<compile_context>
chip_gen: v7x
topology: tpu7x:2x2x1
jax: 0.10.0
libtpu: 0.0.40
codegen_flags: <defaults>
</compile_context>

<pallas_src>
import jax
import jax.numpy as jnp
from jax import lax
from jax.experimental import pallas as pl
from jax.experimental.pallas import tpu as pltpu


def bottleneck_kernel(x_ref, halo_ref, w1_ref, b1_ref, w2_ref, b2_ref,
                      w3_ref, b3_ref, o_ref):
    # x_ref block: (NB, TH, W, Cin)   halo_ref block: (NB, 2, W, Cin)
    NB, TH, W, Cin = x_ref.shape
    wid = w1_ref.shape[1]
    Cout = w3_ref.shape[1]
    M = NB * TH * W
    Mh = NB * 2 * W
    h = pl.program_id(1)
    HS = pl.num_programs(1)

    xm = x_ref[...].reshape(M, Cin)            # bf16; also the residual rows
    xh = halo_ref[...].reshape(Mh, Cin)        # bf16; neighbour-strip rows

    # ---- conv1 (1x1) + BN-bias + ReLU: single matmul over main + halo ------
    xin = jnp.concatenate([xm, xh], axis=0)    # (M + Mh, Cin)
    y1 = jnp.dot(xin, w1_ref[...], preferred_element_type=jnp.float32)
    y1 = jnp.maximum(y1 + b1_ref[...], 0.0).astype(jnp.bfloat16)

    y1m = y1[:M].reshape(NB, TH, W, wid)
    yh = y1[M:].reshape(NB, 2, W, wid)
    # Zero the out-of-image rows in y1 space (see invariant in header).
    top = yh[:, 0:1] * (h > 0).astype(jnp.bfloat16)            # (NB,1,W,wid)
    bot = yh[:, 1:2] * (h < HS - 1).astype(jnp.bfloat16)       # (NB,1,W,wid)
    y1f = jnp.concatenate([top, y1m, bot], axis=1)             # (NB,TH+2,W,wid)

    # ---- conv2 (3x3, stride=1, pad=1): kw-concat buffer + 3 kh matmuls -----
    zc = jnp.zeros((NB, TH + 2, 1, wid), jnp.bfloat16)
    y1p = jnp.concatenate([zc, y1f, zc], axis=2)               # (NB,TH+2,W+2,wid)
    y1kw = jnp.concatenate([y1p[:, :, kw:kw + W, :] for kw in range(3)],
                           axis=-1)                            # (NB,TH+2,W,3*wid)
    acc = jnp.zeros((M, wid), jnp.float32)
    for kh in range(3):                                        # static unroll
        blk = y1kw[:, kh:kh + TH].reshape(M, 3 * wid)
        acc = acc + jnp.dot(blk, w2_ref[kh],
                            preferred_element_type=jnp.float32)
    y2 = jnp.maximum(acc + b2_ref[...], 0.0).astype(jnp.bfloat16)

    # ---- conv3 (1x1) + BN-bias + residual add + ReLU -----------------------
    y3 = jnp.dot(y2, w3_ref[...], preferred_element_type=jnp.float32)
    y3 = y3 + b3_ref[...] + xm.astype(jnp.float32)             # Cin == Cout
    o_ref[...] = jnp.maximum(y3, 0.0).reshape(NB, TH, W, Cout).astype(o_ref.dtype)


def _round_up(n, m):
    return ((n + m - 1) // m) * m


def _pad_axis(a, axis, target):
    pad = target - a.shape[axis]
    if pad == 0:
        return a
    cfg = [(0, 0)] * a.ndim
    cfg[axis] = (0, pad)
    return jnp.pad(a, cfg)


def _vmem_budget():
    """(physical VMEM bytes, tile-selection budget). Generation-aware."""
    phys = 64 * 1024 * 1024                     # conservative (v7x) fallback
    try:
        info = pltpu.get_tpu_info()
        phys = int(getattr(info, "vmem_capacity_bytes", phys))
    except Exception:
        pass
    phys = max(phys, 32 * 1024 * 1024)
    return phys, int(phys * 0.6)


def _vmem_estimate(NB, TH, W, Cin_p, wid_p, Cout_p):
    """Rough per-grid-step VMEM footprint (pipeline buffers + temporaries)."""
    M = NB * TH * W
    Mh = NB * 2 * W
    b = 0
    b += 2 * M * Cin_p * 2                      # x block, 2-buffered, bf16
    b += 2 * Mh * Cin_p * 2                     # halo block, 2-buffered, bf16
    b += 2 * M * Cout_p * 2                     # out block, 2-buffered, bf16
    b += (Cin_p * wid_p + 9 * wid_p * wid_p + wid_p * Cout_p) * 2  # weights
    b += (M + Mh) * Cin_p * 2                   # conv1 input concat (bf16)
    b += (M + Mh) * wid_p * 4                   # conv1 f32 result
    b += M * Cin_p * 4                          # residual f32
    b += 2 * NB * (TH + 2) * (W + 2) * wid_p * 2  # y1 halo/pad copies (bf16)
    b += NB * (TH + 2) * W * 3 * wid_p * 2      # kw-concat buffer (bf16)
    b += M * 3 * wid_p * 2                      # per-kh im2col slice (bf16)
    b += M * wid_p * 4                          # conv2 f32 accumulator
    b += M * Cout_p * 4                         # conv3 f32 result
    return b


def _choose_tiles(N, H, W, Cin_p, wid_p, Cout_p, budget):
    """Largest H-strip fitting the VMEM budget; for small-spatial layers also
    block several batch images per step so matmul M fills the MXU, keeping
    >= 2 grid steps when possible (v7x has 2 TensorCores)."""
    TH = 1
    for th in sorted((d for d in range(1, H + 1) if H % d == 0), reverse=True):
        if _vmem_estimate(1, th, W, Cin_p, wid_p, Cout_p) <= budget:
            TH = th
            break
    NB = 1
    if TH == H:
        for nb in sorted(d for d in range(2, N + 1) if N % d == 0):
            if NB * TH * W >= 256:                    # MXU rows already filled
                break
            if N // nb < 2 and NB * TH * W >= 128:    # keep megacore busy
                break
            if _vmem_estimate(nb, TH, W, Cin_p, wid_p, Cout_p) > budget:
                break
            NB = nb
    return NB, TH


def bottleneck_pallas(x_nhwc, w1, s1, b1, w2, s2, b2, w3, s3, b3,
                      single_buffer_weights=True):
    """x_nhwc: (N,H,W,Cin) f32; w1:(Cin,width); w2: HWIO (3,3,width,width);
    w3:(width,Cout); s*/b*: folded BN scale/bias of shape (1,C).
    Returns NHWC bf16 output of shape (N,H,W,Cout)."""
    N, H, W, Cin = x_nhwc.shape
    width = w1.shape[1]
    Cout = w3.shape[1]
    assert Cin == Cout, "identity residual requires in_planes == planes*4"

    LANE = 128
    Cin_p = _round_up(Cin, LANE)
    wid_p = _round_up(width, LANE)
    Cout_p = _round_up(Cout, LANE)

    # Fold BN scales into conv weights (per output channel); keep biases.
    w1f = w1 * s1.reshape(1, width)
    w2f = w2 * s2.reshape(1, 1, 1, width)
    w3f = w3 * s3.reshape(1, Cout)

    # Pad channel dims to lane multiples; bf16 weights for the MXU.
    w1p = _pad_axis(_pad_axis(w1f, 0, Cin_p), 1, wid_p).astype(jnp.bfloat16)
    w2p = _pad_axis(_pad_axis(w2f, 2, wid_p), 3, wid_p)
    w2p = w2p.reshape(3, 3 * wid_p, wid_p).astype(jnp.bfloat16)  # kh-major, (kw,cin) rows
    w3p = _pad_axis(_pad_axis(w3f, 0, wid_p), 1, Cout_p).astype(jnp.bfloat16)
    b1p = _pad_axis(b1.reshape(1, width), 1, wid_p).astype(jnp.float32)
    b2p = _pad_axis(b2.reshape(1, width), 1, wid_p).astype(jnp.float32)
    b3p = _pad_axis(b3.reshape(1, Cout), 1, Cout_p).astype(jnp.float32)

    # bf16 activation I/O: the block is HBM-bound on all TPU generations.
    xp = _pad_axis(x_nhwc, 3, Cin_p).astype(jnp.bfloat16)

    phys, budget = _vmem_budget()
    NB, TH = _choose_tiles(N, H, W, Cin_p, wid_p, Cout_p, budget)
    HS = H // TH

    # 1-row halo per strip, shipped in a small side array (row above / below).
    # TODO(synk): could be replaced by direct windowed fetch once worthwhile.
    zero_row = jnp.zeros((N, 1, W, Cin_p), xp.dtype)
    top_rows = jnp.concatenate([zero_row, xp[:, TH - 1:H - 1:TH]], axis=1)
    bot_rows = jnp.concatenate([xp[:, TH:H:TH], zero_row], axis=1)
    halo = jnp.stack([top_rows, bot_rows], axis=2).reshape(N, HS * 2, W, Cin_p)

    def wspec(shape):
        ndim = len(shape)
        idx = lambda n, h: (0,) * ndim
        if single_buffer_weights:
            # Grid-invariant operands: a second pipeline buffer is pure waste.
            return pl.BlockSpec(shape, idx, pipeline_mode=pl.Buffered(1))
        return pl.BlockSpec(shape, idx)

    out_p = pl.pallas_call(
        bottleneck_kernel,
        out_shape=jax.ShapeDtypeStruct((N, H, W, Cout_p), jnp.bfloat16),
        grid_spec=pltpu.PrefetchScalarGridSpec(
            num_scalar_prefetch=0,
            grid=(N // NB, HS),
            in_specs=[
                pl.BlockSpec((NB, TH, W, Cin_p), lambda n, h: (n, h, 0, 0)),
                pl.BlockSpec((NB, 2, W, Cin_p), lambda n, h: (n, h, 0, 0)),
                wspec((Cin_p, wid_p)),
                wspec((1, wid_p)),
                wspec((3, 3 * wid_p, wid_p)),
                wspec((1, wid_p)),
                wspec((wid_p, Cout_p)),
                wspec((1, Cout_p)),
            ],
            out_specs=pl.BlockSpec((NB, TH, W, Cout_p),
                                   lambda n, h: (n, h, 0, 0)),
        ),
        compiler_params=pltpu.CompilerParams(
            dimension_semantics=("parallel", "parallel"),
            vmem_limit_bytes=int(phys * 0.85)),
    )(xp, halo, w1p, b1p, w2p, b2p, w3p, b3p)

    return out_p[..., :Cout]


# ---------------- pure-JAX f32 reference (for correctness check) -----------
def _conv_nhwc(x, w_hwio, stride=1, padding=0, dilation=1):
    return lax.conv_general_dilated(
        x, w_hwio, window_strides=(stride, stride),
        padding=[(padding, padding), (padding, padding)],
        rhs_dilation=(dilation, dilation),
        dimension_numbers=("NHWC", "HWIO", "NHWC"))


def bottleneck_ref(x_nhwc, w1, s1, b1, w2, s2, b2, w3, s3, b3):
    Cin, width = w1.shape
    Cout = w3.shape[1]
    y = _conv_nhwc(x_nhwc, w1.reshape(1, 1, Cin, width))
    y = jnp.maximum(y * s1.reshape(1, 1, 1, -1) + b1.reshape(1, 1, 1, -1), 0.0)
    y = _conv_nhwc(y, w2, stride=1, padding=1, dilation=1)
    y = jnp.maximum(y * s2.reshape(1, 1, 1, -1) + b2.reshape(1, 1, 1, -1), 0.0)
    y = _conv_nhwc(y, w3.reshape(1, 1, width, Cout))
    y = y * s3.reshape(1, 1, 1, -1) + b3.reshape(1, 1, 1, -1)
    return jnp.maximum(y + x_nhwc, 0.0)


def _fold_bn(gamma, beta, mean, var, eps=1e-5):
    scale = gamma / jnp.sqrt(var + eps)
    bias = beta - mean * scale
    return scale.reshape(1, -1), bias.reshape(1, -1)


if __name__ == "__main__":
    # Shapes consistent with Bottleneck defaults:
    # in_planes = planes * expansion so the residual add needs no downsample.
    N, H, W = 2, 16, 16
    planes = 4
    in_planes = planes * 4           # 16
    width = planes                   # base_width=64, groups=1 -> width=planes
    Cout = planes * 4                # 16

    key = jax.random.PRNGKey(0)
    ks = jax.random.split(key, 8)

    # Input in PyTorch NCHW layout.
    x_nchw = jax.random.normal(ks[0], (N, in_planes, H, W), jnp.float32)

    # Conv weights in PyTorch (out, in, kh, kw) layout, then transformed.
    w1_pt = jax.random.normal(ks[1], (width, in_planes, 1, 1), jnp.float32) * 0.1
    w2_pt = jax.random.normal(ks[2], (width, width, 3, 3), jnp.float32) * 0.1
    w3_pt = jax.random.normal(ks[3], (Cout, width, 1, 1), jnp.float32) * 0.1

    w1 = w1_pt[:, :, 0, 0].T                       # (Cin, width)
    w2 = jnp.transpose(w2_pt, (2, 3, 1, 0))        # HWIO
    w3 = w3_pt[:, :, 0, 0].T                       # (width, Cout)

    def bn_params(k, c):
        k1, k2, k3, k4 = jax.random.split(k, 4)
        gamma = jax.random.uniform(k1, (c,), jnp.float32, 0.5, 1.5)
        beta = jax.random.normal(k2, (c,), jnp.float32) * 0.1
        mean = jax.random.normal(k3, (c,), jnp.float32) * 0.1
        var = jax.random.uniform(k4, (c,), jnp.float32, 0.5, 1.5)
        return gamma, beta, mean, var

    s1, b1 = _fold_bn(*bn_params(ks[4], width))
    s2, b2 = _fold_bn(*bn_params(ks[5], width))
    s3, b3 = _fold_bn(*bn_params(ks[6], Cout))

    # NCHW -> NHWC for the kernel.
    x_nhwc = jnp.transpose(x_nchw, (0, 2, 3, 1))

    try:
        out_nhwc = jax.block_until_ready(
            bottleneck_pallas(x_nhwc, w1, s1, b1, w2, s2, b2, w3, s3, b3,
                              single_buffer_weights=True))
    except Exception:
        # pl.Buffered(1) is a perf-only hint; retry with default buffering.
        out_nhwc = jax.block_until_ready(
            bottleneck_pallas(x_nhwc, w1, s1, b1, w2, s2, b2, w3, s3, b3,
                              single_buffer_weights=False))

    out_nchw = jnp.transpose(out_nhwc.astype(jnp.float32), (0, 3, 1, 2))

    ref_nhwc = bottleneck_ref(x_nhwc, w1, s1, b1, w2, s2, b2, w3, s3, b3)
    ref_nchw = jnp.transpose(ref_nhwc, (0, 3, 1, 2))

    assert out_nchw.shape == (N, Cout, H, W)
    # bf16 activation I/O + bf16 matmul inputs => looser tolerance than f32.
    assert jnp.allclose(out_nchw, ref_nchw, atol=5e-2, rtol=5e-2), (
        "Pallas kernel output does not match JAX reference")
    print("KERNEL_OK")
</pallas_src>

<mosaic_0001>
module attributes {stable_mosaic.version = 11 : i64} {
  func.func @bottleneck_kernel(%arg0: i32, %arg1: i32, %arg2: memref<1x16x16x128xbf16, #tpu.memory_space<vmem>>, %arg3: memref<1x2x16x128xbf16, #tpu.memory_space<vmem>>, %arg4: memref<128x128xbf16, #tpu.memory_space<vmem>>, %arg5: memref<1x128xf32, #tpu.memory_space<vmem>>, %arg6: memref<3x384x128xbf16, #tpu.memory_space<vmem>>, %arg7: memref<1x128xf32, #tpu.memory_space<vmem>>, %arg8: memref<128x128xbf16, #tpu.memory_space<vmem>>, %arg9: memref<1x128xf32, #tpu.memory_space<vmem>>, %arg10: memref<1x16x16x128xbf16, #tpu.memory_space<vmem>>) attributes {dimension_semantics = [#tpu.dimension_semantics<parallel>, #tpu.dimension_semantics<parallel>], iteration_bounds = array<i64: 2, 1>, scalar_prefetch = 0 : i64, scratch_operands = 0 : i64, tpu.core_type = #tpu.core_type<tc>, window_params = [{transform_indices = @transform_0, window_bounds = array<i64: 1, 16, 16, 128>}, {transform_indices = @transform_1, window_bounds = array<i64: 1, 2, 16, 128>}, {pipeline_mode = #tpu.pipeline_mode<synchronous>, transform_indices = @transform_2, window_bounds = array<i64: 128, 128>}, {pipeline_mode = #tpu.pipeline_mode<synchronous>, transform_indices = @transform_3, window_bounds = array<i64: 1, 128>}, {pipeline_mode = #tpu.pipeline_mode<synchronous>, transform_indices = @transform_4, window_bounds = array<i64: 3, 384, 128>}, {pipeline_mode = #tpu.pipeline_mode<synchronous>, transform_indices = @transform_5, window_bounds = array<i64: 1, 128>}, {pipeline_mode = #tpu.pipeline_mode<synchronous>, transform_indices = @transform_6, window_bounds = array<i64: 128, 128>}, {pipeline_mode = #tpu.pipeline_mode<synchronous>, transform_indices = @transform_7, window_bounds = array<i64: 1, 128>}, {transform_indices = @transform_8, window_bounds = array<i64: 1, 16, 16, 128>}]} {
    %c0 = arith.constant 0 : index
    %c0_0 = arith.constant 0 : index
    %c0_1 = arith.constant 0 : index
    %c0_2 = arith.constant 0 : index
    %0 = vector.load %arg2[%c0, %c0_0, %c0_1, %c0_2] : memref<1x16x16x128xbf16, #tpu.memory_space<vmem>>, vector<1x16x16x128xbf16>
    %1 = vector.shape_cast %0 : vector<1x16x16x128xbf16> to vector<256x128xbf16>
    %c0_3 = arith.constant 0 : index
    %c0_4 = arith.constant 0 : index
    %c0_5 = arith.constant 0 : index
    %c0_6 = arith.constant 0 : index
    %2 = vector.load %arg3[%c0_3, %c0_4, %c0_5, %c0_6] : memref<1x2x16x128xbf16, #tpu.memory_space<vmem>>, vector<1x2x16x128xbf16>
    %3 = vector.shape_cast %2 : vector<1x2x16x128xbf16> to vector<32x128xbf16>
    %4 = tpu.concatenate %1, %3 in 0 : vector<256x128xbf16>, vector<32x128xbf16> -> vector<288x128xbf16>
    %c0_7 = arith.constant 0 : index
    %c0_8 = arith.constant 0 : index
    %5 = vector.load %arg4[%c0_7, %c0_8] : memref<128x128xbf16, #tpu.memory_space<vmem>>, vector<128x128xbf16>
    %cst = arith.constant dense<0.000000e+00> : vector<288x128xf32>
    %6 = tpu.matmul %4, %5, %cst {dimension_numbers = #tpu.dot_dimension_numbers<[1], [0], [0], [1], [0, 0, 1, 1], [], []>} : vector<288x128xbf16>, vector<128x128xbf16>, vector<288x128xf32> -> vector<288x128xf32>
    %c0_9 = arith.constant 0 : index
    %c0_10 = arith.constant 0 : index
    %7 = vector.load %arg5[%c0_9, %c0_10] : memref<1x128xf32, #tpu.memory_space<vmem>>, vector<1x128xf32>
    %8 = vector.broadcast %7 : vector<1x128xf32> to vector<288x128xf32>
    %9 = arith.addf %6, %8 : vector<288x128xf32>
    %cst_11 = arith.constant 0.000000e+00 : f32
    %10 = vector.broadcast %cst_11 : f32 to vector<288x128xf32>
    %11 = arith.maximumf %9, %10 : vector<288x128xf32>
    %12 = arith.truncf %11 : vector<288x128xf32> to vector<288x128xbf16>
    %13 = vector.extract_strided_slice %12 {offsets = [0, 0], sizes = [256, 128], strides = [1, 1]} : vector<288x128xbf16> to vector<256x128xbf16>
    %14 = vector.shape_cast %13 : vector<256x128xbf16> to vector<1x16x16x128xbf16>
    %15 = vector.extract_strided_slice %12 {offsets = [256, 0], sizes = [32, 128], strides = [1, 1]} : vector<288x128xbf16> to vector<32x128xbf16>
    %16 = vector.shape_cast %15 : vector<32x128xbf16> to vector<1x2x16x128xbf16>
    %17 = vector.extract_strided_slice %16 {offsets = [0, 0, 0, 0], sizes = [1, 1, 16, 128], strides = [1, 1, 1, 1]} : vector<1x2x16x128xbf16> to vector<1x1x16x128xbf16>
    %c0_i32 = arith.constant 0 : i32
    %18 = arith.cmpi sgt, %arg1, %c0_i32 : i32
    %19 = arith.extui %18 : i1 to i32
    %20 = arith.sitofp %19 : i32 to f32
    %21 = arith.truncf %20 : f32 to bf16
    %22 = vector.broadcast %21 : bf16 to vector<1x1x16x128xbf16>
    %23 = arith.mulf %17, %22 : vector<1x1x16x128xbf16>
    %24 = vector.extract_strided_slice %16 {offsets = [0, 1, 0, 0], sizes = [1, 1, 16, 128], strides = [1, 1, 1, 1]} : vector<1x2x16x128xbf16> to vector<1x1x16x128xbf16>
    %c0_i32_12 = arith.constant 0 : i32
    %25 = arith.cmpi slt, %arg1, %c0_i32_12 : i32
    %26 = arith.extui %25 : i1 to i32
    %27 = arith.sitofp %26 : i32 to f32
    %28 = arith.truncf %27 : f32 to bf16
    %29 = vector.broadcast %28 : bf16 to vector<1x1x16x128xbf16>
    %30 = arith.mulf %24, %29 : vector<1x1x16x128xbf16>
    %31 = tpu.concatenate %23, %14, %30 in 1 : vector<1x1x16x128xbf16>, vector<1x16x16x128xbf16>, vector<1x1x16x128xbf16> -> vector<1x18x16x128xbf16>
    %cst_13 = arith.constant 0.000000e+00 : bf16
    %32 = vector.broadcast %cst_13 : bf16 to vector<1x18x1x128xbf16>
    %33 = tpu.concatenate %32, %31, %32 in 2 : vector<1x18x1x128xbf16>, vector<1x18x16x128xbf16>, vector<1x18x1x128xbf16> -> vector<1x18x18x128xbf16>
    %34 = vector.extract_strided_slice %33 {offsets = [0, 0, 0, 0], sizes = [1, 18, 16, 128], strides = [1, 1, 1, 1]} : vector<1x18x18x128xbf16> to vector<1x18x16x128xbf16>
    %35 = vector.extract_strided_slice %33 {offsets = [0, 0, 1, 0], sizes = [1, 18, 16, 128], strides = [1, 1, 1, 1]} : vector<1x18x18x128xbf16> to vector<1x18x16x128xbf16>
    %36 = vector.extract_strided_slice %33 {offsets = [0, 0, 2, 0], sizes = [1, 18, 16, 128], strides = [1, 1, 1, 1]} : vector<1x18x18x128xbf16> to vector<1x18x16x128xbf16>
    %37 = tpu.concatenate %34, %35, %36 in 3 : vector<1x18x16x128xbf16>, vector<1x18x16x128xbf16>, vector<1x18x16x128xbf16> -> vector<1x18x16x384xbf16>
    %cst_14 = arith.constant 0.000000e+00 : f32
    %38 = vector.broadcast %cst_14 : f32 to vector<256x128xf32>
    %39 = vector.extract_strided_slice %37 {offsets = [0, 0, 0, 0], sizes = [1, 16, 16, 384], strides = [1, 1, 1, 1]} : vector<1x18x16x384xbf16> to vector<1x16x16x384xbf16>
    %40 = vector.shape_cast %39 : vector<1x16x16x384xbf16> to vector<256x384xbf16>
    %c0_15 = arith.constant 0 : index
    %c0_16 = arith.constant 0 : index
    %c0_17 = arith.constant 0 : index
    %41 = vector.load %arg6[%c0_15, %c0_16, %c0_17] : memref<3x384x128xbf16, #tpu.memory_space<vmem>>, vector<1x384x128xbf16>
    %42 = vector.shape_cast %41 : vector<1x384x128xbf16> to vector<384x128xbf16>
    %cst_18 = arith.constant dense<0.000000e+00> : vector<256x128xf32>
    %43 = tpu.matmul %40, %42, %cst_18 {dimension_numbers = #tpu.dot_dimension_numbers<[1], [0], [0], [1], [0, 0, 1, 1], [], []>} : vector<256x384xbf16>, vector<384x128xbf16>, vector<256x128xf32> -> vector<256x128xf32>
    %44 = arith.addf %38, %43 : vector<256x128xf32>
    %45 = vector.extract_strided_slice %37 {offsets = [0, 1, 0, 0], sizes = [1, 16, 16, 384], strides = [1, 1, 1, 1]} : vector<1x18x16x384xbf16> to vector<1x16x16x384xbf16>
    %46 = vector.shape_cast %45 : vector<1x16x16x384xbf16> to vector<256x384xbf16>
    %c1 = arith.constant 1 : index
    %c0_19 = arith.constant 0 : index
    %c0_20 = arith.constant 0 : index
    %47 = vector.load %arg6[%c1, %c0_19, %c0_20] : memref<3x384x128xbf16, #tpu.memory_space<vmem>>, vector<1x384x128xbf16>
    %48 = vector.shape_cast %47 : vector<1x384x128xbf16> to vector<384x128xbf16>
    %cst_21 = arith.constant dense<0.000000e+00> : vector<256x128xf32>
    %49 = tpu.matmul %46, %48, %cst_21 {dimension_numbers = #tpu.dot_dimension_numbers<[1], [0], [0], [1], [0, 0, 1, 1], [], []>} : vector<256x384xbf16>, vector<384x128xbf16>, vector<256x128xf32> -> vector<256x128xf32>
    %50 = arith.addf %44, %49 : vector<256x128xf32>
    %51 = vector.extract_strided_slice %37 {offsets = [0, 2, 0, 0], sizes = [1, 16, 16, 384], strides = [1, 1, 1, 1]} : vector<1x18x16x384xbf16> to vector<1x16x16x384xbf16>
    %52 = vector.shape_cast %51 : vector<1x16x16x384xbf16> to vector<256x384xbf16>
    %c2 = arith.constant 2 : index
    %c0_22 = arith.constant 0 : index
    %c0_23 = arith.constant 0 : index
    %53 = vector.load %arg6[%c2, %c0_22, %c0_23] : memref<3x384x128xbf16, #tpu.memory_space<vmem>>, vector<1x384x128xbf16>
    %54 = vector.shape_cast %53 : vector<1x384x128xbf16> to vector<384x128xbf16>
    %cst_24 = arith.constant dense<0.000000e+00> : vector<256x128xf32>
    %55 = tpu.matmul %52, %54, %cst_24 {dimension_numbers = #tpu.dot_dimension_numbers<[1], [0], [0], [1], [0, 0, 1, 1], [], []>} : vector<256x384xbf16>, vector<384x128xbf16>, vector<256x128xf32> -> vector<256x128xf32>
    %56 = arith.addf %50, %55 : vector<256x128xf32>
    %c0_25 = arith.constant 0 : index
    %c0_26 = arith.constant 0 : index
    %57 = vector.load %arg7[%c0_25, %c0_26] : memref<1x128xf32, #tpu.memory_space<vmem>>, vector<1x128xf32>
    %58 = vector.broadcast %57 : vector<1x128xf32> to vector<256x128xf32>
    %59 = arith.addf %56, %58 : vector<256x128xf32>
    %cst_27 = arith.constant 0.000000e+00 : f32
    %60 = vector.broadcast %cst_27 : f32 to vector<256x128xf32>
    %61 = arith.maximumf %59, %60 : vector<256x128xf32>
    %62 = arith.truncf %61 : vector<256x128xf32> to vector<256x128xbf16>
    %c0_28 = arith.constant 0 : index
    %c0_29 = arith.constant 0 : index
    %63 = vector.load %arg8[%c0_28, %c0_29] : memref<128x128xbf16, #tpu.memory_space<vmem>>, vector<128x128xbf16>
    %cst_30 = arith.constant dense<0.000000e+00> : vector<256x128xf32>
    %64 = tpu.matmul %62, %63, %cst_30 {dimension_numbers = #tpu.dot_dimension_numbers<[1], [0], [0], [1], [0, 0, 1, 1], [], []>} : vector<256x128xbf16>, vector<128x128xbf16>, vector<256x128xf32> -> vector<256x128xf32>
    %c0_31 = arith.constant 0 : index
    %c0_32 = arith.constant 0 : index
    %65 = vector.load %arg9[%c0_31, %c0_32] : memref<1x128xf32, #tpu.memory_space<vmem>>, vector<1x128xf32>
    %66 = vector.broadcast %65 : vector<1x128xf32> to vector<256x128xf32>
    %67 = arith.addf %64, %66 : vector<256x128xf32>
    %68 = arith.extf %1 : vector<256x128xbf16> to vector<256x128xf32>
    %69 = arith.addf %67, %68 : vector<256x128xf32>
    %cst_33 = arith.constant 0.000000e+00 : f32
    %70 = vector.broadcast %cst_33 : f32 to vector<256x128xf32>
    %71 = arith.maximumf %69, %70 : vector<256x128xf32>
    %72 = vector.shape_cast %71 : vector<256x128xf32> to vector<1x16x16x128xf32>
    %73 = arith.truncf %72 : vector<1x16x16x128xf32> to vector<1x16x16x128xbf16>
    %c0_34 = arith.constant 0 : index
    %c0_35 = arith.constant 0 : index
    %c0_36 = arith.constant 0 : index
    %c0_37 = arith.constant 0 : index
    %74 = vector.load %arg10[%c0_34, %c0_35, %c0_36, %c0_37] : memref<1x16x16x128xbf16, #tpu.memory_space<vmem>>, vector<1x16x16x128xbf16>
    tpu.vector_store %arg10[%c0_34, %c0_35, %c0_36, %c0_37], %73 {strides = array<i32>} : memref<1x16x16x128xbf16, #tpu.memory_space<vmem>>, vector<1x16x16x128xbf16>,
    return
  }
  func.func @transform_0(%arg0: i32, %arg1: i32) -> (i32, i32, i32, i32) {
    %c0_i32 = arith.constant 0 : i32
    %c0_i32_0 = arith.constant 0 : i32
    %c0_i32_1 = arith.constant 0 : i32
    return %arg0, %arg1, %c0_i32, %c0_i32_0 : i32, i32, i32, i32
  }
  func.func @transform_1(%arg0: i32, %arg1: i32) -> (i32, i32, i32, i32) {
    %c0_i32 = arith.constant 0 : i32
    %c0_i32_0 = arith.constant 0 : i32
    %c0_i32_1 = arith.constant 0 : i32
    return %arg0, %arg1, %c0_i32, %c0_i32_0 : i32, i32, i32, i32
  }
  func.func @transform_2(%arg0: i32, %arg1: i32) -> (i32, i32) {
    %c0_i32 = arith.constant 0 : i32
    %c0_i32_0 = arith.constant 0 : i32
    %c0_i32_1 = arith.constant 0 : i32
    return %c0_i32, %c0_i32_0 : i32, i32
  }
  func.func @transform_3(%arg0: i32, %arg1: i32) -> (i32, i32) {
    %c0_i32 = arith.constant 0 : i32
    %c0_i32_0 = arith.constant 0 : i32
    %c0_i32_1 = arith.constant 0 : i32
    return %c0_i32, %c0_i32_0 : i32, i32
  }
  func.func @transform_4(%arg0: i32, %arg1: i32) -> (i32, i32, i32) {
    %c0_i32 = arith.constant 0 : i32
    %c0_i32_0 = arith.constant 0 : i32
    %c0_i32_1 = arith.constant 0 : i32
    %c0_i32_2 = arith.constant 0 : i32
    return %c0_i32, %c0_i32_0, %c0_i32_1 : i32, i32, i32
  }
  func.func @transform_5(%arg0: i32, %arg1: i32) -> (i32, i32) {
    %c0_i32 = arith.constant 0 : i32
    %c0_i32_0 = arith.constant 0 : i32
    %c0_i32_1 = arith.constant 0 : i32
    return %c0_i32, %c0_i32_0 : i32, i32
  }
  func.func @transform_6(%arg0: i32, %arg1: i32) -> (i32, i32) {
    %c0_i32 = arith.constant 0 : i32
    %c0_i32_0 = arith.constant 0 : i32
    %c0_i32_1 = arith.constant 0 : i32
    return %c0_i32, %c0_i32_0 : i32, i32
  }
  func.func @transform_7(%arg0: i32, %arg1: i32) -> (i32, i32) {
    %c0_i32 = arith.constant 0 : i32
    %c0_i32_0 = arith.constant 0 : i32
    %c0_i32_1 = arith.constant 0 : i32
    return %c0_i32, %c0_i32_0 : i32, i32
  }
  func.func @transform_8(%arg0: i32, %arg1: i32) -> (i32, i32, i32, i32) {
    %c0_i32 = arith.constant 0 : i32
    %c0_i32_0 = arith.constant 0 : i32
    %c0_i32_1 = arith.constant 0 : i32
    return %arg0, %arg1, %c0_i32, %c0_i32_0 : i32, i32, i32, i32
  }
}

module attributes {stable_mosaic.version = 11 : i64} {
  func.func @bottleneck_kernel(%arg0: i32, %arg1: i32, %arg2: memref<1x16x16x128xbf16, #tpu.memory_space<vmem>>, %arg3: memref<1x2x16x128xbf16, #tpu.memory_space<vmem>>, %arg4: memref<128x128xbf16, #tpu.memory_space<vmem>>, %arg5: memref<1x128xf32, #tpu.memory_space<vmem>>, %arg6: memref<3x384x128xbf16, #tpu.memory_space<vmem>>, %arg7: memref<1x128xf32, #tpu.memory_space<vmem>>, %arg8: memref<128x128xbf16, #tpu.memory_space<vmem>>, %arg9: memref<1x128xf32, #tpu.memory_space<vmem>>, %arg10: memref<1x16x16x128xbf16, #tpu.memory_space<vmem>>) attributes {dimension_semantics = [#tpu.dimension_semantics<parallel>, #tpu.dimension_semantics<parallel>], iteration_bounds = array<i64: 2, 1>, scalar_prefetch = 0 : i64, scratch_operands = 0 : i64, tpu.core_type = #tpu.core_type<tc>, window_params = [{transform_indices = @transform_0, window_bounds = array<i64: 1, 16, 16, 128>}, {transform_indices = @transform_1, window_bounds = array<i64: 1, 2, 16, 128>}, {pipeline_mode = #tpu.pipeline_mode<synchronous>, transform_indices = @transform_2, window_bounds = array<i64: 128, 128>}, {pipeline_mode = #tpu.pipeline_mode<synchronous>, transform_indices = @transform_3, window_bounds = array<i64: 1, 128>}, {pipeline_mode = #tpu.pipeline_mode<synchronous>, transform_indices = @transform_4, window_bounds = array<i64: 3, 384, 128>}, {pipeline_mode = #tpu.pipeline_mode<synchronous>, transform_indices = @transform_5, window_bounds = array<i64: 1, 128>}, {pipeline_mode = #tpu.pipeline_mode<synchronous>, transform_indices = @transform_6, window_bounds = array<i64: 128, 128>}, {pipeline_mode = #tpu.pipeline_mode<synchronous>, transform_indices = @transform_7, window_bounds = array<i64: 1, 128>}, {transform_indices = @transform_8, window_bounds = array<i64: 1, 16, 16, 128>}]} {
    %c0 = arith.constant 0 : index
    %c0_0 = arith.constant 0 : index
    %c0_1 = arith.constant 0 : index
    %c0_2 = arith.constant 0 : index
    %0 = vector.load %arg2[%c0, %c0_0, %c0_1, %c0_2] : memref<1x16x16x128xbf16, #tpu.memory_space<vmem>>, vector<1x16x16x128xbf16>
    %1 = vector.shape_cast %0 : vector<1x16x16x128xbf16> to vector<256x128xbf16>
    %c0_3 = arith.constant 0 : index
    %c0_4 = arith.constant 0 : index
    %c0_5 = arith.constant 0 : index
    %c0_6 = arith.constant 0 : index
    %2 = vector.load %arg3[%c0_3, %c0_4, %c0_5, %c0_6] : memref<1x2x16x128xbf16, #tpu.memory_space<vmem>>, vector<1x2x16x128xbf16>
    %3 = vector.shape_cast %2 : vector<1x2x16x128xbf16> to vector<32x128xbf16>
    %4 = tpu.concatenate %1, %3 in 0 : vector<256x128xbf16>, vector<32x128xbf16> -> vector<288x128xbf16>
    %c0_7 = arith.constant 0 : index
    %c0_8 = arith.constant 0 : index
    %5 = vector.load %arg4[%c0_7, %c0_8] : memref<128x128xbf16, #tpu.memory_space<vmem>>, vector<128x128xbf16>
    %cst = arith.constant dense<0.000000e+00> : vector<288x128xf32>
    %6 = tpu.matmul %4, %5, %cst {dimension_numbers = #tpu.dot_dimension_numbers<[1], [0], [0], [1], [0, 0, 1, 1], [], []>} : vector<288x128xbf16>, vector<128x128xbf16>, vector<288x128xf32> -> vector<288x128xf32>
    %c0_9 = arith.constant 0 : index
    %c0_10 = arith.constant 0 : index
    %7 = vector.load %arg5[%c0_9, %c0_10] : memref<1x128xf32, #tpu.memory_space<vmem>>, vector<1x128xf32>
    %8 = vector.broadcast %7 : vector<1x128xf32> to vector<288x128xf32>
    %9 = arith.addf %6, %8 : vector<288x128xf32>
    %cst_11 = arith.constant 0.000000e+00 : f32
    %10 = vector.broadcast %cst_11 : f32 to vector<288x128xf32>
    %11 = arith.maximumf %9, %10 : vector<288x128xf32>
    %12 = arith.truncf %11 : vector<288x128xf32> to vector<288x128xbf16>
    %13 = vector.extract_strided_slice %12 {offsets = [0, 0], sizes = [256, 128], strides = [1, 1]} : vector<288x128xbf16> to vector<256x128xbf16>
    %14 = vector.shape_cast %13 : vector<256x128xbf16> to vector<1x16x16x128xbf16>
    %15 = vector.extract_strided_slice %12 {offsets = [256, 0], sizes = [32, 128], strides = [1, 1]} : vector<288x128xbf16> to vector<32x128xbf16>
    %16 = vector.shape_cast %15 : vector<32x128xbf16> to vector<1x2x16x128xbf16>
    %17 = vector.extract_strided_slice %16 {offsets = [0, 0, 0, 0], sizes = [1, 1, 16, 128], strides = [1, 1, 1, 1]} : vector<1x2x16x128xbf16> to vector<1x1x16x128xbf16>
    %c0_i32 = arith.constant 0 : i32
    %18 = arith.cmpi sgt, %arg1, %c0_i32 : i32
    %19 = arith.extui %18 : i1 to i32
    %20 = arith.sitofp %19 : i32 to f32
    %21 = arith.truncf %20 : f32 to bf16
    %22 = vector.broadcast %21 : bf16 to vector<1x1x16x128xbf16>
    %23 = arith.mulf %17, %22 : vector<1x1x16x128xbf16>
    %24 = vector.extract_strided_slice %16 {offsets = [0, 1, 0, 0], sizes = [1, 1, 16, 128], strides = [1, 1, 1, 1]} : vector<1x2x16x128xbf16> to vector<1x1x16x128xbf16>
    %c0_i32_12 = arith.constant 0 : i32
    %25 = arith.cmpi slt, %arg1, %c0_i32_12 : i32
    %26 = arith.extui %25 : i1 to i32
    %27 = arith.sitofp %26 : i32 to f32
    %28 = arith.truncf %27 : f32 to bf16
    %29 = vector.broadcast %28 : bf16 to vector<1x1x16x128xbf16>
    %30 = arith.mulf %24, %29 : vector<1x1x16x128xbf16>
    %31 = tpu.concatenate %23, %14, %30 in 1 : vector<1x1x16x128xbf16>, vector<1x16x16x128xbf16>, vector<1x1x16x128xbf16> -> vector<1x18x16x128xbf16>
    %cst_13 = arith.constant 0.000000e+00 : bf16
    %32 = vector.broadcast %cst_13 : bf16 to vector<1x18x1x128xbf16>
    %33 = tpu.concatenate %32, %31, %32 in 2 : vector<1x18x1x128xbf16>, vector<1x18x16x128xbf16>, vector<1x18x1x128xbf16> -> vector<1x18x18x128xbf16>
    %34 = vector.extract_strided_slice %33 {offsets = [0, 0, 0, 0], sizes = [1, 18, 16, 128], strides = [1, 1, 1, 1]} : vector<1x18x18x128xbf16> to vector<1x18x16x128xbf16>
    %35 = vector.extract_strided_slice %33 {offsets = [0, 0, 1, 0], sizes = [1, 18, 16, 128], strides = [1, 1, 1, 1]} : vector<1x18x18x128xbf16> to vector<1x18x16x128xbf16>
    %36 = vector.extract_strided_slice %33 {offsets = [0, 0, 2, 0], sizes = [1, 18, 16, 128], strides = [1, 1, 1, 1]} : vector<1x18x18x128xbf16> to vector<1x18x16x128xbf16>
    %37 = tpu.concatenate %34, %35, %36 in 3 : vector<1x18x16x128xbf16>, vector<1x18x16x128xbf16>, vector<1x18x16x128xbf16> -> vector<1x18x16x384xbf16>
    %cst_14 = arith.constant 0.000000e+00 : f32
    %38 = vector.broadcast %cst_14 : f32 to vector<256x128xf32>
    %39 = vector.extract_strided_slice %37 {offsets = [0, 0, 0, 0], sizes = [1, 16, 16, 384], strides = [1, 1, 1, 1]} : vector<1x18x16x384xbf16> to vector<1x16x16x384xbf16>
    %40 = vector.shape_cast %39 : vector<1x16x16x384xbf16> to vector<256x384xbf16>
    %c0_15 = arith.constant 0 : index
    %c0_16 = arith.constant 0 : index
    %c0_17 = arith.constant 0 : index
    %41 = vector.load %arg6[%c0_15, %c0_16, %c0_17] : memref<3x384x128xbf16, #tpu.memory_space<vmem>>, vector<1x384x128xbf16>
    %42 = vector.shape_cast %41 : vector<1x384x128xbf16> to vector<384x128xbf16>
    %cst_18 = arith.constant dense<0.000000e+00> : vector<256x128xf32>
    %43 = tpu.matmul %40, %42, %cst_18 {dimension_numbers = #tpu.dot_dimension_numbers<[1], [0], [0], [1], [0, 0, 1, 1], [], []>} : vector<256x384xbf16>, vector<384x128xbf16>, vector<256x128xf32> -> vector<256x128xf32>
    %44 = arith.addf %38, %43 : vector<256x128xf32>
    %45 = vector.extract_strided_slice %37 {offsets = [0, 1, 0, 0], sizes = [1, 16, 16, 384], strides = [1, 1, 1, 1]} : vector<1x18x16x384xbf16> to vector<1x16x16x384xbf16>
    %46 = vector.shape_cast %45 : vector<1x16x16x384xbf16> to vector<256x384xbf16>
    %c1 = arith.constant 1 : index
    %c0_19 = arith.constant 0 : index
    %c0_20 = arith.constant 0 : index
    %47 = vector.load %arg6[%c1, %c0_19, %c0_20] : memref<3x384x128xbf16, #tpu.memory_space<vmem>>, vector<1x384x128xbf16>
    %48 = vector.shape_cast %47 : vector<1x384x128xbf16> to vector<384x128xbf16>
    %cst_21 = arith.constant dense<0.000000e+00> : vector<256x128xf32>
    %49 = tpu.matmul %46, %48, %cst_21 {dimension_numbers = #tpu.dot_dimension_numbers<[1], [0], [0], [1], [0, 0, 1, 1], [], []>} : vector<256x384xbf16>, vector<384x128xbf16>, vector<256x128xf32> -> vector<256x128xf32>
    %50 = arith.addf %44, %49 : vector<256x128xf32>
    %51 = vector.extract_strided_slice %37 {offsets = [0, 2, 0, 0], sizes = [1, 16, 16, 384], strides = [1, 1, 1, 1]} : vector<1x18x16x384xbf16> to vector<1x16x16x384xbf16>
    %52 = vector.shape_cast %51 : vector<1x16x16x384xbf16> to vector<256x384xbf16>
    %c2 = arith.constant 2 : index
    %c0_22 = arith.constant 0 : index
    %c0_23 = arith.constant 0 : index
    %53 = vector.load %arg6[%c2, %c0_22, %c0_23] : memref<3x384x128xbf16, #tpu.memory_space<vmem>>, vector<1x384x128xbf16>
    %54 = vector.shape_cast %53 : vector<1x384x128xbf16> to vector<384x128xbf16>
    %cst_24 = arith.constant dense<0.000000e+00> : vector<256x128xf32>
    %55 = tpu.matmul %52, %54, %cst_24 {dimension_numbers = #tpu.dot_dimension_numbers<[1], [0], [0], [1], [0, 0, 1, 1], [], []>} : vector<256x384xbf16>, vector<384x128xbf16>, vector<256x128xf32> -> vector<256x128xf32>
    %56 = arith.addf %50, %55 : vector<256x128xf32>
    %c0_25 = arith.constant 0 : index
    %c0_26 = arith.constant 0 : index
    %57 = vector.load %arg7[%c0_25, %c0_26] : memref<1x128xf32, #tpu.memory_space<vmem>>, vector<1x128xf32>
    %58 = vector.broadcast %57 : vector<1x128xf32> to vector<256x128xf32>
    %59 = arith.addf %56, %58 : vector<256x128xf32>
    %cst_27 = arith.constant 0.000000e+00 : f32
    %60 = vector.broadcast %cst_27 : f32 to vector<256x128xf32>
    %61 = arith.maximumf %59, %60 : vector<256x128xf32>
    %62 = arith.truncf %61 : vector<256x128xf32> to vector<256x128xbf16>
    %c0_28 = arith.constant 0 : index
    %c0_29 = arith.constant 0 : index
    %63 = vector.load %arg8[%c0_28, %c0_29] : memref<128x128xbf16, #tpu.memory_space<vmem>>, vector<128x128xbf16>
    %cst_30 = arith.constant dense<0.000000e+00> : vector<256x128xf32>
    %64 = tpu.matmul %62, %63, %cst_30 {dimension_numbers = #tpu.dot_dimension_numbers<[1], [0], [0], [1], [0, 0, 1, 1], [], []>} : vector<256x128xbf16>, vector<128x128xbf16>, vector<256x128xf32> -> vector<256x128xf32>
    %c0_31 = arith.constant 0 : index
    %c0_32 = arith.constant 0 : index
    %65 = vector.load %arg9[%c0_31, %c0_32] : memref<1x128xf32, #tpu.memory_space<vmem>>, vector<1x128xf32>
    %66 = vector.broadcast %65 : vector<1x128xf32> to vector<256x128xf32>
    %67 = arith.addf %64, %66 : vector<256x128xf32>
    %68 = arith.extf %1 : vector<256x128xbf16> to vector<256x128xf32>
    %69 = arith.addf %67, %68 : vector<256x128xf32>
    %cst_33 = arith.constant 0.000000e+00 : f32
    %70 = vector.broadcast %cst_33 : f32 to vector<256x128xf32>
    %71 = arith.maximumf %69, %70 : vector<256x128xf32>
    %72 = vector.shape_cast %71 : vector<256x128xf32> to vector<1x16x16x128xf32>
    %73 = arith.truncf %72 : vector<1x16x16x128xf32> to vector<1x16x16x128xbf16>
    %c0_34 = arith.constant 0 : index
    %c0_35 = arith.constant 0 : index
    %c0_36 = arith.constant 0 : index
    %c0_37 = arith.constant 0 : index
    %74 = vector.load %arg10[%c0_34, %c0_35, %c0_36, %c0_37] : memref<1x16x16x128xbf16, #tpu.memory_space<vmem>>, vector<1x16x16x128xbf16>
    tpu.vector_store %arg10[%c0_34, %c0_35, %c0_36, %c0_37], %73 {strides = array<i32>} : memref<1x16x16x128xbf16, #tpu.memory_space<vmem>>, vector<1x16x16x128xbf16>,
    return
  }
  func.func @transform_0(%arg0: i32, %arg1: i32) -> (i32, i32, i32, i32) {
    %c0_i32 = arith.constant 0 : i32
    %c0_i32_0 = arith.constant 0 : i32
    %c0_i32_1 = arith.constant 0 : i32
    return %arg0, %arg1, %c0_i32, %c0_i32_0 : i32, i32, i32, i32
  }
  func.func @transform_1(%arg0: i32, %arg1: i32) -> (i32, i32, i32, i32) {
    %c0_i32 = arith.constant 0 : i32
    %c0_i32_0 = arith.constant 0 : i32
    %c0_i32_1 = arith.constant 0 : i32
    return %arg0, %arg1, %c0_i32, %c0_i32_0 : i32, i32, i32, i32
  }
  func.func @transform_2(%arg0: i32, %arg1: i32) -> (i32, i32) {
    %c0_i32 = arith.constant 0 : i32
    %c0_i32_0 = arith.constant 0 : i32
    %c0_i32_1 = arith.constant 0 : i32
    return %c0_i32, %c0_i32_0 : i32, i32
  }
  func.func @transform_3(%arg0: i32, %arg1: i32) -> (i32, i32) {
    %c0_i32 = arith.constant 0 : i32
    %c0_i32_0 = arith.constant 0 : i32
    %c0_i32_1 = arith.constant 0 : i32
    return %c0_i32, %c0_i32_0 : i32, i32
  }
  func.func @transform_4(%arg0: i32, %arg1: i32) -> (i32, i32, i32) {
    %c0_i32 = arith.constant 0 : i32
    %c0_i32_0 = arith.constant 0 : i32
    %c0_i32_1 = arith.constant 0 : i32
    %c0_i32_2 = arith.constant 0 : i32
    return %c0_i32, %c0_i32_0, %c0_i32_1 : i32, i32, i32
  }
  func.func @transform_5(%arg0: i32, %arg1: i32) -> (i32, i32) {
    %c0_i32 = arith.constant 0 : i32
    %c0_i32_0 = arith.constant 0 : i32
    %c0_i32_1 = arith.constant 0 : i32
    return %c0_i32, %c0_i32_0 : i32, i32
  }
  func.func @transform_6(%arg0: i32, %arg1: i32) -> (i32, i32) {
    %c0_i32 = arith.constant 0 : i32
    %c0_i32_0 = arith.constant 0 : i32
    %c0_i32_1 = arith.constant 0 : i32
    return %c0_i32, %c0_i32_0 : i32, i32
  }
  func.func @transform_7(%arg0: i32, %arg1: i32) -> (i32, i32) {
    %c0_i32 = arith.constant 0 : i32
    %c0_i32_0 = arith.constant 0 : i32
    %c0_i32_1 = arith.constant 0 : i32
    return %c0_i32, %c0_i32_0 : i32, i32
  }
  func.func @transform_8(%arg0: i32, %arg1: i32) -> (i32, i32, i32, i32) {
    %c0_i32 = arith.constant 0 : i32
    %c0_i32_0 = arith.constant 0 : i32
    %c0_i32_1 = arith.constant 0 : i32
    return %arg0, %arg1, %c0_i32, %c0_i32_0 : i32, i32, i32, i32
  }
}

</mosaic_0001>

<bundles_post_ra>
// kernel: tpu_custom_call.1
= control target key start
LH: loop header
LB: loop body
LE: loop exit
PB: predicated region body
PF: predicated region fallthrough
CT: control target
= control target key end

     0   :  { %s6797_s0 = inlined_call_operand.hbm [shape: bf16[2,16,16,128], index: 0, kind: input, shape index: {}]   ;;  %s6798_s1 = inlined_call_operand.hbm [shape: bf16[2,2,16,128], index: 1, kind: input, shape index: {}]   ;;  %s6799_s2 = inlined_call_operand.hbm [shape: bf16[128,128], index: 2, kind: input, shape index: {}]   ;;  %s6800_s3 = inlined_call_operand.vmem [shape: f32[1,128], index: 3, kind: input, shape index: {}]   ;;  %s6801_s4 = inlined_call_operand.hbm [shape: bf16[3,384,128], index: 4, kind: input, shape index: {}]   ;;  %s6802_s5 = inlined_call_operand.vmem [shape: f32[1,128], index: 5, kind: input, shape index: {}]   ;;  %s6803_s6 = inlined_call_operand.hbm [shape: bf16[128,128], index: 6, kind: input, shape index: {}]   ;;  %s6804_s7 = inlined_call_operand.vmem [shape: f32[1,128], index: 7, kind: input, shape index: {}]   ;;  %s6805_s8 = inlined_call_operand.hbm [shape: bf16[2,16,16,128], index: 8, kind: output, shape index: {}]  }
   0x1   :  { %6818 = sst [smem:[#allocation22_spill]] %s6797_s0 }
   0x2   :  { %6819 = sst [smem:[#allocation23_spill]] %s6799_s2 }
   0x3   :  { %6820 = sst [smem:[#allocation24_spill]] %s6801_s4 }
   0x4   :  { %6821 = sst [smem:[#allocation25_spill]] %s6803_s6 }
   0x5   :  { %6822 = sst [smem:[#allocation26_spill]] %s6805_s8 }
   0x6   :  { %13 = vsyncpa [#allocation3], 0 }
   0x7   :  { %15 = vsyncpa [#allocation3 + $0x1], 0 }
   0x8   :  { %16 = vsyncpa [#allocation6], 0 }
   0x9   :  { %18 = vsyncpa [#allocation6 + $0x1], 0 }
   0xa   :  { %19 = vsyncpa [#allocation9], 0 }
   0xb   :  { %20 = vsyncpa [#allocation4], 0 }
   0xc   :  { %22 = vsyncpa [#allocation4 + $0x1], 0  ;;  %s5480_s27 = smov 0   ;;  %s5482_s28 = smov 0  }
   0xd   :  { %s5484_s29 = smov 0   ;;  %s5486_s30 = smov 0  }
   0xe   :  { %s5488_s9 = smov 0   ;;  %s5490_s10 = smov 0  }
   0xf LB: > { %6823 = sst [smem:[#allocation17_spill]] %s5403_s27  ;;  %s5511_s11 = sadd.s32 4294967295, %s5423_s10   ;;  %s5423_s10 = sphi %s5490_s10, %s28_s10   ;;  %s5419_s9 = sphi %s5488_s9, %s6863_s9   ;;  %s5415_s30 = sphi %s5486_s30, %s6862_s30   ;;  %s5411_s29 = sphi %s5484_s29, %s6861_s29   ;;  %s5407_s28 = sphi %s5482_s28, %s6860_s28   ;;  %s5403_s27 = sphi %s5480_s27, %s6859_s27  }
  0x10   : > { %6824 = sst [smem:[#allocation18_spill]] %s5415_s30  ;;  %s3772_s12 = sadd.s32 4294967294, %s5423_s10  }
  0x11   : > { %p62_p0 = scmp.ne.s32.totalorder %s5407_s28, %s5403_s27  ;;  %p6806_p1 = scmp.eq.s32.totalorder %s5511_s11, 0 }
  0x12   : > { %p248_p3 = scmp.eq.s32.totalorder %s3772_s12, 1  ;;  %p3773_p5 = scmp.ge.s32.totalorder %s5423_s10, 1 }
  0x13   : > { %p5520_p4 = por %p6806_p1, %p62_p0  ;;  %p255_p7 = scmp.lt.s32.totalorder %s5423_s10, 3 }
  0x14   : > { %p5525_p6 = por %p248_p3, %p62_p0  ;;  %s5425_s16 = smov [#allocation7]  }
  0x15   : > { %s6825_s13 = scalar_select %p5520_p4, 1, 0 }
  0x16   : > { %s6826_s14 = scalar_select %p5525_p6, 1, 0 }
  0x17   : > { %p5530_p8 = pnand %p3773_p5, %p255_p7  ;;  %s267_s17 = sshll.u32 %s5425_s16, 4  ;;  %s5534_s17 = int_to_ptr.vmem [resolvable:$true] %s267_s17 }
  0x18   : > { %6827 = sst [smem:[#allocation19_spill]] %s6826_s14  ;;  %s5426_s19 = smov [#allocation8]  }
  0x19   : > { %s6828_s15 = scalar_select %p5530_p8, 1, 0 }
  0x1a   : > { %p4963_p9 = pneg %p5530_p8  ;;  %s283_s20 = sshll.u32 %s5426_s19, 4  ;;  %s5545_s20 = int_to_ptr.vmem [resolvable:$true] %s283_s20 }
  0x1b   : > { %s5427_s21 = smov [#allocation10]   ;;  %s6830_s2 = sld [smem:[#allocation23_spill]] }
  0x1c   : > { %p5541_p11 = pnand %p4963_p9, %p6806_p1  ;;  %s5547_s22 = sshll.u32 %s5427_s21, 4  ;;  %s300_s22 = int_to_ptr.vmem [resolvable:$true] %s5547_s22 }
  0x1e   : > { %p5557_p13 = pneg %p5541_p11 }
  0x21   : > { %s5185_s25 = scalar_lea.hbm %s6830_s2, 1024 }
  0x22   : > { %p5186_p12 = scmp.ne.s32.totalorder %s6830_s2, %s5185_s25  ;;  %p5192_p5 = scmp.lt.u32.totalorder %s5185_s25, %s6830_s2 }
  0x24   : > { %p5188_p0 = pnand %p5557_p13, %p5186_p12 }
  0x26   : > { %p5189_p3 = pneg %p5188_p0 }
  0x28   : > { %p5194_p7 = pnand %p5192_p5, %p5189_p3 }
  0x2a   : > { %5197 = shalt.err (!%p5194_p7)
}
  0x2b   : > { %s5198_s23 = scalar_lea.vmem %s5534_s17, 1024  ;;  %p5206_p2 = scmp.lt.s32.totalorder %s5534_s17, %s5534_s17 }
  0x2c   : > { %p5199_p9 = scmp.ne.s32.totalorder %s5534_s17, %s5198_s23  ;;  %p5207_p6 = scmp.lt.s32.totalorder %s5198_s23, %s5198_s23 }
  0x2e   : > { %p5201_p10 = pnand %p5199_p9, %p5557_p13  ;;  %p5208_p12 = por %p5207_p6, %p5206_p2 }
  0x30   : > { %p5202_p1 = pneg %p5201_p10 }
  0x32   : > { %p5209_p0 = pnand %p5208_p12, %p5202_p1 }
  0x34   : > { %5212 = shalt.err (!%p5209_p0)
}
  0x35   : > { %s6812_s24 = smov 64   ;;  %s6814_s25 = smov 4  }
  0x36   : > { %4966 = dma.hbm_to_vmem [thread:$0]  (!%p5541_p11), %s6830_s2, 1024, %s5534_s17, [#allocation6], %s6812_s24, %s6812_s24, %s6814_s25  }
  0x37   : > { %s6832_s4 = sld [smem:[#allocation24_spill]] }
  0x3d   : > { %s5213_s23 = scalar_lea.hbm %s6832_s4, 9216 }
  0x3e   : > { %p5214_p1 = scmp.ne.s32.totalorder %s6832_s4, %s5213_s23  ;;  %p5220_p10 = scmp.lt.u32.totalorder %s5213_s23, %s6832_s4 }
  0x40   : > { %p5216_p2 = pnand %p5214_p1, %p5557_p13 }
  0x42   : > { %p5217_p6 = pneg %p5216_p2 }
  0x44   : > { %p5222_p3 = pnand %p5220_p10, %p5217_p6 }
  0x46   : > { %5225 = shalt.err (!%p5222_p3)
}
  0x47   : > { %s5226_s17 = scalar_lea.vmem %s5545_s20, 9216  ;;  %p5234_p12 = scmp.lt.s32.totalorder %s5545_s20, %s5545_s20 }
  0x48   : > { %p5227_p5 = scmp.ne.s32.totalorder %s5545_s20, %s5226_s17  ;;  %p5235_p0 = scmp.lt.s32.totalorder %s5226_s17, %s5226_s17 }
  0x4a   : > { %p5229_p7 = pnand %p5227_p5, %p5557_p13  ;;  %p5236_p1 = por %p5235_p0, %p5234_p12 }
  0x4c   : > { %p5230_p9 = pneg %p5229_p7 }
  0x4e   : > { %p5237_p2 = pnand %p5236_p1, %p5230_p9 }
  0x50   : > { %5240 = shalt.err (!%p5237_p2)
}
  0x51   : > { %4969 = dma.hbm_to_vmem [thread:$0]  (!%p5541_p11), %s6832_s4, 9216, %s5545_s20, [#allocation9], %s6812_s24, %s6812_s24, %s6814_s25  }
  0x52   : > { %s6833_s6 = sld [smem:[#allocation25_spill]] }
  0x58   : > { %s5241_s26 = scalar_lea.hbm %s6833_s6, 1024 }
  0x59   : > { %p5242_p6 = scmp.ne.s32.totalorder %s6833_s6, %s5241_s26  ;;  %p5248_p5 = scmp.lt.u32.totalorder %s5241_s26, %s6833_s6 }
  0x5b   : > { %p5244_p10 = pnand %p5242_p6, %p5557_p13 }
  0x5d   : > { %p5245_p3 = pneg %p5244_p10 }
  0x5f   : > { %p5250_p7 = pnand %p5248_p5, %p5245_p3 }
  0x61   : > { %5253 = shalt.err (!%p5250_p7)
}
  0x62   : > { %s5254_s17 = scalar_lea.vmem %s300_s22, 1024  ;;  %p5262_p1 = scmp.lt.s32.totalorder %s300_s22, %s300_s22 }
  0x63   : > { %p5255_p9 = scmp.ne.s32.totalorder %s300_s22, %s5254_s17  ;;  %p5263_p2 = scmp.lt.s32.totalorder %s5254_s17, %s5254_s17 }
  0x65   : > { %p5257_p12 = pnand %p5255_p9, %p5557_p13  ;;  %p5264_p4 = por %p5263_p2, %p5262_p1 }
  0x67   : > { %p5258_p0 = pneg %p5257_p12 }
  0x69   : > { %p5265_p8 = pnand %p5264_p4, %p5258_p0 }
  0x6b   : > { %5268 = shalt.err (!%p5265_p8)
}
  0x6c   : > { %4972 = dma.hbm_to_vmem [thread:$0]  (!%p5541_p11), %s6833_s6, 1024, %s300_s22, [#allocation9], %s6812_s24, %s6812_s24, %s6814_s25  }
  0x6d   : > { %s49_s16 = sadd.s32 1, %s5411_s29  ;;  %s40_s18 = sadd.s32 1, %s5419_s9 }
  0x6e   : > { %p56_p4 = scmp.ne.s32.totalorder %s5411_s29, %s5407_s28  ;;  %p42_p8 = scmp.ge.s32.totalorder %s40_s18, 2 }
  0x6f   : > { %p57_p13 = scmp.eq.s32.totalorder %s5423_s10, 0  ;;  %p6834_p6 = scmp.eq.s32.totalorder %s5511_s11, 1 }
  0x70   : > { %p4987_p3 = scmp.lt.s32.totalorder %s5423_s10, 2  ;;  %s6865_s18 = smov (%p42_p8, %s40_s18), 0 }
  0x71   : > { %p5636_p10 = por %p6834_p6, %p56_p4  ;;  %p58_p5 = por %p57_p13, %p56_p4 }
  0x72   : > { %s5644_s30 = sand.u32 1, %s5411_s29   ;;  %s44_s22 = ssub.s32 %s5419_s9, %s6865_s18 }
  0x73   : > { %p47_p11 = scmp.eq.s32.totalorder %s44_s22, 0  ;;  %s3778_s14 = sshll.u32 %s5644_s30, 7 }
  0x74   : > { %s3937_s26 = sshll.u32 %s5419_s9, 11  ;;  %s6836_s0 = sld [smem:[#allocation22_spill]] }
  0x75   : > { %s5651_s12 = scalar_select %p47_p11, %s5411_s29, %s49_s16  }
  0x76   : > { %s320_s17 = scalar_lea.vmem [#allocation2], %s3778_s14  ;;  %p5662_p7 = pnand %p4987_p3, %p58_p5 }
  0x77   : > { %s330_s20 = sshll.u32 %s320_s17, 4  ;;  %s3781_s22 = sshll.u32 %s5644_s30, 4  ;;  %s5658_s20 = int_to_ptr.vmem [resolvable:$true] %s330_s20 }
  0x78   : > { %s317_s19 = scalar_lea.sflag [#allocation3], %s5644_s30  ;;  %p5271_p12 = pneg %p5662_p7 }
  0x7a   : > { %s5656_s23 = scalar_lea.hbm %s6836_s0, %s3937_s26  ;;  %s5274_s17 = scalar_lea.hbm %s6836_s0, 4096 }
  0x7b   : > { %s5269_s26 = scalar_lea.hbm %s5656_s23, 2048  ;;  %p5275_p2 = scmp.lt.u32.totalorder %s5656_s23, %s6836_s0 }
  0x7c   : > { %p5270_p9 = scmp.ne.s32.totalorder %s5656_s23, %s5269_s26  ;;  %p5276_p4 = scmp.lt.u32.totalorder %s5274_s17, %s5269_s26 }
  0x7d   : > { %p5278_p13 = scmp.lt.u32.totalorder %s5269_s26, %s5656_s23 }
  0x7e   : > { %p5272_p0 = pnand %p5271_p12, %p5270_p9  ;;  %p5277_p8 = por %p5276_p4, %p5275_p2 }
  0x80   : > { %p5273_p1 = pneg %p5272_p0  ;;  %p5279_p6 = por %p5278_p13, %p5277_p8 }
  0x82   : > { %p5280_p3 = pnand %p5279_p6, %p5273_p1 }
  0x84   : > { %5283 = shalt.err (!%p5280_p3)
}
  0x85   : > { %s5284_s16 = scalar_lea.vmem %s5658_s20, 2048  ;;  %s5430_s14 = smov [#allocation2]  }
  0x86   : > { %p5285_p5 = scmp.ne.s32.totalorder %s5658_s20, %s5284_s16  ;;  %s5289_s21 = sshll.u32 %s5430_s14, 4  ;;  %s5290_s21 = int_to_ptr.vmem [resolvable:$false] %s5289_s21 }
  0x87   : > { %s5291_s24 = scalar_lea.vmem %s5290_s21, 4096  ;;  %p5292_p0 = scmp.lt.s32.totalorder %s5658_s20, %s5290_s21 }
  0x88   : > { %p5287_p11 = pnand %p5285_p5, %p5271_p12  ;;  %p5293_p2 = scmp.lt.s32.totalorder %s5291_s24, %s5284_s16 }
  0x8a   : > { %p5288_p9 = pneg %p5287_p11  ;;  %p5294_p4 = por %p5293_p2, %p5292_p0 }
  0x8c   : > { %p5295_p8 = pnand %p5294_p4, %p5288_p9 }
  0x8e   : > { %5298 = shalt.err (!%p5295_p8)
}
  0x8f   : > { %s6838_s25 = smov 4   ;;  %s6839_s26 = smov 64  }
  0x90   : > { %4976 = dma.hbm_to_vmem [thread:$0]  (!%p5662_p7), %s5656_s23, 2048, %s5658_s20, %s317_s19, %s6839_s26, %s6839_s26, %s6838_s25  }
  0x91   : > { %s3938_s17 = sshll.u32 %s5419_s9, 8  ;;  %s344_s24 = scalar_lea.vmem [#allocation5], %s3781_s22 }
  0x92   : > { %s5703_s21 = scalar_lea.hbm %s6798_s1, %s3938_s17  ;;  %s354_s0 = sshll.u32 %s344_s24, 4  ;;  %s5707_s0 = int_to_ptr.vmem [resolvable:$true] %s354_s0 }
  0x93   : > { %s6840_s2 = sand.u32 1, %s5423_s10   ;;  %s5299_s6 = scalar_lea.hbm %s5703_s21, 256 }
  0x94   : > { %s5711_s4 = scalar_lea.sflag [#allocation6], %s6840_s2  ;;  %p5300_p1 = scmp.ne.s32.totalorder %s5703_s21, %s5299_s6 }
  0x95   : > { %s5304_s30 = scalar_lea.hbm %s6798_s1, 512  ;;  %p5305_p3 = scmp.lt.u32.totalorder %s5703_s21, %s6798_s1 }
  0x96   : > { %p5302_p13 = pnand %p5300_p1, %p5271_p12  ;;  %p5306_p5 = scmp.lt.u32.totalorder %s5304_s30, %s5299_s6 }
  0x97   : > { %p5308_p9 = scmp.lt.u32.totalorder %s5299_s6, %s5703_s21 }
  0x98   : > { %p5303_p6 = pneg %p5302_p13  ;;  %p5307_p11 = por %p5306_p5, %p5305_p3 }
  0x9a   : > { %p5309_p0 = por %p5308_p9, %p5307_p11 }
  0x9c   : > { %p5310_p2 = pnand %p5309_p0, %p5303_p6 }
  0x9e   : > { %5313 = shalt.err (!%p5310_p2)
}
  0x9f   : > { %s5314_s2 = scalar_lea.vmem %s5707_s0, 256  ;;  %s5431_s22 = smov [#allocation5]  }
  0xa0   : > { %p5315_p4 = scmp.ne.s32.totalorder %s5707_s0, %s5314_s2  ;;  %s5319_s14 = sshll.u32 %s5431_s22, 4  ;;  %s5320_s14 = int_to_ptr.vmem [resolvable:$false] %s5319_s14 }
  0xa1   : > { %s5321_s16 = scalar_lea.vmem %s5320_s14, 512  ;;  %p5322_p13 = scmp.lt.s32.totalorder %s5707_s0, %s5320_s14 }
  0xa2   : > { %p5317_p8 = pnand %p5315_p4, %p5271_p12  ;;  %p5323_p3 = scmp.lt.s32.totalorder %s5321_s16, %s5314_s2 }
  0xa4   : > { %p5318_p1 = pneg %p5317_p8  ;;  %p5324_p5 = por %p5323_p3, %p5322_p13 }
  0xa6   : > { %p5325_p11 = pnand %p5324_p5, %p5318_p1 }
  0xa8   : > { %5328 = shalt.err (!%p5325_p11)
}
  0xa9   : > { %4979 = dma.hbm_to_vmem [thread:$0]  (!%p5662_p7), %s5703_s21, 256, %s5707_s0, %s5711_s4, %s6839_s26, %s6839_s26, %s6838_s25  }
  0xaa   : > { %p6841_p12 = scmp.ne.s32.totalorder %s6828_s15, 0 }
  0xac   : > { %366 = sbr.rel (%p6841_p12) target bundleno = 1239 (0x4d7), region = 52 }
  0xb3   : > { %s5743_s6 = sand.u32 1, %s5407_s28   ;;  %p6842_p6 = scmp.ne.s32.totalorder %s6825_s13, 0 }
  0xb4   : > { %s3785_s24 = sshll.u32 %s5743_s6, 7  ;;  %s369_s23 = scalar_lea.sflag [#allocation3], %s5743_s6 }
  0xb5   : > { %s5749_s8 = scalar_lea.vmem [#allocation2], %s3785_s24 }
  0xb6   : > { %5382 = dma.done.wait (%p6842_p6), %s369_s23, 2048  }
  0xb7   : > { %5384 = vsyncadd (%p6842_p6), %s369_s23, 4294965248  ;;  %s377_s0 = sand.u32 1, %s5511_s11   ;;  %s3786_s4 = sshll.u32 %s5743_s6, 4 }
  0xb8   : > { %s378_s15 = scalar_lea.sflag [#allocation6], %s377_s0  ;;  %s5757_s25 = scalar_lea.vmem [#allocation5], %s3786_s4 }
  0xb9   : > { %5386 = dma.done.wait (%p6842_p6), %s378_s15, 256  }
  0xba   : > { %5388 = vsyncadd (%p6842_p6), %s378_s15, 4294967040  ;;  %p6843_p7 = scmp.eq.s32.totalorder %s5511_s11, 0 }
  0xbc   : > { %5390 = dma.done.wait (%p6843_p7), [#allocation6], 1024   ;;  %p6844_p9 = pmov %p6843_p7 }
  0xbd   : > { %p6845_p0 = pmov %p6843_p7 }
  0xbe   : > { %5392 = vsyncadd (%p6844_p9), [#allocation6], 4294966272 }
  0xbf   : > { %5394 = dma.done.wait (%p6845_p0), [#allocation9], 10240   ;;  %p6846_p2 = pmov %p6845_p0 }
  0xc0   : > { %v5047_v0 = vld [vmem:[#allocation7] sm:$0xff]   ;;  %v5048_v1 = vld [vmem:[#allocation7 + $0x8] sm:$0xff]   ;;  %v5049_v2 = vld [vmem:[#allocation7 + $0x10] sm:$0xff]   ;;  %vm1079_vm0 = vcmask 1040384   ;;  %vm1080_vm1 = vsmask.f32 256 }
  0xc1   : > { %5396 = vsyncadd (%p6846_p2), [#allocation9], 4294957056  ;;  %4525 = vmatprep.subr.bf16.mxu0 %v5047_v0  ;;  %4769 = vmatprep.subr.bf16.mxu1 %v5047_v0  ;;  %v5050_v3 = vld [vmem:[#allocation7 + $0x18] sm:$0xff]   ;;  %v435_v4 = vld [vmem:[%s5749_s8] sm:$0xff]   ;;  %vm1389_vm3 = vcmask 1046528   ;;  %s6685_s19 = scalar_lea.vmem [#allocation11], %s3785_s24 }
  0xc2   : > { %4526 = vmatpush3.bf16.msra.mxu0 %v5047_v0  ;;  %4777 = vmatpush3.bf16.msra.mxu1 %v5047_v0  ;;  %v451_v5 = vld [vmem:[%s5749_s8 + $0x40] sm:$0xff]   ;;  %v5052_v7 = vld [vmem:[#allocation7 + $0x28] sm:$0xff]   ;;  %v5053_v8 = vld [vmem:[#allocation7 + $0x30] sm:$0xff]   ;;  %vm1118_vm4 = vsmask.f32 7424  ;;  %s6853_s17 = sld [smem:[#allocation18_spill]] }
  0xc3   : > { %4527 = vmatprep.subr.bf16.mxu0 %v5048_v1  ;;  %4770 = vmatprep.subr.bf16.mxu1 %v5048_v1  ;;  %v5051_v6 = vld [vmem:[#allocation7 + $0x20] sm:$0xff]   ;;  %v5054_v9 = vld [vmem:[#allocation7 + $0x38] sm:$0xff]   ;;  %v437_v10 = vld [vmem:[%s5749_s8 + $0x8] sm:$0xff]   ;;  %s3630_s22 = sshll.u32 %s6685_s19, 4  ;;  %s6854_s24 = sld [smem:[#allocation26_spill]]  ;;  %s6746_s22 = int_to_ptr.vmem [resolvable:$true] %s3630_s22 }
  0xc4   : > { %4541 = vmatprep.mubr.bf16.mxu0 %v435_v4  ;;  %4557 = vmatprep.mubr.bf16.mxu1 %v451_v5  ;;  %v439_v11 = vld [vmem:[%s5749_s8 + $0x10] sm:$0xff]   ;;  %v453_v12 = vld [vmem:[%s5749_s8 + $0x48] sm:$0xff]   ;;  %v5073_v13 = vld [vmem:[#allocation8 + $0x140] sm:$0xff]   ;;  %s5329_s0 = scalar_lea.vmem %s6746_s22, 2048  ;;  %s5432_s4 = smov [#allocation11]  }
  0xc5   : > { %v455_v14 = vld [vmem:[%s5749_s8 + $0x50] sm:$0xff]   ;;  %v5075_v15 = vld [vmem:[#allocation8 + $0x100] sm:$0xff]   ;;  %v5074_v16 = vld [vmem:[#allocation8 + $0x148] sm:$0xff]   ;;  %p5330_p4 = scmp.ne.s32.totalorder %s6746_s22, %s5329_s0  ;;  %s5333_s15 = sshll.u32 %s5432_s4, 4  ;;  %s5334_s15 = int_to_ptr.vmem [resolvable:$false] %s5333_s15 }
  0xc6   : > { %4528 = vmatpush3.bf16.msra.mxu0 %v5048_v1  ;;  %4778 = vmatpush3.bf16.msra.mxu1 %v5048_v1  ;;  %v5076_v17 = vld [vmem:[#allocation8 + $0xc0] sm:$0xff]   ;;  %v5078_v18 = vld [vmem:[#allocation8 + $0x108] sm:$0xff]   ;;  %v441_v19 = vld [vmem:[%s5749_s8 + $0x18] sm:$0xff]   ;;  %p5336_p13 = scmp.lt.s32.totalorder %s6746_s22, %s5334_s15 }
  0xc7   : > { %4529 = vmatprep.subr.bf16.mxu0 %v5049_v2  ;;  %4771 = vmatprep.subr.bf16.mxu1 %v5049_v2  ;;  %v443_v20 = vld [vmem:[%s5749_s8 + $0x20] sm:$0xff]   ;;  %v457_v21 = vld [vmem:[%s5749_s8 + $0x58] sm:$0xff]   ;;  %v5077_v23 = vld [vmem:[#allocation8 + $0x150] sm:$0xff]   ;;  %p5331_p8 = pnand %p5330_p4, %p5636_p10 }
  0xc8   : > { %v459_v22 = vld [vmem:[%s5749_s8 + $0x60] sm:$0xff]   ;;  %v5079_v24 = vld [vmem:[#allocation8 + $0xc8] sm:$0xff]   ;;  %v447_v26 = vld [vmem:[%s5749_s8 + $0x30] sm:$0xff]   ;;  %s3971_s2 = sshll.u32 %s6853_s17, 11 }
  0xc9   : > { %v445_v25 = vld [vmem:[%s5749_s8 + $0x28] sm:$0xff]   ;;  %v463_v28 = vld [vmem:[%s5749_s8 + $0x70] sm:$0xff]   ;;  %v449_v29 = vld [vmem:[%s5749_s8 + $0x38] sm:$0xff]   ;;  %s6744_s23 = scalar_lea.hbm %s6854_s24, %s3971_s2  ;;  %p5332_p1 = pneg %p5331_p8 }
  0xca   : > { %4530 = vmatpush3.bf16.msra.mxu0 %v5049_v2  ;;  %4779 = vmatpush3.bf16.msra.mxu1 %v5049_v2  ;;  %v461_v27 = vld [vmem:[%s5749_s8 + $0x68] sm:$0xff]   ;;  %v465_v30 = vld [vmem:[%s5749_s8 + $0x78] sm:$0xff]   ;;  %v5071_v31 = vld [vmem:[%s5757_s25] sm:$0xff]  }
  0xcb   : > { %4531 = vmatprep.subr.bf16.mxu0 %v5050_v3  ;;  %4772 = vmatprep.subr.bf16.mxu1 %v5050_v3  ;;  %v5072_v32 = vld [vmem:[%s5757_s25 + $0x8] sm:$0xff]   ;;  %v5081_v34 = vld [vmem:[#allocation8 + $0x110] sm:$0xff]   ;;  %v5083_v36 = vld [vmem:[#allocation8 + $0x160] sm:$0xff]   ;;  %s5335_s25 = scalar_lea.vmem %s5334_s15, 4096 }
  0xcc   : > { %v5080_v33 = vld [vmem:[#allocation8 + $0x158] sm:$0xff]   ;;  %v5082_v35 = vld [vmem:[#allocation8 + $0xd0] sm:$0xff]   ;;  %v5086_v39 = vld [vmem:[#allocation8 + $0x168] sm:$0xff]   ;;  %p5337_p3 = scmp.lt.s32.totalorder %s5335_s25, %s5329_s0 }
  0xcd   : > { %v5084_v37 = vld [vmem:[#allocation8 + $0x118] sm:$0xff]   ;;  %v5087_v40 = vld [vmem:[#allocation8 + $0x120] sm:$0xff]   ;;  %v5089_v42 = vld [vmem:[#allocation8 + $0x170] sm:$0xff]  }
  0xce   : > { %4532 = vmatpush3.bf16.msra.mxu0 %v5050_v3  ;;  %4780 = vmatpush3.bf16.msra.mxu1 %v5050_v3  ;;  %v5085_v38 = vld [vmem:[#allocation8 + $0xd8] sm:$0xff]   ;;  %v5088_v41 = vld [vmem:[#allocation8 + $0xe0] sm:$0xff]   ;;  %v5090_v43 = vld [vmem:[#allocation8 + $0x128] sm:$0xff]   ;;  %p5338_p5 = por %p5337_p3, %p5336_p13 }
  0xcf   : > { %4533 = vmatprep.subr.bf16.mxu0 %v5051_v6  ;;  %4773 = vmatprep.subr.bf16.mxu1 %v5051_v6  ;;  %v5091_v44 = vld [vmem:[#allocation8 + $0xe8] sm:$0xff]   ;;  %v5092_v45 = vld [vmem:[#allocation8 + $0x178] sm:$0xff]   ;;  %v5093_v46 = vld [vmem:[#allocation8 + $0x130] sm:$0xff]  }
  0xd0   : > { %v5094_v47 = vld [vmem:[#allocation8 + $0xf0] sm:$0xff]   ;;  %v5096_v48 = vld [vmem:[#allocation8 + $0x138] sm:$0xff]   ;;  %v5789_v50 = vld [vmem:[#allocation8 + $0x80] sm:$0xff]   ;;  %p5339_p11 = pnand %p5338_p5, %p5332_p1 }
  0xd1   : > { %v5097_v49 = vld [vmem:[#allocation8 + $0xf8] sm:$0xff]   ;;  %v5105_v51 = vld [vmem:[#allocation8 + $0x40] sm:$0xff]   ;;  %vm5817_vm2 = vmand %vm1079_vm0, %vm1080_vm1 }
  0xd2   : > { %4534 = vmatpush3.bf16.msra.mxu0 %v5051_v6  ;;  %4781 = vmatpush3.bf16.msra.mxu1 %v5051_v6  ;;  %v5795_v52 = vld [vmem:[%s6800_s3] ss:$0 sm:$0xff] }
  0xd3   : > { %4535 = vmatprep.subr.bf16.mxu0 %v5052_v7  ;;  %4774 = vmatprep.subr.bf16.mxu1 %v5052_v7 }
  0xd6   : > { %4536 = vmatpush3.bf16.msra.mxu0 %v5052_v7  ;;  %4782 = vmatpush3.bf16.msra.mxu1 %v5052_v7 }
  0xd7   : > { %4537 = vmatprep.subr.bf16.mxu0 %v5053_v8  ;;  %4775 = vmatprep.subr.bf16.mxu1 %v5053_v8 }
  0xda   : > { %4538 = vmatpush3.bf16.msra.mxu0 %v5053_v8  ;;  %4783 = vmatpush3.bf16.msra.mxu1 %v5053_v8 }
  0xdb   : > { %4539 = vmatprep.subr.bf16.mxu0 %v5054_v9  ;;  %4776 = vmatprep.subr.bf16.mxu1 %v5054_v9 }
  0xde   : > { %4540 = vmatpush3.bf16.msra.mxu0 %v5054_v9  ;;  %4784 = vmatpush3.bf16.msra.mxu1 %v5054_v9 }
  0xdf   : > { %4577 = vmatprep.subr.bf16.mxu0 %v5073_v13  ;;  %4093 = vmatprep.subr.bf16.mxu1 %v5075_v15 }
  0xe1   : > { %4542 = vmatmul.mubr.bf16.vlgmr.msra.gmra.mrb[0].mxu0 %v437_v10  ;;  %4558 = vmatmul.mubr.bf16.vlgmr.msra.gmra.mrb[0].mxu1 %v453_v12 }
  0xe2   : > { %4545 = vmatprep.mubr.bf16.mxu0 %v439_v11  ;;  %4561 = vmatprep.mubr.bf16.mxu1 %v455_v14 }
  0xe3   : > { %4578 = vmatpush3.bf16.msra.mxu0 %v5073_v13  ;;  %4094 = vmatpush3.bf16.msra.mxu1 %v5076_v17 }
  0xe4   : > { %4579 = vmatprep.subr.bf16.mxu0 %v5074_v16  ;;  %4095 = vmatprep.subr.bf16.mxu1 %v5078_v18 }
  0xe7   : > { %4580 = vmatpush3.bf16.msra.mxu0 %v5074_v16  ;;  %4096 = vmatpush3.bf16.msra.mxu1 %v5079_v24 }
  0xe8   : > { %4581 = vmatprep.subr.bf16.mxu0 %v5077_v23  ;;  %4097 = vmatprep.subr.bf16.mxu1 %v5081_v34 }
  0xe9   : > { %4546 = vmatmul.mubr.bf16.gmra.mrb[4].mxu0 %v441_v19  ;;  %4562 = vmatmul.mubr.bf16.gmra.mrb[4].mxu1 %v457_v21 }
  0xea   : > { %4549 = vmatprep.mubr.bf16.mxu0 %v443_v20  ;;  %4565 = vmatprep.mubr.bf16.mxu1 %v459_v22 }
  0xeb   : > { %4582 = vmatpush3.bf16.msra.mxu0 %v5077_v23  ;;  %4098 = vmatpush3.bf16.msra.mxu1 %v5082_v35 }
  0xec   : > { %4583 = vmatprep.subr.bf16.mxu0 %v5080_v33  ;;  %4099 = vmatprep.subr.bf16.mxu1 %v5084_v37 }
  0xef   : > { %4584 = vmatpush3.bf16.msra.mxu0 %v5080_v33  ;;  %4100 = vmatpush3.bf16.msra.mxu1 %v5085_v38 }
  0xf0   : > { %4585 = vmatprep.subr.bf16.mxu0 %v5083_v36  ;;  %4101 = vmatprep.subr.bf16.mxu1 %v5087_v40 }
  0xf1   : > { %4550 = vmatmul.mubr.bf16.gmra.mrb[8].mxu0 %v445_v25  ;;  %4566 = vmatmul.mubr.bf16.gmra.mrb[8].mxu1 %v461_v27 }
  0xf2   : > { %4553 = vmatprep.mubr.bf16.mxu0 %v447_v26  ;;  %4569 = vmatprep.mubr.bf16.mxu1 %v463_v28  ;;  %v6847_v28 = vmov 0 }
  0xf3   : > { %4586 = vmatpush3.bf16.msra.mxu0 %v5083_v36  ;;  %4102 = vmatpush3.bf16.msra.mxu1 %v5088_v41  ;;  %v6848_v28 = vsel %vm5817_vm2, 4294967295, %v6847_v28 }
  0xf4   : > { %4587 = vmatprep.subr.bf16.mxu0 %v5086_v39  ;;  %4103 = vmatprep.subr.bf16.mxu1 %v5090_v43  ;;  %6849 = vst [vmem:[#allocation20_spill] sm:$0xff] %v6848_v28 }
  0xf7   : > { %4588 = vmatpush3.bf16.msra.mxu0 %v5086_v39  ;;  %4104 = vmatpush3.bf16.msra.mxu1 %v5091_v44 }
  0xf8   : > { %4589 = vmatprep.subr.bf16.mxu0 %v5089_v42  ;;  %4105 = vmatprep.subr.bf16.mxu1 %v5093_v46 }
  0xf9   : > { %4554 = vmatmul.mubr.bf16.gmra.mrb[12].mxu0 %v449_v29  ;;  %4570 = vmatmul.mubr.bf16.gmra.mrb[12].mxu1 %v465_v30 }
  0xfa   : > { %4573 = vmatprep.mubr.bf16.mxu1 %v5071_v31 }
  0xfb   : > { %4590 = vmatpush3.bf16.msra.mxu0 %v5089_v42  ;;  %4106 = vmatpush3.bf16.msra.mxu1 %v5094_v47 }
  0xfc   : > { %4591 = vmatprep.subr.bf16.mxu0 %v5092_v45  ;;  %4107 = vmatprep.subr.bf16.mxu1 %v5096_v48 }
  0xff   : > { %4592 = vmatpush3.bf16.msra.mxu0 %v5092_v45  ;;  %4108 = vmatpush3.bf16.msra.mxu1 %v5097_v49 }
 0x100   : > { %4625 = vmatprep.subr.bf16.mxu0 %v5789_v50  ;;  %4229 = vmatprep.subr.bf16.mxu1 %v5105_v51 }
 0x101   : > { %4574 = vmatmul.mubr.bf16.gmra.mrb[16].mxu1 %v5072_v32 }
 0x1b4   : > { %v4543_v53 = vpop.f32.mrb[0].mxu0  ;;  %v4559_v56 = vpop.f32.mrb[0].mxu1 }
 0x1b5   : > { %v693_v54 = vadd.f32 %v4543_v53, %v5795_v52  ;;  %v684_v55 = vpop.f32.mrb[1].mxu0  ;;  %v757_v59 = vadd.f32 %v4559_v56, %v5795_v52  ;;  %v748_v60 = vpop.f32.mrb[1].mxu1 }
 0x1b6   : > { %v685_v57 = vadd.f32 %v5795_v52, %v684_v55  ;;  %v4544_v58 = vpop.f32.mrb[2].mxu0  ;;  %v749_v63 = vadd.f32 %v5795_v52, %v748_v60  ;;  %v4560_v0 = vpop.f32.mrb[2].mxu1 }
 0x1b7   : > { %v696_v61 = vadd.f32 %v4544_v58, %v5795_v52  ;;  %v687_v62 = vpop.f32.mrb[3].mxu0  ;;  %v845_v2 = vmax.f32 %v757_v59, 0.0  ;;  %v760_v3 = vadd.f32 %v4560_v0, %v5795_v52  ;;  %v751_v4 = vpop.f32.mrb[3].mxu1  ;;  %v829_v5 = vmax.f32 %v693_v54, 0.0 }
 0x1b8   : > { %v688_v1 = vadd.f32 %v5795_v52, %v687_v62  ;;  %v843_v7 = vmax.f32 %v749_v63, 0.0  ;;  %v752_v8 = vadd.f32 %v5795_v52, %v751_v4  ;;  %v827_v9 = vmax.f32 %v685_v57, 0.0 }
 0x1b9   : > { %v830_v6 = vmax.f32 %v696_v61, 0.0  ;;  %v846_v11 = vmax.f32 %v760_v3, 0.0 }
 0x1ba   : > { %v828_v10 = vmax.f32 %v688_v1, 0.0  ;;  %v844_v13 = vmax.f32 %v752_v8, 0.0 }
 0x1bb   : > { %v864_v12 = vpack.c.bf16 %v830_v6, %v829_v5  ;;  %v5805_v16 = vpack.c.bf16 %v846_v11, %v845_v2 }
 0x1bc   : > { %v863_v14 = vpack.c.bf16 %v828_v10, %v827_v9  ;;  %v4547_v15 = vpop.f32.mrb[4].mxu0  ;;  %v5808_v20 = vpack.c.bf16 %v844_v13, %v843_v7  ;;  %v5810_v21 = vpop.f32.mrb[4].mxu1  ;;  %v5098_v7 = vld [vmem:[#allocation8 + $0x88] sm:$0xff]  }
 0x1bd   : > { %v932_v17 = vshrl.u32 %v864_v12, 16  ;;  %v709_v18 = vadd.f32 %v4547_v15, %v5795_v52  ;;  %v700_v19 = vpop.f32.mrb[5].mxu0  ;;  %v5813_v25 = vpop.f32.mrb[5].mxu1  ;;  %v935_v27 = vshll.u32 %v864_v12, 16  ;;  %v988_v46 = vshrl.u32 %v5805_v16, 16 }
 0x1be   : > { %v925_v22 = vshrl.u32 %v863_v14, 16  ;;  %v701_v23 = vadd.f32 %v5795_v52, %v700_v19  ;;  %v4548_v24 = vpop.f32.mrb[6].mxu0  ;;  %v5822_v31 = vpop.f32.mrb[6].mxu1  ;;  %v928_v33 = vshll.u32 %v863_v14, 16  ;;  %v981_v53 = vshrl.u32 %v5808_v20, 16 }
 0x1bf   : > { %v934_v26 = vrot.slane %v932_v17, 7  ;;  %v712_v29 = vadd.f32 %v4548_v24, %v5795_v52  ;;  %v703_v30 = vpop.f32.mrb[7].mxu0  ;;  %v5825_v35 = vpop.f32.mrb[7].mxu1  ;;  %v833_v37 = vmax.f32 %v709_v18, 0.0  ;;  %v991_v24 = vshll.u32 %v5805_v16, 16 }
 0x1c0   : > { %v927_v32 = vrot.slane %v925_v22, 7  ;;  %v704_v34 = vadd.f32 %v5795_v52, %v703_v30  ;;  %v831_v40 = vmax.f32 %v701_v23, 0.0  ;;  %v5878_v30 = vrot.slane %v988_v46, 7 }
 0x1c1   : > { %v937_v36 = vor.u32 %v935_v27, %v934_v26  ;;  %v834_v38 = vmax.f32 %v712_v29, 0.0  ;;  %v5835_v44 = vsel %vm5817_vm2, %v934_v26, 0 }
 0x1c2   : > { %v930_v39 = vor.u32 %v928_v33, %v927_v32  ;;  %v832_v41 = vmax.f32 %v704_v34, 0.0  ;;  %v1101_v42 = vsel %vm5817_vm2, %v927_v32, 0  ;;  %v1397_v60 = vrot.slane %v5835_v44, 1  ;;  %v5099_v32 = vld [vmem:[#allocation8 + $0x90] sm:$0xff]  }
 0x1c3   : > { %v5831_v43 = vsel %vm5817_vm2, 0, %v937_v36  ;;  %v866_v45 = vpack.c.bf16 %v834_v38, %v833_v37  ;;  %v1394_v58 = vrot.slane %v1101_v42, 1  ;;  %v1139_v0 = vshll.u32 %v1101_v42, 16 }
 0x1c4   : > { %v5840_v47 = vsel %vm5817_vm2, 0, %v930_v39  ;;  %v865_v48 = vpack.c.bf16 %v832_v41, %v831_v40  ;;  %v4551_v49 = vpop.f32.mrb[8].mxu0  ;;  %v1396_v51 = vrot.slane %v5831_v43, 1  ;;  %v5846_v59 = vpop.f32.mrb[8].mxu1  ;;  %v5880_v37 = vrot.slane %v981_v53, 7 }
 0x1c5   : > { %v946_v54 = vshrl.u32 %v866_v45, 16  ;;  %v725_v55 = vadd.f32 %v4551_v49, %v5795_v52  ;;  %v716_v56 = vpop.f32.mrb[9].mxu0  ;;  %v1393_v57 = vrot.slane %v5840_v47, 1  ;;  %v5850_v1 = vpop.f32.mrb[9].mxu1  ;;  %v949_v3 = vshll.u32 %v866_v45, 16 }
 0x1c6   : > { %v939_v61 = vshrl.u32 %v865_v48, 16  ;;  %v717_v62 = vadd.f32 %v5795_v52, %v716_v56  ;;  %v4552_v63 = vpop.f32.mrb[10].mxu0  ;;  %v5858_v8 = vpop.f32.mrb[10].mxu1  ;;  %v942_v10 = vshll.u32 %v865_v48, 16  ;;  %v5865_v12 = vsel %vm1389_vm3, %v1396_v51, %v1397_v60 }
 0x1c7   : > { %v5852_v2 = vrot.slane %v946_v54, 7  ;;  %v728_v4 = vadd.f32 %v4552_v63, %v5795_v52  ;;  %v719_v5 = vpop.f32.mrb[11].mxu0  ;;  %v5856_v6 = vsel %vm1389_vm3, %v1393_v57, %v1394_v58  ;;  %v5867_v13 = vpop.f32.mrb[11].mxu1  ;;  %v837_v15 = vmax.f32 %v725_v55, 0.0  ;;  %v5106_v54 = vld [vmem:[#allocation8] sm:$0xff]   ;;  %v5111_v63 = vld [vmem:[#allocation8 + $0x48] sm:$0xff]  }
 0x1c8   : > { %v5860_v9 = vrot.slane %v939_v61, 7  ;;  %v720_v11 = vadd.f32 %v5795_v52, %v719_v5  ;;  %4593 = vmatprep.mubr.bf16.mxu0 %v5856_v6  ;;  %v1134_v18 = vshll.u32 %v5840_v47, 16  ;;  %v835_v22 = vmax.f32 %v717_v62, 0.0  ;;  %v5100_v61 = vld [vmem:[#allocation8 + $0x98] sm:$0xff]  }
 0x1c9   : > { %v951_v14 = vor.u32 %v949_v3, %v5852_v2  ;;  %v838_v17 = vmax.f32 %v728_v4, 0.0  ;;  %4594 = vmatmul.mubr.bf16.vlgmr.msra.gmra.mrb[16].mxu0 %v5865_v12  ;;  %v1132_v27 = vshrl.u32 %v5840_v47, 16  ;;  %v1141_v36 = vrot.slane %v1139_v0, 1 }
 0x1ca   : > { %v944_v19 = vor.u32 %v942_v10, %v5860_v9  ;;  %v836_v23 = vmax.f32 %v720_v11, 0.0  ;;  %4626 = vmatpush3.bf16.msra.mxu0 %v5789_v50  ;;  %v1136_v29 = vrot.slane %v1134_v18, 1  ;;  %v1146_v38 = vshll.u32 %v5831_v43, 16 }
 0x1cb   : > { %v5875_v26 = vpack.c.bf16 %v838_v17, %v837_v15  ;;  %4627 = vmatprep.subr.bf16.mxu0 %v5098_v7  ;;  %v5885_v50 = vsel %vm5817_vm2, 0, %v951_v14  ;;  %v984_v51 = vshll.u32 %v5808_v20, 16  ;;  %v1144_v58 = vshrl.u32 %v5831_v43, 16 }
 0x1cc   : > { %v867_v33 = vpack.c.bf16 %v836_v23, %v835_v22  ;;  %v4555_v34 = vpop.f32.mrb[12].mxu0  ;;  %v1137_v40 = vor.u32 %v1136_v29, %v1132_v27  ;;  %v5889_v42 = vpop.f32.mrb[12].mxu1  ;;  %v5893_v45 = vsel %vm5817_vm2, 0, %v944_v19  ;;  %v1148_v4 = vrot.slane %v1146_v38, 1 }
 0x1cd   : > { %v960_v16 = vshrl.u32 %v5875_v26, 16  ;;  %v741_v39 = vadd.f32 %v4555_v34, %v5795_v52  ;;  %v732_v41 = vpop.f32.mrb[13].mxu0  ;;  %v5897_v53 = vpop.f32.mrb[13].mxu1  ;;  %v963_v55 = vshll.u32 %v5875_v26, 16  ;;  %v1151_v11 = vshll.u32 %v5835_v44, 16  ;;  %v5101_v44 = vld [vmem:[#allocation8 + $0xa0] sm:$0xff]  }
 0x1ce   : > { %v953_v46 = vshrl.u32 %v867_v33, 16  ;;  %v733_v48 = vadd.f32 %v5795_v52, %v732_v41  ;;  %v4556_v49 = vpop.f32.mrb[14].mxu0  ;;  %4628 = vmatpush3.bf16.msra.mxu0 %v5098_v7  ;;  %v5901_v56 = vsel %vm1118_vm4, %v1137_v40, %v1141_v36  ;;  %v5905_v62 = vpop.f32.mrb[14].mxu1  ;;  %v956_v3 = vshll.u32 %v867_v33, 16  ;;  %v5112_v34 = vld [vmem:[#allocation8 + $0x8] sm:$0xff]  }
 0x1cf   : > { %v744_v57 = vadd.f32 %v4556_v49, %v5795_v52  ;;  %v735_v60 = vpop.f32.mrb[15].mxu0  ;;  %4629 = vmatprep.subr.bf16.mxu0 %v5099_v32  ;;  %v5907_v20 = vrot.slane %v960_v16, 7  ;;  %1735 = vmatprep.mubr.bf16.mxu1 %v5901_v56  ;;  %v5912_v5 = vpop.f32.mrb[15].mxu1  ;;  %v841_v7 = vmax.f32 %v741_v39, 0.0  ;;  %v1149_v17 = vor.u32 %v1148_v4, %v1144_v58  ;;  %v5117_v49 = vld [vmem:[#allocation8 + $0x50] sm:$0xff]  }
 0x1d0   : > { %v5909_v0 = vrot.slane %v953_v46, 7  ;;  %1736 = vmatmul.mubr.bf16.vlgmr.msra.gmra.mrb[20].mxu1 %v5840_v47  ;;  %v736_v14 = vadd.f32 %v5795_v52, %v735_v60  ;;  %v839_v15 = vmax.f32 %v733_v48, 0.0  ;;  %v5920_v18 = vsel %vm5817_vm2, %v5860_v9, 0  ;;  %v5118_v4 = vld [vmem:[#allocation8 + $0x10] sm:$0xff]  }
 0x1d1   : > { %v842_v10 = vmax.f32 %v744_v57, 0.0  ;;  %v1399_v19 = vrot.slane %v5893_v45, 1  ;;  %4230 = vmatpush3.bf16.msra.mxu1 %v5106_v54  ;;  %v1153_v26 = vrot.slane %v1151_v11, 1  ;;  %v5927_v29 = vor.u32 %v991_v24, %v5878_v30 }
 0x1d2   : > { %4630 = vmatpush3.bf16.msra.mxu0 %v5099_v32  ;;  %v958_v22 = vor.u32 %v956_v3, %v5909_v0  ;;  %v840_v27 = vmax.f32 %v736_v14, 0.0  ;;  %4231 = vmatprep.subr.bf16.mxu1 %v5111_v63  ;;  %v1400_v33 = vrot.slane %v5920_v18, 1  ;;  %v5933_v9 = vsel %vm5817_vm2, %v5852_v2, 0  ;;  %v5123_v14 = vld [vmem:[#allocation8 + $0x58] sm:$0xff]  }
 0x1d3   : > { %v5924_v23 = vpack.c.bf16 %v842_v10, %v841_v7  ;;  %4631 = vmatprep.subr.bf16.mxu0 %v5100_v61  ;;  %v1402_v32 = vrot.slane %v5885_v50, 1  ;;  %v965_v36 = vor.u32 %v963_v55, %v5907_v20  ;;  %v5939_v16 = vsel %vm1118_vm4, %v1149_v17, %v1153_v26 }
 0x1d4   : > { %v869_v39 = vpack.c.bf16 %v840_v27, %v839_v15  ;;  %v5941_v24 = vpop.f32.mrb[16].mxu1  ;;  %1743 = vmatprep.mubr.bf16.mxu1 %v5939_v16  ;;  %v5945_v40 = vsel %vm1389_vm3, %v1399_v19, %v1400_v33  ;;  %v1403_v2 = vrot.slane %v5933_v9, 1  ;;  %v773_v41 = vadd.f32 %v5810_v21, %v5795_v52 }
 0x1d5   : > { %v974_v38 = vshrl.u32 %v5924_v23, 16  ;;  %v765_v46 = vadd.f32 %v5795_v52, %v5813_v25  ;;  %v5952_v48 = vpop.f32.mrb[17].mxu1  ;;  %v5956_v54 = vsel %vm5817_vm2, 0, %v958_v22  ;;  %v5959_v55 = vor.u32 %v984_v51, %v5880_v37  ;;  %4597 = vmatprep.mubr.bf16.mxu0 %v5945_v40  ;;  %v5102_v25 = vld [vmem:[#allocation8 + $0xa8] sm:$0xff]   ;;  %4232 = vmatpush3.bf16.msra.mxu1 %v5112_v34 }
 0x1d6   : > { %4632 = vmatpush3.bf16.msra.mxu0 %v5100_v61  ;;  %v967_v57 = vshrl.u32 %v869_v39, 16  ;;  %v776_v21 = vadd.f32 %v5822_v31, %v5795_v52  ;;  %v5964_v58 = vpop.f32.mrb[18].mxu1  ;;  %v5967_v60 = vsel %vm1389_vm3, %v1402_v32, %v1403_v2  ;;  %v849_v61 = vmax.f32 %v773_v41, 0.0  ;;  %4233 = vmatprep.subr.bf16.mxu1 %v5117_v49  ;;  %v5103_v32 = vld [vmem:[#allocation8 + $0xb0] sm:$0xff]   ;;  %v5127_v41 = vld [vmem:[#allocation8 + $0x60] sm:$0xff]  }
 0x1d7   : > { %4633 = vmatprep.subr.bf16.mxu0 %v5101_v44  ;;  %v847_v63 = vmax.f32 %v765_v46, 0.0  ;;  %v768_v3 = vadd.f32 %v5795_v52, %v5825_v35  ;;  %v5971_v51 = vpop.f32.mrb[19].mxu1  ;;  %v5975_v7 = vsel %vm5817_vm2, 0, %v965_v36  ;;  %v5977_v31 = vrot.slane %v974_v38, 7  ;;  %4598 = vmatmul.mubr.bf16.gmra.mrb[20].mxu0 %v5967_v60 }
 0x1d8   : > { %v5979_v10 = vrot.slane %v967_v57, 7  ;;  %v850_v11 = vmax.f32 %v776_v21, 0.0  ;;  %1744 = vmatmul.mubr.bf16.gmra.mrb[24].mxu1 %v5831_v43  ;;  %v1158_v35 = vshll.u32 %v5893_v45, 16  ;;  %v1163_v17 = vshll.u32 %v5920_v18, 16 }
 0x1d9   : > { %v848_v15 = vmax.f32 %v768_v3, 0.0  ;;  %v5988_v19 = vsel %vm5817_vm2, %v5909_v0, 0  ;;  %v977_v22 = vshll.u32 %v5924_v23, 16  ;;  %v970_v26 = vshll.u32 %v869_v39, 16  ;;  %4234 = vmatpush3.bf16.msra.mxu1 %v5118_v4  ;;  %v5124_v0 = vld [vmem:[#allocation8 + $0x18] sm:$0xff]  }
 0x1da   : > { %4634 = vmatpush3.bf16.msra.mxu0 %v5101_v44  ;;  %v874_v27 = vpack.c.bf16 %v850_v11, %v849_v61  ;;  %v1405_v33 = vrot.slane %v5956_v54, 1  ;;  %v1156_v36 = vshrl.u32 %v5893_v45, 16  ;;  %v1160_v18 = vrot.slane %v1158_v35, 1  ;;  %4235 = vmatprep.subr.bf16.mxu1 %v5123_v14  ;;  %v5128_v35 = vld [vmem:[#allocation8 + $0x20] sm:$0xff]  }
 0x1db   : > { %4635 = vmatprep.subr.bf16.mxu0 %v5102_v25  ;;  %v5992_v34 = vpack.c.bf16 %v848_v15, %v847_v63  ;;  %v1406_v38 = vrot.slane %v5988_v19, 1  ;;  %v979_v44 = vor.u32 %v977_v22, %v5977_v31  ;;  %v972_v2 = vor.u32 %v970_v26, %v5979_v10  ;;  %v5104_v15 = vld [vmem:[#allocation8 + $0xb8] sm:$0xff]  }
 0x1dc   : > { %v1002_v23 = vshrl.u32 %v874_v27, 16  ;;  %v6001_v39 = vsel %vm5817_vm2, %v5907_v20, 0  ;;  %v1161_v49 = vor.u32 %v1160_v18, %v1156_v36  ;;  %v1165_v57 = vrot.slane %v1163_v17, 1 }
 0x1dd   : > { %v995_v46 = vshrl.u32 %v5992_v34, 16  ;;  %v6005_v21 = vsel %vm1389_vm3, %v1405_v33, %v1406_v38  ;;  %v1005_v61 = vshll.u32 %v874_v27, 16  ;;  %v1408_v63 = vrot.slane %v5975_v7, 1  ;;  %4236 = vmatpush3.bf16.msra.mxu1 %v5124_v0 }
 0x1de   : > { %4636 = vmatpush3.bf16.msra.mxu0 %v5102_v25  ;;  %4601 = vmatprep.mubr.bf16.mxu0 %v6005_v21  ;;  %v1409_v3 = vrot.slane %v6001_v39, 1  ;;  %v789_v20 = vadd.f32 %v5846_v59, %v5795_v52  ;;  %v6012_v4 = vrot.slane %v1002_v23, 7  ;;  %v6015_v11 = vsel %vm1118_vm4, %v1161_v49, %v1165_v57  ;;  %v5132_v57 = vld [vmem:[#allocation8 + $0x28] sm:$0xff]  }
 0x1df   : > { %4637 = vmatprep.subr.bf16.mxu0 %v5103_v32  ;;  %v781_v14 = vadd.f32 %v5795_v52, %v5850_v1  ;;  %v792_v25 = vadd.f32 %v5858_v8, %v5795_v52  ;;  %v6023_v17 = vsel %vm5817_vm2, 0, %v972_v2  ;;  %1751 = vmatprep.mubr.bf16.mxu1 %v6015_v11  ;;  %v784_v26 = vadd.f32 %v5795_v52, %v5867_v13  ;;  %v5130_v1 = vld [vmem:[#allocation8 + $0x68] sm:$0xff]  }
 0x1e0   : > { %v6027_v59 = vsel %vm1389_vm3, %v1408_v63, %v1409_v3  ;;  %v853_v22 = vmax.f32 %v789_v20, 0.0  ;;  %4237 = vmatprep.subr.bf16.mxu1 %v5127_v41  ;;  %v6031_v27 = vrot.slane %v995_v46, 7  ;;  %v998_v8 = vshll.u32 %v5992_v34, 16  ;;  %1752 = vmatmul.mubr.bf16.gmra.mrb[28].mxu1 %v5893_v45 }
 0x1e1   : > { %4602 = vmatmul.mubr.bf16.gmra.mrb[24].mxu0 %v6027_v59  ;;  %v851_v33 = vmax.f32 %v781_v14, 0.0  ;;  %v854_v36 = vmax.f32 %v792_v25, 0.0  ;;  %v6038_v18 = vsel %vm5817_vm2, 0, %v979_v44  ;;  %v852_v38 = vmax.f32 %v784_v26, 0.0  ;;  %v5107_v44 = vld [vmem:[#allocation8 + $0x1c0] sm:$0xff]   ;;  %4238 = vmatpush3.bf16.msra.mxu1 %v5128_v35  ;;  %v5133_v26 = vld [vmem:[#allocation8 + $0x70] sm:$0xff]  }
 0x1e2   : > { %v1170_v0 = vshll.u32 %v5885_v50, 16  ;;  %v1175_v13 = vshll.u32 %v5933_v9, 16  ;;  %4638 = vmatpush3.bf16.msra.mxu0 %v5103_v32  ;;  %v1007_v2 = vor.u32 %v1005_v61, %v6012_v4  ;;  %v6048_v34 = vsel %vm5817_vm2, %v5979_v10, 0  ;;  %4239 = vmatprep.subr.bf16.mxu1 %v5130_v1 }
 0x1e3   : > { %v6043_v23 = vpack.c.bf16 %v854_v36, %v853_v22  ;;  %v1411_v41 = vrot.slane %v6023_v17, 1  ;;  %4639 = vmatprep.subr.bf16.mxu0 %v5104_v15  ;;  %v6051_v46 = vpack.c.bf16 %v852_v38, %v851_v33  ;;  %v1168_v49 = vshrl.u32 %v5885_v50, 16  ;;  %v5134_v36 = vld [vmem:[#allocation8 + $0x30] sm:$0xff]  }
 0x1e4   : > { %v1172_v9 = vrot.slane %v1170_v0, 1  ;;  %v1412_v32 = vrot.slane %v6048_v34, 1  ;;  %v6058_v61 = vsel %vm5817_vm2, 0, %v5927_v29  ;;  %v1000_v10 = vor.u32 %v998_v8, %v6031_v27 }
 0x1e5   : > { %v6064_v63 = vsel %vm5817_vm2, %v5977_v31, 0  ;;  %v1414_v3 = vrot.slane %v6038_v18, 1  ;;  %v6070_v20 = vsel %vm5817_vm2, 0, %v5959_v55  ;;  %v1177_v25 = vrot.slane %v1175_v13, 1  ;;  %4240 = vmatpush3.bf16.msra.mxu1 %v5132_v57 }
 0x1e6   : > { %v1173_v14 = vor.u32 %v1172_v9, %v1168_v49  ;;  %v6073_v35 = vsel %vm1389_vm3, %v1411_v41, %v1412_v32  ;;  %4640 = vmatpush3.bf16.msra.mxu0 %v5104_v15  ;;  %v1009_v29 = vshrl.u32 %v6051_v46, 16  ;;  %v1415_v31 = vrot.slane %v6064_v63, 1  ;;  %4241 = vmatprep.subr.bf16.mxu1 %v5133_v26 }
 0x1e7   : > { %4605 = vmatprep.mubr.bf16.mxu0 %v6073_v35  ;;  %v6081_v22 = vsel %vm5817_vm2, %v5880_v37, 0  ;;  %v1417_v55 = vrot.slane %v6070_v20, 1  ;;  %4365 = vmatprep.subr.bf16.mxu0 %v5107_v44  ;;  %v6086_v1 = vsel %vm5817_vm2, 0, %v1007_v2  ;;  %v805_v33 = vadd.f32 %v5889_v42, %v5795_v52  ;;  %v5136_v2 = vld [vmem:[#allocation8 + $0x78] sm:$0xff]  }
 0x1e8   : > { %v6089_v15 = vsel %vm1118_vm4, %v1173_v14, %v1177_v25  ;;  %v1418_v8 = vrot.slane %v6081_v22, 1  ;;  %v6096_v37 = vsel %vm5817_vm2, 0, %v1000_v10  ;;  %v6100_v38 = vsel %vm1389_vm3, %v1414_v3, %v1415_v31  ;;  %v5137_v25 = vld [vmem:[#allocation8 + $0x38] sm:$0xff]  }
 0x1e9   : > { %1759 = vmatprep.mubr.bf16.mxu1 %v6089_v15  ;;  %v797_v0 = vadd.f32 %v5795_v52, %v5897_v53  ;;  %v808_v13 = vadd.f32 %v5905_v62, %v5795_v52  ;;  %v1016_v42 = vshrl.u32 %v6043_v23, 16  ;;  %4606 = vmatmul.mubr.bf16.gmra.mrb[28].mxu0 %v6100_v38  ;;  %v857_v44 = vmax.f32 %v805_v33, 0.0 }
 0x1ea   : > { %v6109_v41 = vsel %vm1389_vm3, %v1417_v55, %v1418_v8  ;;  %1760 = vmatmul.mubr.bf16.gmra.mrb[32].mxu1 %v5885_v50  ;;  %v800_v49 = vadd.f32 %v5795_v52, %v5912_v5  ;;  %v1011_v9 = vrot.slane %v1009_v29, 7  ;;  %v1012_v53 = vshll.u32 %v6051_v46, 16 }
 0x1eb   : > { %4609 = vmatprep.mubr.bf16.mxu0 %v6109_v41  ;;  %v855_v62 = vmax.f32 %v797_v0, 0.0  ;;  %v858_v32 = vmax.f32 %v808_v13, 0.0  ;;  %v1019_v57 = vshll.u32 %v6043_v23, 16  ;;  %v1182_v3 = vshll.u32 %v5956_v54, 16  ;;  %4242 = vmatpush3.bf16.msra.mxu1 %v5134_v36 }
 0x1ec   : > { %v856_v10 = vmax.f32 %v800_v49, 0.0  ;;  %v1187_v14 = vshll.u32 %v5988_v19, 16  ;;  %v6124_v5 = vsel %vm5817_vm2, %v5878_v30, 0  ;;  %v1420_v46 = vrot.slane %v6058_v61, 1  ;;  %4243 = vmatprep.subr.bf16.mxu1 %v5136_v2 }
 0x1ed   : > { %v6119_v31 = vpack.c.bf16 %v858_v32, %v857_v44  ;;  %v6130_v23 = vsel %vm5817_vm2, %v6031_v27, 0  ;;  %v1180_v19 = vshrl.u32 %v5956_v54, 16  ;;  %v1184_v55 = vrot.slane %v1182_v3, 1 }
 0x1ee   : > { %v877_v29 = vpack.c.bf16 %v856_v10, %v855_v62  ;;  %v1421_v26 = vrot.slane %v6124_v5, 1  ;;  %v1018_v8 = vrot.slane %v1016_v42, 7  ;;  %v1014_v33 = vor.u32 %v1012_v53, %v1011_v9 }
 0x1ef   : > { %v1423_v36 = vrot.slane %v6096_v37, 1  ;;  %v1424_v30 = vrot.slane %v6130_v23, 1  ;;  %v1185_v44 = vor.u32 %v1184_v55, %v1180_v19  ;;  %v1189_v49 = vrot.slane %v1187_v14, 1  ;;  %4244 = vmatpush3.bf16.msra.mxu1 %v5137_v25 }
 0x1f0   : > { %v1023_v0 = vshrl.u32 %v877_v29, 16  ;;  %v1026_v13 = vshll.u32 %v877_v29, 16  ;;  %v6137_v27 = vsel %vm1389_vm3, %v1420_v46, %v1421_v26  ;;  %v821_v62 = vadd.f32 %v5941_v24, %v5795_v52 }
 0x1f1   : > { %v6140_v2 = vsel %vm1389_vm3, %v1423_v36, %v1424_v30  ;;  %v813_v42 = vadd.f32 %v5795_v52, %v5952_v48  ;;  %v6147_v32 = vsel %vm1118_vm4, %v1185_v44, %v1189_v49  ;;  %4610 = vmatmul.mubr.bf16.gmra.mrb[32].mxu0 %v6137_v27  ;;  %v824_v10 = vadd.f32 %v5964_v58, %v5795_v52 }
 0x1f2   : > { %v1025_v53 = vrot.slane %v1023_v0, 7  ;;  %v816_v3 = vadd.f32 %v5795_v52, %v5971_v51  ;;  %v1021_v14 = vor.u32 %v1019_v57, %v1018_v8  ;;  %v6156_v25 = vsel %vm5817_vm2, 0, %v1014_v33  ;;  %1767 = vmatprep.mubr.bf16.mxu1 %v6147_v32  ;;  %4613 = vmatprep.mubr.bf16.mxu0 %v6140_v2 }
 0x1f3   : > { %v861_v24 = vmax.f32 %v821_v62, 0.0  ;;  %v859_v48 = vmax.f32 %v813_v42, 0.0  ;;  %v1030_v46 = vshrl.u32 %v6119_v31, 16  ;;  %v862_v29 = vmax.f32 %v824_v10, 0.0  ;;  %1768 = vmatmul.mubr.bf16.gmra.mrb[36].mxu1 %v5956_v54 }
 0x1f4   : > { %v860_v58 = vmax.f32 %v816_v3, 0.0  ;;  %v1194_v19 = vshll.u32 %v5975_v7, 16  ;;  %v1192_v52 = vshrl.u32 %v5975_v7, 16  ;;  %v1199_v51 = vshll.u32 %v6001_v39, 16 }
 0x1f5   : > { %v6168_v57 = vsel %vm5817_vm2, %v6012_v4, 0  ;;  %v1426_v55 = vrot.slane %v6086_v1, 1  ;;  %v1028_v26 = vor.u32 %v1026_v13, %v1025_v53  ;;  %v6171_v33 = vpack.c.bf16 %v862_v29, %v861_v24 }
 0x1f6   : > { %v879_v36 = vpack.c.bf16 %v860_v58, %v859_v48  ;;  %v1196_v30 = vrot.slane %v1194_v19, 1  ;;  %v6175_v0 = vsel %vm5817_vm2, 0, %v1021_v14  ;;  %v1427_v44 = vrot.slane %v6168_v57, 1 }
 0x1f7   : > { %6850 = vst [vmem:[#allocation21_spill] sm:$0xff] %v6171_v33  ;;  %v6180_v39 = vsel %vm5817_vm2, %v1011_v9, 0  ;;  %v1429_v4 = vrot.slane %v6156_v25, 1  ;;  %v1033_v49 = vshll.u32 %v6119_v31, 16  ;;  %v1201_v10 = vrot.slane %v1199_v51, 1 }
 0x1f8   : > { %v898_v62 = vmul.bf16 0.0, %v879_v36  ;;  %v1197_v13 = vor.u32 %v1196_v30, %v1192_v52  ;;  %v1430_v42 = vrot.slane %v6180_v39, 1  ;;  %v6186_v3 = vsel %vm1389_vm3, %v1426_v55, %v1427_v44 }
 0x1f9   : > { %v1206_v14 = vshll.u32 %v6023_v17, 16  ;;  %v1211_v24 = vshll.u32 %v6048_v34, 16  ;;  %v1032_v48 = vrot.slane %v1030_v46, 7  ;;  %v6192_v9 = vsel %vm5817_vm2, 0, %v1028_v26  ;;  %4614 = vmatmul.mubr.bf16.gmra.mrb[36].mxu0 %v6186_v3 }
 0x1fa   : > { %v918_v29 = vshrl.u32 %v898_v62, 16  ;;  %v1204_v31 = vshrl.u32 %v6023_v17, 16  ;;  %v921_v58 = vshll.u32 %v898_v62, 16  ;;  %v6197_v19 = vsel %vm1118_vm4, %v1197_v13, %v1201_v10 }
 0x1fb   : > { %v6200_v52 = vsel %vm1389_vm3, %v1429_v4, %v1430_v42  ;;  %v1208_v51 = vrot.slane %v1206_v14, 1  ;;  %1775 = vmatprep.mubr.bf16.mxu1 %v6197_v19  ;;  %v1213_v34 = vrot.slane %v1211_v24, 1  ;;  %v6206_v46 = vsel %vm5817_vm2, %v1018_v8, 0 }
 0x1fc   : > { %v920_v55 = vrot.slane %v918_v29, 7  ;;  %4617 = vmatprep.mubr.bf16.mxu0 %v6200_v52  ;;  %v1432_v26 = vrot.slane %v6175_v0, 1  ;;  %1776 = vmatmul.mubr.bf16.gmra.mrb[40].mxu1 %v5975_v7  ;;  %v1433_v30 = vrot.slane %v6206_v46, 1  ;;  %v6213_v44 = vsel %vm5817_vm2, %v1025_v53, 0 }
 0x1fd   : > { %v1209_v36 = vor.u32 %v1208_v51, %v1204_v31  ;;  %v1435_v4 = vrot.slane %v6192_v9, 1  ;;  %v1035_v62 = vor.u32 %v1033_v49, %v1032_v48  ;;  %v1436_v13 = vrot.slane %v6213_v44, 1 }
 0x1fe   : > { %v923_v42 = vor.u32 %v921_v58, %v920_v55  ;;  %v1218_v10 = vshll.u32 %v6038_v18, 16  ;;  %v1223_v14 = vshll.u32 %v6064_v63, 16  ;;  %v6227_v53 = vsel %vm1389_vm3, %v1432_v26, %v1433_v30 }
 0x1ff   : > { %v6218_v8 = vsel %vm1118_vm4, %v1209_v36, %v1213_v34  ;;  %v6224_v24 = vsel %vm1389_vm3, %v1435_v4, %v1436_v13  ;;  %v1216_v49 = vshrl.u32 %v6038_v18, 16  ;;  %v6232_v31 = vsel %vm5817_vm2, %v1032_v48, 0 }
 0x200   : > { %1783 = vmatprep.mubr.bf16.mxu1 %v6218_v8  ;;  %v1220_v29 = vrot.slane %v1218_v10, 1  ;;  %v6237_v63 = vsel %vm5817_vm2, %v920_v55, 0  ;;  %v1230_v58 = vshll.u32 %v6070_v20, 16  ;;  %v6242_v51 = vsel %vm5817_vm2, 0, %v1035_v62 }
 0x201   : > { %4618 = vmatmul.mubr.bf16.gmra.mrb[40].mxu0 %v6227_v53  ;;  %v6246_v34 = vsel %vm5817_vm2, 0, %v923_v42  ;;  %v1225_v26 = vrot.slane %v1223_v14, 1  ;;  %v1438_v36 = vrot.slane %v6242_v51, 1  ;;  %v1439_v30 = vrot.slane %v6232_v31, 1 }
 0x202   : > { %4621 = vmatprep.mubr.bf16.mxu0 %v6224_v24  ;;  %v1221_v48 = vor.u32 %v1220_v29, %v1216_v49  ;;  %v1390_v55 = vrot.slane %v6246_v34, 1  ;;  %v1391_v4 = vrot.slane %v6237_v63, 1  ;;  %v1228_v13 = vshrl.u32 %v6070_v20, 16 }
 0x203   : > { %v1232_v42 = vrot.slane %v1230_v58, 1  ;;  %v1235_v10 = vshll.u32 %v6081_v22, 16  ;;  %v6262_v49 = vsel %vm1389_vm3, %v1438_v36, %v1439_v30  ;;  %v1242_v33 = vshll.u32 %v6058_v61, 16  ;;  %v5108_v36 = vld [vmem:[#allocation8 + $0x180] sm:$0xff]   ;;  %v5109_v30 = vld [vmem:[#allocation8 + $0x1c8] sm:$0xff]  }
 0x204   : > { %1784 = vmatmul.mubr.bf16.gmra.mrb[44].mxu1 %v6023_v17  ;;  %v6255_v62 = vsel %vm1118_vm4, %v1221_v48, %v1225_v26  ;;  %v1392_v14 = vsel %vm1389_vm3, %v1390_v55, %v1391_v4  ;;  %v1240_v22 = vshrl.u32 %v6058_v61, 16  ;;  %v1247_v26 = vshll.u32 %v6124_v5, 16 }
 0x205   : > { %1791 = vmatprep.mubr.bf16.mxu1 %v6255_v62  ;;  %v1233_v29 = vor.u32 %v1232_v42, %v1228_v13  ;;  %v1237_v28 = vrot.slane %v1235_v10, 1  ;;  %v1244_v48 = vrot.slane %v1242_v33, 1  ;;  %v1254_v13 = vshll.u32 %v6096_v37, 16  ;;  %v5113_v42 = vld [vmem:[#allocation8 + $0x1d0] sm:$0xff]  }
 0x206   : > { %v1249_v4 = vrot.slane %v1247_v26, 1  ;;  %v1252_v33 = vshrl.u32 %v6096_v37, 16  ;;  %v1266_v26 = vshll.u32 %v6086_v1, 16 }
 0x207   : > { %v6268_v58 = vsel %vm1118_vm4, %v1233_v29, %v1237_v28  ;;  %v1245_v55 = vor.u32 %v1244_v48, %v1240_v22  ;;  %v5110_v28 = vld [vmem:[#allocation8 + $0x188] sm:$0xff]   ;;  %v1256_v10 = vrot.slane %v1254_v13, 1  ;;  %v5115_v29 = vld [vmem:[#allocation8 + $0x1d8] sm:$0xff]   ;;  %v1271_v13 = vshll.u32 %v6168_v57, 16 }
 0x209   : > { %4622 = vmatmul.mubr.bf16.gmra.mrb[44].mxu0 %v6262_v49  ;;  %v6278_v5 = vsel %vm1118_vm4, %v1245_v55, %v1249_v4  ;;  %v1257_v22 = vor.u32 %v1256_v10, %v1252_v33  ;;  %v1264_v55 = vshrl.u32 %v6086_v1, 16  ;;  %v1268_v4 = vrot.slane %v1266_v26, 1 }
 0x20a   : > { %4641 = vmatprep.mubr.bf16.mxu0 %v1392_v14  ;;  %v1259_v14 = vshll.u32 %v6130_v23, 16  ;;  %v1273_v10 = vrot.slane %v1271_v13, 1  ;;  %v1283_v26 = vshll.u32 %v6180_v39, 16  ;;  %v1290_v13 = vshll.u32 %v6175_v0, 16 }
 0x20b   : > { %v1269_v33 = vor.u32 %v1268_v4, %v1264_v55 }
 0x20c   : > { %1792 = vmatmul.mubr.bf16.gmra.mrb[48].mxu1 %v6038_v18  ;;  %v1261_v48 = vrot.slane %v1259_v14, 1  ;;  %v1278_v14 = vshll.u32 %v6156_v25, 16  ;;  %v1285_v4 = vrot.slane %v1283_v26, 1  ;;  %v1300_v26 = vshrl.u32 %v6192_v9, 16 }
 0x20d   : > { %1799 = vmatprep.mubr.bf16.mxu1 %v6268_v58  ;;  %v6298_v57 = vsel %vm1118_vm4, %v1269_v33, %v1273_v10  ;;  %v1288_v33 = vshrl.u32 %v6175_v0, 16  ;;  %v1292_v10 = vrot.slane %v1290_v13, 1 }
 0x20e   : > { %v6288_v23 = vsel %vm1118_vm4, %v1257_v22, %v1261_v48  ;;  %v1276_v22 = vshrl.u32 %v6156_v25, 16  ;;  %v1280_v48 = vrot.slane %v1278_v14, 1  ;;  %v1295_v14 = vshll.u32 %v6206_v46, 16 }
 0x210   : > { %v1281_v55 = vor.u32 %v1280_v48, %v1276_v22  ;;  %v1302_v22 = vshll.u32 %v6192_v9, 16 }
 0x211   : > { %4642 = vmatmul.mubr.bf16.vlgmr.msra.gmra.mrb[16].mxu0 %v5856_v6  ;;  %v5114_v6 = vld [vmem:[#allocation8 + $0x190] sm:$0xff]  }
 0x212   : > { %4366 = vmatpush3.bf16.msra.mxu0 %v5108_v36  ;;  %4645 = vmatprep.mubr.bf16.mxu0 %v5865_v12  ;;  %v5116_v36 = vld [vmem:[#allocation8 + $0x198] sm:$0xff]   ;;  %v6308_v39 = vsel %vm1118_vm4, %v1281_v55, %v1285_v4  ;;  %v1304_v46 = vrot.slane %v1302_v22, 1  ;;  %v1314_v4 = vshll.u32 %v6242_v51, 16  ;;  %v1120_v22 = vshrl.u32 %v6246_v34, 16 }
 0x213   : > { %4367 = vmatprep.subr.bf16.mxu0 %v5109_v30  ;;  %v5119_v30 = vld [vmem:[#allocation8 + $0x1e0] sm:$0xff]  }
 0x214   : > { %1800 = vmatmul.mubr.bf16.gmra.mrb[52].mxu1 %v6070_v20 }
 0x215   : > { %1807 = vmatprep.mubr.bf16.mxu1 %v6278_v5 }
 0x216   : > { %4368 = vmatpush3.bf16.msra.mxu0 %v5110_v28  ;;  %v5120_v28 = vld [vmem:[#allocation8 + $0x1a0] sm:$0xff]  }
 0x217   : > { %4369 = vmatprep.subr.bf16.mxu0 %v5113_v42  ;;  %v5121_v42 = vld [vmem:[#allocation8 + $0x1e8] sm:$0xff]  }
 0x219   : > { %4646 = vmatmul.mubr.bf16.gmra.mrb[20].mxu0 %v5945_v40 }
 0x21a   : > { %4649 = vmatprep.mubr.bf16.mxu0 %v5967_v60  ;;  %4370 = vmatpush3.bf16.msra.mxu0 %v5114_v6  ;;  %v5122_v6 = vld [vmem:[#allocation8 + $0x1a8] sm:$0xff]  }
 0x21b   : > { %4371 = vmatprep.subr.bf16.mxu0 %v5115_v29  ;;  %v5125_v29 = vld [vmem:[#allocation8 + $0x1f0] sm:$0xff]  }
 0x21c   : > { %1808 = vmatmul.mubr.bf16.gmra.mrb[56].mxu1 %v6058_v61 }
 0x21d   : > { %1815 = vmatprep.mubr.bf16.mxu1 %v6288_v23 }
 0x21e   : > { %4372 = vmatpush3.bf16.msra.mxu0 %v5116_v36  ;;  %v5126_v36 = vld [vmem:[#allocation8 + $0x1b0] sm:$0xff]  }
 0x21f   : > { %4373 = vmatprep.subr.bf16.mxu0 %v5119_v30  ;;  %v5129_v30 = vld [vmem:[#allocation8 + $0x1f8] sm:$0xff]  }
 0x221   : > { %4650 = vmatmul.mubr.bf16.gmra.mrb[24].mxu0 %v6005_v21 }
 0x222   : > { %4653 = vmatprep.mubr.bf16.mxu0 %v6027_v59  ;;  %4374 = vmatpush3.bf16.msra.mxu0 %v5120_v28  ;;  %v5131_v28 = vld [vmem:[#allocation8 + $0x1b8] sm:$0xff]  }
 0x223   : > { %4375 = vmatprep.subr.bf16.mxu0 %v5121_v42  ;;  %v5135_v42 = vld [vmem:[#allocation8 + $0x200] sm:$0xff]  }
 0x224   : > { %1816 = vmatmul.mubr.bf16.gmra.mrb[60].mxu1 %v6096_v37 }
 0x225   : > { %1823 = vmatprep.mubr.bf16.mxu1 %v6298_v57 }
 0x226   : > { %4376 = vmatpush3.bf16.msra.mxu0 %v5122_v6  ;;  %v1293_v6 = vor.u32 %v1292_v10, %v1288_v33  ;;  %v1316_v33 = vrot.slane %v1314_v4, 1  ;;  %v5140_v4 = vld [vmem:[#allocation8 + $0x218] sm:$0xff]  }
 0x227   : > { %4377 = vmatprep.subr.bf16.mxu0 %v5125_v29  ;;  %v1297_v29 = vrot.slane %v1295_v14, 1 }
 0x229   : > { %4654 = vmatmul.mubr.bf16.gmra.mrb[28].mxu0 %v6073_v35  ;;  %v6318_v48 = vsel %vm1118_vm4, %v1293_v6, %v1297_v29  ;;  %v1122_v6 = vshll.u32 %v6246_v34, 16 }
 0x22a   : > { %4657 = vmatprep.mubr.bf16.mxu0 %v6100_v38  ;;  %4378 = vmatpush3.bf16.msra.mxu0 %v5126_v36  ;;  %v1307_v36 = vshll.u32 %v6213_v44, 16  ;;  %v1319_v44 = vshll.u32 %v6232_v31, 16  ;;  %v1127_v31 = vshll.u32 %v6237_v63, 16  ;;  %v5139_v63 = vld [vmem:[#allocation8 + $0x210] sm:$0xff]  }
 0x22b   : > { %4379 = vmatprep.subr.bf16.mxu0 %v5129_v30  ;;  %v1305_v30 = vor.u32 %v1304_v46, %v1300_v26  ;;  %v1124_v26 = vrot.slane %v1122_v6, 1 }
 0x22c   : > { %1824 = vmatmul.mubr.bf16.gmra.mrb[64].mxu1 %v6086_v1  ;;  %v1309_v55 = vrot.slane %v1307_v36, 1  ;;  %v1321_v14 = vrot.slane %v1319_v44, 1  ;;  %v1129_v36 = vrot.slane %v1127_v31, 1 }
 0x22d   : > { %1831 = vmatprep.mubr.bf16.mxu1 %v6308_v39  ;;  %v1125_v46 = vor.u32 %v1124_v26, %v1120_v22 }
 0x22e   : > { %4380 = vmatpush3.bf16.msra.mxu0 %v5131_v28  ;;  %v6328_v13 = vsel %vm1118_vm4, %v1305_v30, %v1309_v55  ;;  %v1312_v28 = vshrl.u32 %v6242_v51, 16  ;;  %v5138_v55 = vld [vmem:[#allocation8 + $0x208] sm:$0xff]  }
 0x22f   : > { %4673 = vmatprep.subr.bf16.mxu0 %v5135_v42  ;;  %v1130_v30 = vsel %vm1118_vm4, %v1125_v46, %v1129_v36 }
 0x230   : > { %v1317_v10 = vor.u32 %v1316_v33, %v1312_v28  ;;  %v5141_v28 = vld [vmem:[#allocation8 + $0x220] sm:$0xff]  }
 0x231   : > { %4658 = vmatmul.mubr.bf16.gmra.mrb[32].mxu0 %v6109_v41 }
 0x232   : > { %4661 = vmatprep.mubr.bf16.mxu0 %v6137_v27  ;;  %v6338_v29 = vsel %vm1118_vm4, %v1317_v10, %v1321_v14 }
 0x234   : > { %1832 = vmatmul.mubr.bf16.gmra.mrb[68].mxu1 %v6156_v25 }
 0x235   : > { %1839 = vmatprep.mubr.bf16.mxu1 %v6318_v48 }
 0x239   : > { %4662 = vmatmul.mubr.bf16.gmra.mrb[36].mxu0 %v6140_v2 }
 0x23a   : > { %4665 = vmatprep.mubr.bf16.mxu0 %v6186_v3 }
 0x23c   : > { %1840 = vmatmul.mubr.bf16.gmra.mrb[72].mxu1 %v6175_v0 }
 0x23d   : > { %1847 = vmatprep.mubr.bf16.mxu1 %v6328_v13 }
 0x241   : > { %4666 = vmatmul.mubr.bf16.gmra.mrb[40].mxu0 %v6200_v52 }
 0x242   : > { %4669 = vmatprep.mubr.bf16.mxu0 %v6227_v53 }
 0x244   : > { %1848 = vmatmul.mubr.bf16.gmra.mrb[76].mxu1 %v6192_v9 }
 0x245   : > { %1855 = vmatprep.mubr.bf16.mxu1 %v6338_v29 }
 0x249   : > { %4670 = vmatmul.mubr.bf16.gmra.mrb[44].mxu0 %v6224_v24 }
 0x24a   : > { %2716 = vmatprep.mubr.bf16.mxu0 %v5939_v16 }
 0x24c   : > { %1856 = vmatmul.mubr.bf16.gmra.mrb[80].mxu1 %v6242_v51 }
 0x24d   : > { %2201 = vmatprep.mubr.bf16.mxu1 %v1130_v30 }
 0x251   : > { %2717 = vmatmul.mubr.bf16.vlgmr.msra.gmra.mrb[48].mxu0 %v5831_v43 }
 0x252   : > { %4674 = vmatpush3.bf16.msra.mxu0 %v5135_v42  ;;  %2724 = vmatprep.mubr.bf16.mxu0 %v6015_v11  ;;  %v5142_v42 = vld [vmem:[#allocation8 + $0x228] sm:$0xff]  }
 0x253   : > { %4675 = vmatprep.subr.bf16.mxu0 %v5138_v55 }
 0x254   : > { %2202 = vmatmul.mubr.bf16.vlgmr.msra.gmra.mrb[84].mxu1 %v6246_v34  ;;  %v5144_v34 = vld [vmem:[#allocation8 + $0x238] sm:$0xff]  }
 0x255   : > { %2209 = vmatprep.mubr.bf16.mxu1 %v5901_v56  ;;  %v5143_v56 = vld [vmem:[#allocation8 + $0x230] sm:$0xff]  }
 0x256   : > { %4676 = vmatpush3.bf16.msra.mxu0 %v5138_v55 }
 0x257   : > { %4677 = vmatprep.subr.bf16.mxu0 %v5139_v63 }
 0x259   : > { %2725 = vmatmul.mubr.bf16.gmra.mrb[52].mxu0 %v5893_v45 }
 0x25a   : > { %2732 = vmatprep.mubr.bf16.mxu0 %v6089_v15  ;;  %4678 = vmatpush3.bf16.msra.mxu0 %v5139_v63 }
 0x25b   : > { %4679 = vmatprep.subr.bf16.mxu0 %v5140_v4 }
 0x25c   : > { %2210 = vmatmul.mubr.bf16.gmra.mrb[88].mxu1 %v5840_v47 }
 0x25d   : > { %2217 = vmatprep.mubr.bf16.mxu1 %v5939_v16 }
 0x25e   : > { %4680 = vmatpush3.bf16.msra.mxu0 %v5140_v4 }
 0x25f   : > { %4681 = vmatprep.subr.bf16.mxu0 %v5141_v28 }
 0x261   : > { %2733 = vmatmul.mubr.bf16.gmra.mrb[56].mxu0 %v5885_v50 }
 0x262   : > { %2740 = vmatprep.mubr.bf16.mxu0 %v6147_v32  ;;  %4682 = vmatpush3.bf16.msra.mxu0 %v5141_v28 }
 0x263   : > { %4683 = vmatprep.subr.bf16.mxu0 %v5142_v42 }
 0x264   : > { %2218 = vmatmul.mubr.bf16.gmra.mrb[92].mxu1 %v5831_v43  ;;  %v6851_v43 = vld [vmem:[#allocation21_spill] sm:$0xff] }
 0x265   : > { %2225 = vmatprep.mubr.bf16.mxu1 %v6015_v11  ;;  %v916_v47 = vmul.bf16 0.0, %v6851_v43 }
 0x266   : > { %4684 = vmatpush3.bf16.msra.mxu0 %v5142_v42 }
 0x267   : > { %4685 = vmatprep.subr.bf16.mxu0 %v5143_v56  ;;  %v1037_v11 = vshrl.u32 %v916_v47, 16 }
 0x269   : > { %2741 = vmatmul.mubr.bf16.gmra.mrb[60].mxu0 %v5956_v54 }
 0x26a   : > { %2748 = vmatprep.mubr.bf16.mxu0 %v6197_v19  ;;  %4686 = vmatpush3.bf16.msra.mxu0 %v5143_v56  ;;  %v5146_v56 = vld [vmem:[#allocation10 + $0x8] sm:$0xff]  }
 0x26b   : > { %4687 = vmatprep.subr.bf16.mxu0 %v5144_v34 }
 0x26c   : > { %2226 = vmatmul.mubr.bf16.gmra.mrb[96].mxu1 %v5893_v45 }
 0x26d   : > { %2233 = vmatprep.mubr.bf16.mxu1 %v6089_v15 }
 0x26e   : > { %4688 = vmatpush3.bf16.msra.mxu0 %v5144_v34 }
 0x271   : > { %2749 = vmatmul.mubr.bf16.gmra.mrb[64].mxu0 %v5975_v7 }
 0x272   : > { %2756 = vmatprep.mubr.bf16.mxu0 %v6218_v8 }
 0x274   : > { %2234 = vmatmul.mubr.bf16.gmra.mrb[100].mxu1 %v5885_v50 }
 0x275   : > { %2241 = vmatprep.mubr.bf16.mxu1 %v6147_v32 }
 0x279   : > { %2757 = vmatmul.mubr.bf16.gmra.mrb[68].mxu0 %v6023_v17 }
 0x27a   : > { %2764 = vmatprep.mubr.bf16.mxu0 %v6255_v62 }
 0x27c   : > { %2242 = vmatmul.mubr.bf16.gmra.mrb[104].mxu1 %v5956_v54 }
 0x27d   : > { %2249 = vmatprep.mubr.bf16.mxu1 %v6197_v19 }
 0x281   : > { %2765 = vmatmul.mubr.bf16.gmra.mrb[72].mxu0 %v6038_v18 }
 0x282   : > { %2772 = vmatprep.mubr.bf16.mxu0 %v6268_v58 }
 0x284   : > { %2250 = vmatmul.mubr.bf16.gmra.mrb[108].mxu1 %v5975_v7 }
 0x285   : > { %2257 = vmatprep.mubr.bf16.mxu1 %v6218_v8 }
 0x289   : > { %2773 = vmatmul.mubr.bf16.gmra.mrb[76].mxu0 %v6070_v20 }
 0x28a   : > { %2780 = vmatprep.mubr.bf16.mxu0 %v6278_v5 }
 0x28c   : > { %2258 = vmatmul.mubr.bf16.gmra.mrb[112].mxu1 %v6023_v17 }
 0x28d   : > { %2265 = vmatprep.mubr.bf16.mxu1 %v6255_v62 }
 0x291   : > { %2781 = vmatmul.mubr.bf16.gmra.mrb[80].mxu0 %v6058_v61 }
 0x292   : > { %2788 = vmatprep.mubr.bf16.mxu0 %v6288_v23 }
 0x294   : > { %2266 = vmatmul.mubr.bf16.gmra.mrb[116].mxu1 %v6038_v18  ;;  %v1039_v18 = vrot.slane %v1037_v11, 7 }
 0x295   : > { %2273 = vmatprep.mubr.bf16.mxu1 %v6268_v58 }
 0x296   : > { %v6417_v22 = vsel %vm5817_vm2, %v1039_v18, 0 }
 0x297   : > { %v1331_v46 = vshll.u32 %v6417_v22, 16 }
 0x299   : > { %2789 = vmatmul.mubr.bf16.gmra.mrb[84].mxu0 %v6096_v37  ;;  %v1333_v55 = vrot.slane %v1331_v46, 1 }
 0x29a   : > { %2796 = vmatprep.mubr.bf16.mxu0 %v6298_v57 }
 0x29c   : > { %2274 = vmatmul.mubr.bf16.gmra.mrb[120].mxu1 %v6070_v20  ;;  %v1040_v20 = vshll.u32 %v916_v47, 16 }
 0x29d   : > { %2281 = vmatprep.mubr.bf16.mxu1 %v6278_v5  ;;  %v5145_v5 = vld [vmem:[#allocation10] sm:$0xff]  }
 0x29e   : > { %v1042_v62 = vor.u32 %v1040_v20, %v1039_v18  ;;  %4721 = vmatprep.subr.bf16.mxu1 %v5145_v5 }
 0x29f   : > { %4722 = vmatpush3.bf16.msra.mxu1 %v5145_v5 }
 0x2a0   : > { %v6407_v33 = vsel %vm5817_vm2, 0, %v1042_v62  ;;  %4723 = vmatprep.subr.bf16.mxu1 %v5146_v56 }
 0x2a1   : > { %2797 = vmatmul.mubr.bf16.gmra.mrb[88].mxu0 %v6086_v1  ;;  %v1326_v14 = vshll.u32 %v6407_v33, 16  ;;  %v1324_v31 = vshrl.u32 %v6407_v33, 16 }
 0x2a2   : > { %2804 = vmatprep.mubr.bf16.mxu0 %v6308_v39 }
 0x2a3   : > { %v4109_v50 = vpop.f32.mrb[20].mxu1  ;;  %4724 = vmatpush3.bf16.msra.mxu1 %v5146_v56 }
 0x2a4   : > { %v4110_v45 = vpop.f32.mrb[21].mxu1  ;;  %2282 = vmatmul.mubr.bf16.gmra.mrb[124].mxu1 %v6058_v61 }
 0x2a5   : > { %v6391_v16 = vadd.f32 %v4110_v45, %v4109_v50  ;;  %v4112_v54 = vpop.f32.mrb[22].mxu1  ;;  %2289 = vmatprep.mubr.bf16.mxu1 %v6288_v23 }
 0x2a6   : > { %v4113_v7 = vpop.f32.mrb[23].mxu1 }
 0x2a7   : > { %v6394_v17 = vadd.f32 %v4113_v7, %v4112_v54  ;;  %v5147_v54 = vld [vmem:[#allocation10 + $0x10] sm:$0xff]  }
 0x2a8   : > { %4725 = vmatprep.subr.bf16.mxu1 %v5147_v54 }
 0x2a9   : > { %2805 = vmatmul.mubr.bf16.gmra.mrb[92].mxu0 %v6156_v25  ;;  %4726 = vmatpush3.bf16.msra.mxu1 %v5147_v54 }
 0x2aa   : > { %2812 = vmatprep.mubr.bf16.mxu0 %v6318_v48 }
 0x2ab   : > { %v4115_v15 = vpop.f32.mrb[24].mxu1 }
 0x2ac   : > { %v4116_v32 = vpop.f32.mrb[25].mxu1  ;;  %2290 = vmatmul.mubr.bf16.gmra.mrb[128].mxu1 %v6096_v37 }
 0x2ad   : > { %v6399_v61 = vadd.f32 %v4116_v32, %v4115_v15  ;;  %v4118_v19 = vpop.f32.mrb[26].mxu1  ;;  %2297 = vmatprep.mubr.bf16.mxu1 %v6298_v57 }
 0x2ae   : > { %v4119_v8 = vpop.f32.mrb[27].mxu1 }
 0x2af   : > { %v6402_v58 = vadd.f32 %v4119_v8, %v4118_v19 }
 0x2b1   : > { %2813 = vmatmul.mubr.bf16.gmra.mrb[96].mxu0 %v6175_v0 }
 0x2b2   : > { %2820 = vmatprep.mubr.bf16.mxu0 %v6328_v13 }
 0x2b3   : > { %v4121_v37 = vpop.f32.mrb[28].mxu1 }
 0x2b4   : > { %2298 = vmatmul.mubr.bf16.gmra.mrb[132].mxu1 %v6086_v1  ;;  %v4122_v44 = vpop.f32.mrb[29].mxu1  ;;  %v1328_v1 = vrot.slane %v1326_v14, 1 }
 0x2b5   : > { %2305 = vmatprep.mubr.bf16.mxu1 %v6308_v39  ;;  %v6412_v57 = vadd.f32 %v4122_v44, %v4121_v37  ;;  %v4124_v10 = vpop.f32.mrb[30].mxu1 }
 0x2b6   : > { %v4125_v6 = vpop.f32.mrb[31].mxu1  ;;  %v1329_v30 = vor.u32 %v1328_v1, %v1324_v31 }
 0x2b7   : > { %v6419_v26 = vadd.f32 %v4125_v6, %v4124_v10 }
 0x2b8   : > { %v1334_v34 = vsel %vm1118_vm4, %v1329_v30, %v1333_v55 }
 0x2b9   : > { %2821 = vmatmul.mubr.bf16.gmra.mrb[100].mxu0 %v6192_v9 }
 0x2ba   : > { %2828 = vmatprep.mubr.bf16.mxu0 %v6338_v29 }
 0x2bc   : > { %2306 = vmatmul.mubr.bf16.gmra.mrb[136].mxu1 %v6156_v25 }
 0x2bd   : > { %v4127_v39 = vpop.f32.mrb[32].mxu1  ;;  %2313 = vmatprep.mubr.bf16.mxu1 %v6318_v48 }
 0x2be   : > { %v4128_v36 = vpop.f32.mrb[33].mxu1 }
 0x2bf   : > { %v6427_v63 = vadd.f32 %v4128_v36, %v4127_v39  ;;  %v4130_v4 = vpop.f32.mrb[34].mxu1 }
 0x2c0   : > { %v4131_v28 = vpop.f32.mrb[35].mxu1 }
 0x2c1   : > { %v6429_v42 = vadd.f32 %v4131_v28, %v4130_v4  ;;  %2829 = vmatmul.mubr.bf16.gmra.mrb[104].mxu0 %v6242_v51 }
 0x2c2   : > { %2836 = vmatprep.mubr.bf16.mxu0 %v1334_v34 }
 0x2c4   : > { %2314 = vmatmul.mubr.bf16.gmra.mrb[140].mxu1 %v6175_v0 }
 0x2c5   : > { %2321 = vmatprep.mubr.bf16.mxu1 %v6328_v13 }
 0x2c6   : > { %v4133_v25 = vpop.f32.mrb[36].mxu1 }
 0x2c7   : > { %v4134_v48 = vpop.f32.mrb[37].mxu1 }
 0x2c8   : > { %v6435_v29 = vadd.f32 %v4134_v48, %v4133_v25  ;;  %v4136_v43 = vpop.f32.mrb[38].mxu1 }
 0x2c9   : > { %2837 = vmatmul.mubr.bf16.gmra.mrb[108].mxu0 %v6407_v33  ;;  %v4137_v47 = vpop.f32.mrb[39].mxu1 }
 0x2ca   : > { %4689 = vmatprep.mubr.bf16.mxu0 %v5865_v12  ;;  %v6439_v51 = vadd.f32 %v4137_v47, %v4136_v43 }
 0x2cc   : > { %2322 = vmatmul.mubr.bf16.gmra.mrb[144].mxu1 %v6192_v9 }
 0x2cf   : > { %v4139_v50 = vpop.f32.mrb[40].mxu1 }
 0x2d0   : > { %v4140_v45 = vpop.f32.mrb[41].mxu1 }
 0x2d1   : > { %v6442_v0 = vadd.f32 %v4140_v45, %v4139_v50  ;;  %4690 = vmatmul.mubr.bf16.vlgmr.msra.gmra.mrb[16].mxu0 %v5945_v40  ;;  %v4142_v13 = vpop.f32.mrb[42].mxu1 }
 0x2d2   : > { %4693 = vmatprep.mubr.bf16.mxu0 %v5967_v60  ;;  %v4143_v7 = vpop.f32.mrb[43].mxu1  ;;  %v5148_v60 = vld [vmem:[#allocation10 + $0x18] sm:$0xff]  }
 0x2d3   : > { %v6446_v11 = vadd.f32 %v4143_v7, %v4142_v13  ;;  %4727 = vmatprep.subr.bf16.mxu1 %v5148_v60 }
 0x2d4   : > { %4728 = vmatpush3.bf16.msra.mxu1 %v5148_v60 }
 0x2d7   : > { %v4145_v12 = vpop.f32.mrb[44].mxu1 }
 0x2d8   : > { %v4146_v18 = vpop.f32.mrb[45].mxu1 }
 0x2d9   : > { %v6448_v20 = vadd.f32 %v4146_v18, %v4145_v12  ;;  %4694 = vmatmul.mubr.bf16.gmra.mrb[20].mxu0 %v6005_v21  ;;  %v4148_v9 = vpop.f32.mrb[46].mxu1  ;;  %v5151_v12 = vld [vmem:[#allocation10 + $0x30] sm:$0xff]  }
 0x2da   : > { %4697 = vmatprep.mubr.bf16.mxu0 %v6027_v59  ;;  %v4149_v15 = vpop.f32.mrb[47].mxu1 }
 0x2db   : > { %v6452_v32 = vadd.f32 %v4149_v15, %v4148_v9 }
 0x2df   : > { %v4151_v40 = vpop.f32.mrb[48].mxu1 }
 0x2e0   : > { %v4152_v19 = vpop.f32.mrb[49].mxu1 }
 0x2e1   : > { %v6454_v8 = vadd.f32 %v4152_v19, %v4151_v40  ;;  %4698 = vmatmul.mubr.bf16.gmra.mrb[24].mxu0 %v6073_v35  ;;  %v4154_v62 = vpop.f32.mrb[50].mxu1 }
 0x2e2   : > { %4701 = vmatprep.mubr.bf16.mxu0 %v6100_v38  ;;  %v4155_v5 = vpop.f32.mrb[51].mxu1  ;;  %v5149_v38 = vld [vmem:[#allocation10 + $0x20] sm:$0xff]  }
 0x2e3   : > { %v6458_v23 = vadd.f32 %v4155_v5, %v4154_v62  ;;  %4729 = vmatprep.subr.bf16.mxu1 %v5149_v38 }
 0x2e4   : > { %4730 = vmatpush3.bf16.msra.mxu1 %v5149_v38 }
 0x2e7   : > { %v4157_v21 = vpop.f32.mrb[52].mxu1 }
 0x2e8   : > { %v4158_v59 = vpop.f32.mrb[53].mxu1 }
 0x2e9   : > { %v6460_v37 = vadd.f32 %v4158_v59, %v4157_v21  ;;  %4702 = vmatmul.mubr.bf16.gmra.mrb[28].mxu0 %v6109_v41  ;;  %v4160_v44 = vpop.f32.mrb[54].mxu1 }
 0x2ea   : > { %4705 = vmatprep.mubr.bf16.mxu0 %v6137_v27  ;;  %v4161_v10 = vpop.f32.mrb[55].mxu1 }
 0x2eb   : > { %v6464_v14 = vadd.f32 %v4161_v10, %v4160_v44  ;;  %v5152_v44 = vld [vmem:[#allocation10 + $0x38] sm:$0xff]  }
 0x2ef   : > { %v4163_v35 = vpop.f32.mrb[56].mxu1 }
 0x2f0   : > { %v4164_v6 = vpop.f32.mrb[57].mxu1 }
 0x2f1   : > { %v6466_v31 = vadd.f32 %v4164_v6, %v4163_v35  ;;  %4706 = vmatmul.mubr.bf16.gmra.mrb[32].mxu0 %v6140_v2  ;;  %v4166_v1 = vpop.f32.mrb[58].mxu1 }
 0x2f2   : > { %4709 = vmatprep.mubr.bf16.mxu0 %v6186_v3  ;;  %v4167_v46 = vpop.f32.mrb[59].mxu1  ;;  %v5150_v3 = vld [vmem:[#allocation10 + $0x28] sm:$0xff]  }
 0x2f3   : > { %v6470_v39 = vadd.f32 %v4167_v46, %v4166_v1  ;;  %4731 = vmatprep.subr.bf16.mxu1 %v5150_v3 }
 0x2f4   : > { %4732 = vmatpush3.bf16.msra.mxu1 %v5150_v3 }
 0x2f5   : > { %4733 = vmatprep.subr.bf16.mxu1 %v5151_v12 }
 0x2f7   : > { %v4169_v41 = vpop.f32.mrb[60].mxu1 }
 0x2f8   : > { %v4170_v27 = vpop.f32.mrb[61].mxu1  ;;  %4734 = vmatpush3.bf16.msra.mxu1 %v5151_v12 }
 0x2f9   : > { %v6472_v36 = vadd.f32 %v4170_v27, %v4169_v41  ;;  %4710 = vmatmul.mubr.bf16.gmra.mrb[36].mxu0 %v6200_v52  ;;  %v4172_v30 = vpop.f32.mrb[62].mxu1  ;;  %v1441_v52 = vrot.slane %v6407_v33, 1  ;;  %4735 = vmatprep.subr.bf16.mxu1 %v5152_v44 }
 0x2fa   : > { %4713 = vmatprep.mubr.bf16.mxu0 %v6227_v53  ;;  %v4173_v55 = vpop.f32.mrb[63].mxu1  ;;  %v1442_v53 = vrot.slane %v6417_v22, 1 }
 0x2fb   : > { %v6476_v4 = vadd.f32 %v4173_v55, %v4172_v30 }
 0x2fc   : > { %v1443_v50 = vsel %vm1389_vm3, %v1441_v52, %v1442_v53  ;;  %4736 = vmatpush3.bf16.msra.mxu1 %v5152_v44 }
 0x2ff   : > { %v4175_v2 = vpop.f32.mrb[64].mxu1 }
 0x300   : > { %v4176_v28 = vpop.f32.mrb[65].mxu1 }
 0x301   : > { %v6478_v56 = vadd.f32 %v4176_v28, %v4175_v2  ;;  %4714 = vmatmul.mubr.bf16.gmra.mrb[40].mxu0 %v6224_v24  ;;  %v4178_v34 = vpop.f32.mrb[66].mxu1 }
 0x302   : > { %4717 = vmatprep.mubr.bf16.mxu0 %v6262_v49  ;;  %v4179_v25 = vpop.f32.mrb[67].mxu1 }
 0x303   : > { %v6482_v48 = vadd.f32 %v4179_v25, %v4178_v34 }
 0x307   : > { %v4181_v43 = vpop.f32.mrb[68].mxu1 }
 0x308   : > { %v4182_v47 = vpop.f32.mrb[69].mxu1 }
 0x309   : > { %v6487_v45 = vadd.f32 %v4182_v47, %v4181_v43  ;;  %4718 = vmatmul.mubr.bf16.gmra.mrb[44].mxu0 %v1443_v50  ;;  %v4184_v24 = vpop.f32.mrb[70].mxu1 }
 0x30a   : > { %v4185_v54 = vpop.f32.mrb[71].mxu1 }
 0x30b   : > { %v6489_v13 = vadd.f32 %v4185_v54, %v4184_v24 }
 0x30f   : > { %v4187_v49 = vpop.f32.mrb[72].mxu1 }
 0x310   : > { %v4188_v7 = vpop.f32.mrb[73].mxu1 }
 0x311   : > { %v6491_v18 = vadd.f32 %v4188_v7, %v4187_v49  ;;  %v4190_v9 = vpop.f32.mrb[74].mxu1 }
 0x312   : > { %v4191_v33 = vpop.f32.mrb[75].mxu1 }
 0x313   : > { %v6493_v22 = vadd.f32 %v4191_v33, %v4190_v9 }
 0x317   : > { %v4193_v15 = vpop.f32.mrb[76].mxu1 }
 0x318   : > { %v4194_v40 = vpop.f32.mrb[77].mxu1 }
 0x319   : > { %v6495_v19 = vadd.f32 %v4194_v40, %v4193_v15  ;;  %v4196_v60 = vpop.f32.mrb[78].mxu1 }
 0x31a   : > { %v4197_v62 = vpop.f32.mrb[79].mxu1 }
 0x31b   : > { %v6497_v5 = vadd.f32 %v4197_v62, %v4196_v60 }
 0x31f   : > { %v4199_v21 = vpop.f32.mrb[80].mxu1 }
 0x320   : > { %v4200_v59 = vpop.f32.mrb[81].mxu1 }
 0x321   : > { %v6499_v10 = vadd.f32 %v4200_v59, %v4199_v21  ;;  %v4202_v35 = vpop.f32.mrb[82].mxu1 }
 0x322   : > { %v4203_v6 = vpop.f32.mrb[83].mxu1 }
 0x323   : > { %v6501_v38 = vadd.f32 %v4203_v6, %v4202_v35 }
 0x324   : > { %v4381_v1 = vpop.f32.mrb[48].mxu0 }
 0x325   : > { %v4382_v46 = vpop.f32.mrb[49].mxu0 }
 0x326   : > { %v4383_v41 = vadd.f32 %v4382_v46, %v4381_v1  ;;  %v4384_v27 = vpop.f32.mrb[50].mxu0 }
 0x327   : > { %v4385_v30 = vpop.f32.mrb[51].mxu0  ;;  %v4245_v55 = vpop.f32.mrb[84].mxu1 }
 0x328   : > { %v4386_v2 = vadd.f32 %v4385_v30, %v4384_v27  ;;  %v4246_v28 = vpop.f32.mrb[85].mxu1 }
 0x329   : > { %v4247_v3 = vadd.f32 %v4246_v28, %v4245_v55  ;;  %v4248_v34 = vpop.f32.mrb[86].mxu1 }
 0x32a   : > { %v4249_v25 = vpop.f32.mrb[87].mxu1 }
 0x32b   : > { %v4788_v52 = vadd.f32 %v4247_v3, %v6391_v16  ;;  %v4250_v53 = vadd.f32 %v4249_v25, %v4248_v34 }
 0x32c   : > { %v4387_v43 = vpop.f32.mrb[52].mxu0 }
 0x32d   : > { %v4794_v47 = vadd.f32 %v4250_v53, %v6394_v17  ;;  %v4388_v50 = vpop.f32.mrb[53].mxu0  ;;  %v6505_v24 = vadd.f32 %v4788_v52, %v4383_v41 }
 0x32e   : > { %v4389_v54 = vadd.f32 %v4388_v50, %v4387_v43  ;;  %v4390_v49 = vpop.f32.mrb[54].mxu0 }
 0x32f   : > { %v4391_v7 = vpop.f32.mrb[55].mxu0  ;;  %v4251_v12 = vpop.f32.mrb[88].mxu1  ;;  %v6507_v9 = vadd.f32 %v4794_v47, %v4386_v2 }
 0x330   : > { %v4392_v33 = vadd.f32 %v4391_v7, %v4390_v49  ;;  %v4252_v15 = vpop.f32.mrb[89].mxu1 }
 0x331   : > { %v4253_v40 = vadd.f32 %v4252_v15, %v4251_v12  ;;  %v4254_v60 = vpop.f32.mrb[90].mxu1 }
 0x332   : > { %v4255_v62 = vpop.f32.mrb[91].mxu1 }
 0x333   : > { %v4785_v16 = vadd.f32 %v4253_v40, %v6399_v61  ;;  %v4256_v21 = vadd.f32 %v4255_v62, %v4254_v60 }
 0x334   : > { %v4393_v59 = vpop.f32.mrb[56].mxu0 }
 0x335   : > { %v4791_v17 = vadd.f32 %v4256_v21, %v6402_v58  ;;  %v4394_v44 = vpop.f32.mrb[57].mxu0  ;;  %v6511_v35 = vadd.f32 %v4785_v16, %v4389_v54 }
 0x336   : > { %v4395_v6 = vadd.f32 %v4394_v44, %v4393_v59  ;;  %v4396_v1 = vpop.f32.mrb[58].mxu0 }
 0x337   : > { %v4397_v46 = vpop.f32.mrb[59].mxu0  ;;  %v4257_v41 = vpop.f32.mrb[92].mxu1  ;;  %v6513_v27 = vadd.f32 %v4791_v17, %v4392_v33 }
 0x338   : > { %v4398_v30 = vadd.f32 %v4397_v46, %v4396_v1  ;;  %v4258_v55 = vpop.f32.mrb[93].mxu1 }
 0x339   : > { %v4259_v2 = vadd.f32 %v4258_v55, %v4257_v41  ;;  %v4260_v28 = vpop.f32.mrb[94].mxu1 }
 0x33a   : > { %v4261_v3 = vpop.f32.mrb[95].mxu1 }
 0x33b   : > { %v4800_v61 = vadd.f32 %v4259_v2, %v6412_v57  ;;  %v4262_v34 = vadd.f32 %v4261_v3, %v4260_v28 }
 0x33c   : > { %v4399_v25 = vpop.f32.mrb[60].mxu0 }
 0x33d   : > { %v4806_v58 = vadd.f32 %v4262_v34, %v6419_v26  ;;  %v4400_v52 = vpop.f32.mrb[61].mxu0  ;;  %v6517_v53 = vadd.f32 %v4800_v61, %v4395_v6 }
 0x33e   : > { %v4401_v43 = vadd.f32 %v4400_v52, %v4399_v25  ;;  %v4402_v47 = vpop.f32.mrb[62].mxu0 }
 0x33f   : > { %v4403_v50 = vpop.f32.mrb[63].mxu0  ;;  %v4263_v54 = vpop.f32.mrb[96].mxu1  ;;  %v6519_v49 = vadd.f32 %v4806_v58, %v4398_v30 }
 0x340   : > { %v4404_v7 = vadd.f32 %v4403_v50, %v4402_v47  ;;  %v4264_v12 = vpop.f32.mrb[97].mxu1 }
 0x341   : > { %v4265_v33 = vadd.f32 %v4264_v12, %v4263_v54  ;;  %v4266_v15 = vpop.f32.mrb[98].mxu1 }
 0x342   : > { %v4267_v40 = vpop.f32.mrb[99].mxu1 }
 0x343   : > { %v4797_v57 = vadd.f32 %v4265_v33, %v6427_v63  ;;  %v4268_v60 = vadd.f32 %v4267_v40, %v4266_v15 }
 0x344   : > { %v4405_v62 = vpop.f32.mrb[64].mxu0 }
 0x345   : > { %v4803_v26 = vadd.f32 %v4268_v60, %v6429_v42  ;;  %v4406_v16 = vpop.f32.mrb[65].mxu0  ;;  %v6523_v21 = vadd.f32 %v4797_v57, %v4401_v43 }
 0x346   : > { %v4407_v59 = vadd.f32 %v4406_v16, %v4405_v62  ;;  %v4408_v17 = vpop.f32.mrb[66].mxu0 }
 0x347   : > { %v4409_v44 = vpop.f32.mrb[67].mxu0  ;;  %v4269_v6 = vpop.f32.mrb[100].mxu1  ;;  %v6525_v1 = vadd.f32 %v4803_v26, %v4404_v7 }
 0x348   : > { %v4410_v46 = vadd.f32 %v4409_v44, %v4408_v17  ;;  %v4270_v41 = vpop.f32.mrb[101].mxu1 }
 0x349   : > { %v4271_v30 = vadd.f32 %v4270_v41, %v4269_v6  ;;  %v4272_v55 = vpop.f32.mrb[102].mxu1 }
 0x34a   : > { %v4273_v2 = vpop.f32.mrb[103].mxu1 }
 0x34b   : > { %v4812_v63 = vadd.f32 %v4271_v30, %v6435_v29  ;;  %v4274_v28 = vadd.f32 %v4273_v2, %v4272_v55 }
 0x34c   : > { %v4411_v3 = vpop.f32.mrb[68].mxu0 }
 0x34d   : > { %v4818_v42 = vadd.f32 %v4274_v28, %v6439_v51  ;;  %v4412_v61 = vpop.f32.mrb[69].mxu0  ;;  %v6529_v34 = vadd.f32 %v4812_v63, %v4407_v59 }
 0x34e   : > { %v4413_v25 = vadd.f32 %v4412_v61, %v4411_v3  ;;  %v4414_v58 = vpop.f32.mrb[70].mxu0 }
 0x34f   : > { %v4415_v52 = vpop.f32.mrb[71].mxu0  ;;  %v4275_v43 = vpop.f32.mrb[104].mxu1  ;;  %v6531_v47 = vadd.f32 %v4818_v42, %v4410_v46 }
 0x350   : > { %v4416_v50 = vadd.f32 %v4415_v52, %v4414_v58  ;;  %v4276_v54 = vpop.f32.mrb[105].mxu1 }
 0x351   : > { %v4277_v7 = vadd.f32 %v4276_v54, %v4275_v43  ;;  %v4278_v12 = vpop.f32.mrb[106].mxu1 }
 0x352   : > { %v4279_v33 = vpop.f32.mrb[107].mxu1 }
 0x353   : > { %v4809_v29 = vadd.f32 %v4277_v7, %v6442_v0  ;;  %v4280_v15 = vadd.f32 %v4279_v33, %v4278_v12 }
 0x354   : > { %v4417_v40 = vpop.f32.mrb[72].mxu0 }
 0x355   : > { %v4815_v51 = vadd.f32 %v4280_v15, %v6446_v11  ;;  %v4418_v57 = vpop.f32.mrb[73].mxu0  ;;  %v6535_v60 = vadd.f32 %v4809_v29, %v4413_v25 }
 0x356   : > { %v4419_v62 = vadd.f32 %v4418_v57, %v4417_v40  ;;  %v4420_v26 = vpop.f32.mrb[74].mxu0 }
 0x357   : > { %v4421_v16 = vpop.f32.mrb[75].mxu0  ;;  %v4281_v59 = vpop.f32.mrb[108].mxu1  ;;  %v6537_v17 = vadd.f32 %v4815_v51, %v4416_v50 }
 0x358   : > { %v4422_v44 = vadd.f32 %v4421_v16, %v4420_v26  ;;  %v4282_v6 = vpop.f32.mrb[109].mxu1 }
 0x359   : > { %v4283_v46 = vadd.f32 %v4282_v6, %v4281_v59  ;;  %v4284_v41 = vpop.f32.mrb[110].mxu1 }
 0x35a   : > { %v4285_v30 = vpop.f32.mrb[111].mxu1 }
 0x35b   : > { %v4824_v0 = vadd.f32 %v4283_v46, %v6448_v20  ;;  %v4286_v55 = vadd.f32 %v4285_v30, %v4284_v41 }
 0x35c   : > { %v4423_v2 = vpop.f32.mrb[76].mxu0 }
 0x35d   : > { %v4830_v11 = vadd.f32 %v4286_v55, %v6452_v32  ;;  %v4424_v63 = vpop.f32.mrb[77].mxu0  ;;  %v6541_v28 = vadd.f32 %v4824_v0, %v4419_v62 }
 0x35e   : > { %v4425_v3 = vadd.f32 %v4424_v63, %v4423_v2  ;;  %v4426_v42 = vpop.f32.mrb[78].mxu0 }
 0x35f   : > { %v4427_v61 = vpop.f32.mrb[79].mxu0  ;;  %v4287_v25 = vpop.f32.mrb[112].mxu1  ;;  %v6543_v58 = vadd.f32 %v4830_v11, %v4422_v44 }
 0x360   : > { %v4428_v52 = vadd.f32 %v4427_v61, %v4426_v42  ;;  %v4288_v43 = vpop.f32.mrb[113].mxu1 }
 0x361   : > { %v4289_v50 = vadd.f32 %v4288_v43, %v4287_v25  ;;  %v4290_v54 = vpop.f32.mrb[114].mxu1 }
 0x362   : > { %v4291_v7 = vpop.f32.mrb[115].mxu1 }
 0x363   : > { %v4821_v20 = vadd.f32 %v4289_v50, %v6454_v8  ;;  %v4292_v12 = vadd.f32 %v4291_v7, %v4290_v54 }
 0x364   : > { %v4429_v33 = vpop.f32.mrb[80].mxu0 }
 0x365   : > { %v4827_v32 = vadd.f32 %v4292_v12, %v6458_v23  ;;  %v4430_v29 = vpop.f32.mrb[81].mxu0  ;;  %v6547_v15 = vadd.f32 %v4821_v20, %v4425_v3 }
 0x366   : > { %v4431_v40 = vadd.f32 %v4430_v29, %v4429_v33  ;;  %v4432_v51 = vpop.f32.mrb[82].mxu0 }
 0x367   : > { %v4433_v57 = vpop.f32.mrb[83].mxu0  ;;  %v4293_v62 = vpop.f32.mrb[116].mxu1  ;;  %v6549_v26 = vadd.f32 %v4827_v32, %v4428_v52 }
 0x368   : > { %v4434_v16 = vadd.f32 %v4433_v57, %v4432_v51  ;;  %v4294_v59 = vpop.f32.mrb[117].mxu1 }
 0x369   : > { %v4295_v44 = vadd.f32 %v4294_v59, %v4293_v62  ;;  %v4296_v6 = vpop.f32.mrb[118].mxu1 }
 0x36a   : > { %v4297_v46 = vpop.f32.mrb[119].mxu1 }
 0x36b   : > { %v4836_v8 = vadd.f32 %v4295_v44, %v6460_v37  ;;  %v4298_v41 = vadd.f32 %v4297_v46, %v4296_v6 }
 0x36c   : > { %v4435_v30 = vpop.f32.mrb[84].mxu0 }
 0x36d   : > { %v4842_v23 = vadd.f32 %v4298_v41, %v6464_v14  ;;  %v4436_v0 = vpop.f32.mrb[85].mxu0  ;;  %v6553_v55 = vadd.f32 %v4836_v8, %v4431_v40 }
 0x36e   : > { %v4437_v2 = vadd.f32 %v4436_v0, %v4435_v30  ;;  %v4438_v11 = vpop.f32.mrb[86].mxu0 }
 0x36f   : > { %v4439_v63 = vpop.f32.mrb[87].mxu0  ;;  %v4299_v3 = vpop.f32.mrb[120].mxu1  ;;  %v6555_v42 = vadd.f32 %v4842_v23, %v4434_v16 }
 0x370   : > { %v4440_v61 = vadd.f32 %v4439_v63, %v4438_v11  ;;  %v4300_v25 = vpop.f32.mrb[121].mxu1 }
 0x371   : > { %v4301_v52 = vadd.f32 %v4300_v25, %v4299_v3  ;;  %v4302_v43 = vpop.f32.mrb[122].mxu1 }
 0x372   : > { %v4303_v50 = vpop.f32.mrb[123].mxu1 }
 0x373   : > { %v4833_v37 = vadd.f32 %v4301_v52, %v6466_v31  ;;  %v4304_v54 = vadd.f32 %v4303_v50, %v4302_v43 }
 0x374   : > { %v4441_v7 = vpop.f32.mrb[88].mxu0 }
 0x375   : > { %v4839_v14 = vadd.f32 %v4304_v54, %v6470_v39  ;;  %v4442_v20 = vpop.f32.mrb[89].mxu0  ;;  %v6559_v12 = vadd.f32 %v4833_v37, %v4437_v2 }
 0x376   : > { %v4443_v33 = vadd.f32 %v4442_v20, %v4441_v7  ;;  %v4444_v32 = vpop.f32.mrb[90].mxu0 }
 0x377   : > { %v4445_v29 = vpop.f32.mrb[91].mxu0  ;;  %v4305_v40 = vpop.f32.mrb[124].mxu1  ;;  %v6561_v51 = vadd.f32 %v4839_v14, %v4440_v61 }
 0x378   : > { %v4446_v57 = vadd.f32 %v4445_v29, %v4444_v32  ;;  %v4306_v62 = vpop.f32.mrb[125].mxu1 }
 0x379   : > { %v4307_v16 = vadd.f32 %v4306_v62, %v4305_v40  ;;  %v4308_v59 = vpop.f32.mrb[126].mxu1 }
 0x37a   : > { %v4309_v44 = vpop.f32.mrb[127].mxu1 }
 0x37b   : > { %v4848_v31 = vadd.f32 %v4307_v16, %v6472_v36  ;;  %v4310_v6 = vadd.f32 %v4309_v44, %v4308_v59 }
 0x37c   : > { %v4447_v46 = vpop.f32.mrb[92].mxu0 }
 0x37d   : > { %v4854_v39 = vadd.f32 %v4310_v6, %v6476_v4  ;;  %v4448_v8 = vpop.f32.mrb[93].mxu0  ;;  %v6565_v41 = vadd.f32 %v4848_v31, %v4443_v33 }
 0x37e   : > { %v4449_v30 = vadd.f32 %v4448_v8, %v4447_v46  ;;  %v4450_v23 = vpop.f32.mrb[94].mxu0 }
 0x37f   : > { %v4451_v0 = vpop.f32.mrb[95].mxu0  ;;  %v4311_v2 = vpop.f32.mrb[128].mxu1  ;;  %v6567_v11 = vadd.f32 %v4854_v39, %v4446_v57 }
 0x380   : > { %v4452_v63 = vadd.f32 %v4451_v0, %v4450_v23  ;;  %v4312_v3 = vpop.f32.mrb[129].mxu1 }
 0x381   : > { %v4313_v61 = vadd.f32 %v4312_v3, %v4311_v2  ;;  %v4314_v25 = vpop.f32.mrb[130].mxu1 }
 0x382   : > { %v4315_v52 = vpop.f32.mrb[131].mxu1 }
 0x383   : > { %v4845_v36 = vadd.f32 %v4313_v61, %v6478_v56  ;;  %v4316_v43 = vadd.f32 %v4315_v52, %v4314_v25 }
 0x384   : > { %v4453_v50 = vpop.f32.mrb[96].mxu0 }
 0x385   : > { %v4851_v4 = vadd.f32 %v4316_v43, %v6482_v48  ;;  %v4454_v37 = vpop.f32.mrb[97].mxu0  ;;  %v6571_v54 = vadd.f32 %v4845_v36, %v4449_v30 }
 0x386   : > { %v4455_v7 = vadd.f32 %v4454_v37, %v4453_v50  ;;  %v4456_v14 = vpop.f32.mrb[98].mxu0 }
 0x387   : > { %v4457_v20 = vpop.f32.mrb[99].mxu0  ;;  %v4317_v33 = vpop.f32.mrb[132].mxu1  ;;  %v6573_v32 = vadd.f32 %v4851_v4, %v4452_v63 }
 0x388   : > { %v4458_v29 = vadd.f32 %v4457_v20, %v4456_v14  ;;  %v4318_v40 = vpop.f32.mrb[133].mxu1 }
 0x389   : > { %v4319_v57 = vadd.f32 %v4318_v40, %v4317_v33  ;;  %v4320_v62 = vpop.f32.mrb[134].mxu1 }
 0x38a   : > { %v4321_v16 = vpop.f32.mrb[135].mxu1 }
 0x38b   : > { %v4860_v56 = vadd.f32 %v4319_v57, %v6487_v45  ;;  %v4322_v59 = vadd.f32 %v4321_v16, %v4320_v62 }
 0x38c   : > { %v4459_v44 = vpop.f32.mrb[100].mxu0 }
 0x38d   : > { %v4866_v48 = vadd.f32 %v4322_v59, %v6489_v13  ;;  %v4460_v31 = vpop.f32.mrb[101].mxu0  ;;  %v6577_v6 = vadd.f32 %v4860_v56, %v4455_v7 }
 0x38e   : > { %v4461_v46 = vadd.f32 %v4460_v31, %v4459_v44  ;;  %v4462_v39 = vpop.f32.mrb[102].mxu0 }
 0x38f   : > { %v4463_v8 = vpop.f32.mrb[103].mxu0  ;;  %v4323_v30 = vpop.f32.mrb[136].mxu1  ;;  %v6579_v23 = vadd.f32 %v4866_v48, %v4458_v29 }
 0x390   : > { %v4464_v0 = vadd.f32 %v4463_v8, %v4462_v39  ;;  %v4324_v2 = vpop.f32.mrb[137].mxu1 }
 0x391   : > { %v4325_v63 = vadd.f32 %v4324_v2, %v4323_v30  ;;  %v4326_v3 = vpop.f32.mrb[138].mxu1 }
 0x392   : > { %v4327_v61 = vpop.f32.mrb[139].mxu1 }
 0x393   : > { %v4857_v45 = vadd.f32 %v4325_v63, %v6491_v18  ;;  %v4328_v25 = vadd.f32 %v4327_v61, %v4326_v3 }
 0x394   : > { %v4465_v52 = vpop.f32.mrb[104].mxu0 }
 0x395   : > { %v4863_v13 = vadd.f32 %v4328_v25, %v6493_v22  ;;  %v4466_v36 = vpop.f32.mrb[105].mxu0  ;;  %v6583_v43 = vadd.f32 %v4857_v45, %v4461_v46 }
 0x396   : > { %v4467_v50 = vadd.f32 %v4466_v36, %v4465_v52  ;;  %v4468_v4 = vpop.f32.mrb[106].mxu0 }
 0x397   : > { %v4469_v37 = vpop.f32.mrb[107].mxu0  ;;  %v4329_v7 = vpop.f32.mrb[140].mxu1  ;;  %v6585_v14 = vadd.f32 %v4863_v13, %v4464_v0 }
 0x398   : > { %v4470_v20 = vadd.f32 %v4469_v37, %v4468_v4  ;;  %v4330_v33 = vpop.f32.mrb[141].mxu1 }
 0x399   : > { %v4331_v29 = vadd.f32 %v4330_v33, %v4329_v7  ;;  %v4332_v40 = vpop.f32.mrb[142].mxu1 }
 0x39a   : > { %v4333_v57 = vpop.f32.mrb[143].mxu1 }
 0x39b   : > { %v4872_v18 = vadd.f32 %v4331_v29, %v6495_v19  ;;  %v4334_v62 = vadd.f32 %v4333_v57, %v4332_v40 }
 0x39c   : > { %v4471_v16 = vpop.f32.mrb[108].mxu0 }
 0x39d   : > { %v4878_v22 = vadd.f32 %v4334_v62, %v6497_v5  ;;  %v4472_v56 = vpop.f32.mrb[109].mxu0  ;;  %v6589_v59 = vadd.f32 %v4872_v18, %v4467_v50  ;;  %v6597_v5 = vld [vmem:[%s6802_s5] ss:$0 sm:$0xff] }
 0x39e   : > { %v4473_v44 = vadd.f32 %v4472_v56, %v4471_v16  ;;  %v4474_v48 = vpop.f32.mrb[110].mxu0 }
 0x39f   : > { %v4475_v31 = vpop.f32.mrb[111].mxu0  ;;  %v4335_v46 = vpop.f32.mrb[144].mxu1  ;;  %v6591_v39 = vadd.f32 %v4878_v22, %v4470_v20 }
 0x3a0   : > { %v4476_v8 = vadd.f32 %v4475_v31, %v4474_v48  ;;  %v4336_v30 = vpop.f32.mrb[145].mxu1 }
 0x3a1   : > { %v4337_v0 = vadd.f32 %v4336_v30, %v4335_v46  ;;  %v4338_v2 = vpop.f32.mrb[146].mxu1 }
 0x3a2   : > { %v4339_v63 = vpop.f32.mrb[147].mxu1 }
 0x3a3   : > { %v4869_v19 = vadd.f32 %v4337_v0, %v6499_v10  ;;  %v4340_v3 = vadd.f32 %v4339_v63, %v4338_v2 }
 0x3a4   : > { %v4691_v61 = vpop.f32.mrb[16].mxu0 }
 0x3a5   : > { %v4875_v45 = vadd.f32 %v4340_v3, %v6501_v38  ;;  %v4787_v25 = vadd.f32 %v6511_v35, %v4691_v61  ;;  %v2879_v52 = vpop.f32.mrb[17].mxu0  ;;  %v6601_v13 = vadd.f32 %v4869_v19, %v4473_v44 }
 0x3a6   : > { %v4790_v36 = vadd.f32 %v6505_v24, %v2879_v52  ;;  %v4692_v50 = vpop.f32.mrb[18].mxu0 }
 0x3a7   : > { %v3047_v4 = vadd.f32 %v4787_v25, %v6597_v5  ;;  %v4793_v10 = vadd.f32 %v6513_v27, %v4692_v50  ;;  %v2882_v37 = vpop.f32.mrb[19].mxu0  ;;  %v6606_v7 = vadd.f32 %v4875_v45, %v4476_v8 }
 0x3a8   : > { %v3045_v20 = vadd.f32 %v4790_v36, %v6597_v5  ;;  %v4796_v33 = vadd.f32 %v6507_v9, %v2882_v37 }
 0x3a9   : > { %v3048_v38 = vadd.f32 %v4793_v10, %v6597_v5  ;;  %v3079_v29 = vmax.f32 %v3047_v4, 0.0 }
 0x3aa   : > { %v3046_v35 = vadd.f32 %v4796_v33, %v6597_v5  ;;  %v3077_v57 = vmax.f32 %v3045_v20, 0.0 }
 0x3ab   : > { %v3080_v40 = vmax.f32 %v3048_v38, 0.0 }
 0x3ac   : > { %v3078_v24 = vmax.f32 %v3046_v35, 0.0  ;;  %v4695_v18 = vpop.f32.mrb[20].mxu0 }
 0x3ad   : > { %v3110_v62 = vpack.c.bf16 %v3080_v40, %v3079_v29  ;;  %v4799_v16 = vadd.f32 %v6523_v21, %v4695_v18  ;;  %v2895_v27 = vpop.f32.mrb[21].mxu0 }
 0x3ae   : > { %v4802_v22 = vadd.f32 %v6517_v53, %v2895_v27  ;;  %v4696_v56 = vpop.f32.mrb[22].mxu0  ;;  %v3109_v44 = vpack.c.bf16 %v3078_v24, %v3077_v57 }
 0x3af   : > { %v3051_v48 = vadd.f32 %v4799_v16, %v6597_v5  ;;  %v4805_v9 = vadd.f32 %v6525_v1, %v4696_v56  ;;  %v2898_v31 = vpop.f32.mrb[23].mxu0 }
 0x3b0   : > { %v3049_v46 = vadd.f32 %v4802_v22, %v6597_v5  ;;  %v4808_v8 = vadd.f32 %v6519_v49, %v2898_v31  ;;  %4737 = vmatprep.mubr.bf16.mxu1 %v3109_v44 }
 0x3b1   : > { %v3052_v30 = vadd.f32 %v4805_v9, %v6597_v5  ;;  %4738 = vmatmul.mubr.bf16.vlgmr.msra.gmra.mrb[148].mxu1 %v3110_v62  ;;  %v3083_v0 = vmax.f32 %v3051_v48, 0.0 }
 0x3b2   : > { %v3050_v21 = vadd.f32 %v4808_v8, %v6597_v5  ;;  %v3081_v53 = vmax.f32 %v3049_v46, 0.0 }
 0x3b3   : > { %v3084_v2 = vmax.f32 %v3052_v30, 0.0 }
 0x3b4   : > { %v3082_v63 = vmax.f32 %v3050_v21, 0.0  ;;  %v4699_v19 = vpop.f32.mrb[24].mxu0 }
 0x3b5   : > { %v4811_v3 = vadd.f32 %v6535_v60, %v4699_v19  ;;  %v2911_v61 = vpop.f32.mrb[25].mxu0  ;;  %v3112_v1 = vpack.c.bf16 %v3084_v2, %v3083_v0 }
 0x3b6   : > { %v4814_v45 = vadd.f32 %v6529_v34, %v2911_v61  ;;  %v4700_v25 = vpop.f32.mrb[26].mxu0  ;;  %v3111_v52 = vpack.c.bf16 %v3082_v63, %v3081_v53 }
 0x3b7   : > { %v3055_v49 = vadd.f32 %v4811_v3, %v6597_v5  ;;  %v4817_v36 = vadd.f32 %v6537_v17, %v4700_v25  ;;  %v2914_v50 = vpop.f32.mrb[27].mxu0 }
 0x3b8   : > { %v3053_v4 = vadd.f32 %v4814_v45, %v6597_v5  ;;  %v4820_v10 = vadd.f32 %v6531_v47, %v2914_v50  ;;  %4741 = vmatprep.mubr.bf16.mxu1 %v3111_v52 }
 0x3b9   : > { %v3056_v37 = vadd.f32 %v4817_v36, %v6597_v5  ;;  %4742 = vmatmul.mubr.bf16.gmra.mrb[152].mxu1 %v3112_v1  ;;  %v3087_v20 = vmax.f32 %v3055_v49, 0.0 }
 0x3ba   : > { %v3054_v60 = vadd.f32 %v4820_v10, %v6597_v5  ;;  %v3085_v34 = vmax.f32 %v3053_v4, 0.0 }
 0x3bb   : > { %v3088_v33 = vmax.f32 %v3056_v37, 0.0 }
 0x3bc   : > { %v3086_v38 = vmax.f32 %v3054_v60, 0.0  ;;  %v4703_v35 = vpop.f32.mrb[28].mxu0 }
 0x3bd   : > { %v4823_v29 = vadd.f32 %v6547_v15, %v4703_v35  ;;  %v2927_v40 = vpop.f32.mrb[29].mxu0  ;;  %v3114_v17 = vpack.c.bf16 %v3088_v33, %v3087_v20 }
 0x3be   : > { %v4826_v57 = vadd.f32 %v6541_v28, %v2927_v40  ;;  %v4704_v24 = vpop.f32.mrb[30].mxu0  ;;  %v3113_v18 = vpack.c.bf16 %v3086_v38, %v3085_v34 }
 0x3bf   : > { %v3059_v47 = vadd.f32 %v4823_v29, %v6597_v5  ;;  %v4829_v62 = vadd.f32 %v6549_v26, %v4704_v24  ;;  %v2930_v16 = vpop.f32.mrb[31].mxu0 }
 0x3c0   : > { %v3057_v27 = vadd.f32 %v4826_v57, %v6597_v5  ;;  %v4832_v22 = vadd.f32 %v6543_v58, %v2930_v16  ;;  %4745 = vmatprep.mubr.bf16.mxu1 %v3113_v18 }
 0x3c1   : > { %v3060_v56 = vadd.f32 %v4829_v62, %v6597_v5  ;;  %4746 = vmatmul.mubr.bf16.gmra.mrb[156].mxu1 %v3114_v17  ;;  %v3091_v44 = vmax.f32 %v3059_v47, 0.0 }
 0x3c2   : > { %v3058_v15 = vadd.f32 %v4832_v22, %v6597_v5  ;;  %v3089_v28 = vmax.f32 %v3057_v27, 0.0 }
 0x3c3   : > { %v3092_v48 = vmax.f32 %v3060_v56, 0.0 }
 0x3c4   : > { %v3090_v9 = vmax.f32 %v3058_v15, 0.0  ;;  %v4707_v31 = vpop.f32.mrb[32].mxu0 }
 0x3c5   : > { %v4835_v46 = vadd.f32 %v6559_v12, %v4707_v31  ;;  %v2943_v8 = vpop.f32.mrb[33].mxu0  ;;  %v3116_v26 = vpack.c.bf16 %v3092_v48, %v3091_v44 }
 0x3c6   : > { %v4838_v30 = vadd.f32 %v6553_v55, %v2943_v8  ;;  %v4708_v21 = vpop.f32.mrb[34].mxu0  ;;  %v3115_v0 = vpack.c.bf16 %v3090_v9, %v3089_v28 }
 0x3c7   : > { %v3063_v58 = vadd.f32 %v4835_v46, %v6597_v5  ;;  %v4841_v2 = vadd.f32 %v6561_v51, %v4708_v21  ;;  %v2946_v53 = vpop.f32.mrb[35].mxu0 }
 0x3c8   : > { %v3061_v63 = vadd.f32 %v4838_v30, %v6597_v5  ;;  %v4844_v19 = vadd.f32 %v6555_v42, %v2946_v53  ;;  %4749 = vmatprep.mubr.bf16.mxu1 %v3115_v0 }
 0x3c9   : > { %v3064_v3 = vadd.f32 %v4841_v2, %v6597_v5  ;;  %4750 = vmatmul.mubr.bf16.gmra.mrb[160].mxu1 %v3116_v26  ;;  %v3095_v61 = vmax.f32 %v3063_v58, 0.0 }
 0x3ca   : > { %v3062_v12 = vadd.f32 %v4844_v19, %v6597_v5  ;;  %v3093_v55 = vmax.f32 %v3061_v63, 0.0 }
 0x3cb   : > { %v3096_v1 = vmax.f32 %v3064_v3, 0.0 }
 0x3cc   : > { %v3094_v45 = vmax.f32 %v3062_v12, 0.0  ;;  %v4711_v25 = vpop.f32.mrb[36].mxu0 }
 0x3cd   : > { %v4847_v52 = vadd.f32 %v6571_v54, %v4711_v25  ;;  %v2959_v49 = vpop.f32.mrb[37].mxu0  ;;  %v3118_v51 = vpack.c.bf16 %v3096_v1, %v3095_v61  ;;  %v5170_v61 = vld [vmem:[%s5749_s8] sm:$0xff]  }
 0x3ce   : > { %v4850_v36 = vadd.f32 %v6565_v41, %v2959_v49  ;;  %v4712_v50 = vpop.f32.mrb[38].mxu0  ;;  %v3117_v4 = vpack.c.bf16 %v3094_v45, %v3093_v55  ;;  %v3357_v1 = vunpack.c.l.bf16 %v5170_v61 }
 0x3cf   : > { %v3067_v42 = vadd.f32 %v4847_v52, %v6597_v5  ;;  %v4853_v10 = vadd.f32 %v6573_v32, %v4712_v50  ;;  %v2962_v37 = vpop.f32.mrb[39].mxu0  ;;  %v3358_v52 = vunpack.c.h.bf16 %v5170_v61 }
 0x3d0   : > { %v3065_v60 = vadd.f32 %v4850_v36, %v6597_v5  ;;  %v4856_v20 = vadd.f32 %v6567_v11, %v2962_v37  ;;  %4753 = vmatprep.mubr.bf16.mxu1 %v3117_v4 }
 0x3d1   : > { %v3068_v33 = vadd.f32 %v4853_v10, %v6597_v5  ;;  %4754 = vmatmul.mubr.bf16.gmra.mrb[164].mxu1 %v3118_v51  ;;  %v3099_v34 = vmax.f32 %v3067_v42, 0.0 }
 0x3d2   : > { %v3066_v54 = vadd.f32 %v4856_v20, %v6597_v5  ;;  %v3097_v41 = vmax.f32 %v3065_v60, 0.0 }
 0x3d3   : > { %v3100_v38 = vmax.f32 %v3068_v33, 0.0 }
 0x3d4   : > { %v3098_v35 = vmax.f32 %v3066_v54, 0.0  ;;  %v4715_v29 = vpop.f32.mrb[40].mxu0  ;;  %v5171_v54 = vld [vmem:[%s5749_s8 + $0x18] sm:$0xff]  }
 0x3d5   : > { %v4859_v40 = vadd.f32 %v6583_v43, %v4715_v29  ;;  %v2975_v17 = vpop.f32.mrb[41].mxu0  ;;  %v3120_v32 = vpack.c.bf16 %v3100_v38, %v3099_v34  ;;  %v3363_v34 = vunpack.c.l.bf16 %v5171_v54  ;;  %v5172_v29 = vld [vmem:[%s5749_s8 + $0x10] sm:$0xff]  }
 0x3d6   : > { %v4862_v57 = vadd.f32 %v6577_v6, %v2975_v17  ;;  %v4716_v24 = vpop.f32.mrb[42].mxu0  ;;  %v3119_v18 = vpack.c.bf16 %v3098_v35, %v3097_v41 }
 0x3d7   : > { %v3071_v11 = vadd.f32 %v4859_v40, %v6597_v5  ;;  %v4865_v47 = vadd.f32 %v6585_v14, %v4716_v24  ;;  %v2978_v62 = vpop.f32.mrb[43].mxu0  ;;  %v3361_v40 = vunpack.c.l.bf16 %v5172_v29  ;;  %v3364_v24 = vunpack.c.h.bf16 %v5171_v54 }
 0x3d8   : > { %v3069_v16 = vadd.f32 %v4862_v57, %v6597_v5  ;;  %v4868_v27 = vadd.f32 %v6579_v23, %v2978_v62  ;;  %4757 = vmatprep.mubr.bf16.mxu1 %v3119_v18  ;;  %v3362_v62 = vunpack.c.h.bf16 %v5172_v29 }
 0x3d9   : > { %v3072_v22 = vadd.f32 %v4865_v47, %v6597_v5  ;;  %4758 = vmatmul.mubr.bf16.gmra.mrb[168].mxu1 %v3120_v32  ;;  %v3103_v56 = vmax.f32 %v3071_v11, 0.0 }
 0x3da   : > { %v3070_v43 = vadd.f32 %v4868_v27, %v6597_v5  ;;  %v3101_v6 = vmax.f32 %v3069_v16, 0.0 }
 0x3db   : > { %v3104_v15 = vmax.f32 %v3072_v22, 0.0 }
 0x3dc   : > { %v3102_v44 = vmax.f32 %v3070_v43, 0.0  ;;  %v4719_v48 = vpop.f32.mrb[44].mxu0 }
 0x3dd   : > { %v4871_v28 = vadd.f32 %v6601_v13, %v4719_v48  ;;  %v2991_v9 = vpop.f32.mrb[45].mxu0  ;;  %v3122_v14 = vpack.c.bf16 %v3104_v15, %v3103_v56 }
 0x3de   : > { %v4874_v31 = vadd.f32 %v6589_v59, %v2991_v9  ;;  %v4720_v46 = vpop.f32.mrb[46].mxu0  ;;  %v3121_v8 = vpack.c.bf16 %v3102_v44, %v3101_v6 }
 0x3df   : > { %v3075_v23 = vadd.f32 %v4871_v28, %v6597_v5  ;;  %v4877_v26 = vadd.f32 %v6606_v7, %v4720_v46  ;;  %v2994_v30 = vpop.f32.mrb[47].mxu0  ;;  %v6671_v7 = vld [vmem:[%s6804_s7] ss:$0 sm:$0xff]  ;;  %v5173_v28 = vld [vmem:[%s5749_s8 + $0x28] sm:$0xff]  }
 0x3e0   : > { %v3073_v21 = vadd.f32 %v4874_v31, %v6597_v5  ;;  %v4880_v0 = vadd.f32 %v6591_v39, %v2994_v30  ;;  %4761 = vmatprep.mubr.bf16.mxu1 %v3121_v8  ;;  %v5169_v39 = vld [vmem:[%s5749_s8 + $0x8] sm:$0xff]   ;;  %v3367_v9 = vunpack.c.l.bf16 %v5173_v28  ;;  %v5174_v8 = vld [vmem:[%s5749_s8 + $0x20] sm:$0xff]  }
 0x3e1   : > { %v3076_v13 = vadd.f32 %v4877_v26, %v6597_v5  ;;  %4762 = vmatmul.mubr.bf16.gmra.mrb[172].mxu1 %v3122_v14  ;;  %v3107_v59 = vmax.f32 %v3075_v23, 0.0  ;;  %v3359_v12 = vunpack.c.l.bf16 %v5169_v39  ;;  %v3360_v25 = vunpack.c.h.bf16 %v5169_v39 }
 0x3e2   : > { %v3074_v58 = vadd.f32 %v4880_v0, %v6597_v5  ;;  %v3105_v53 = vmax.f32 %v3073_v21, 0.0  ;;  %v3365_v23 = vunpack.c.l.bf16 %v5174_v8  ;;  %v3368_v0 = vunpack.c.h.bf16 %v5173_v28 }
 0x3e3   : > { %v3108_v2 = vmax.f32 %v3076_v13, 0.0 }
 0x3e4   : > { %v3106_v63 = vmax.f32 %v3074_v58, 0.0 }
 0x3e5   : > { %v3124_v19 = vpack.c.bf16 %v3108_v2, %v3107_v59  ;;  %v3366_v2 = vunpack.c.h.bf16 %v5174_v8 }
 0x3e6   : > { %v3123_v3 = vpack.c.bf16 %v3106_v63, %v3105_v53 }
 0x3e8   : > { %4765 = vmatprep.mubr.bf16.mxu1 %v3123_v3 }
 0x3e9   : > { %4766 = vmatmul.mubr.bf16.gmra.mrb[176].mxu1 %v3124_v19 }
 0x484   : > { %v4739_v55 = vpop.f32.mrb[148].mxu1 }
 0x485   : > { %v3239_v5 = vadd.f32 %v4739_v55, %v6671_v7  ;;  %v3230_v45 = vpop.f32.mrb[149].mxu1 }
 0x486   : > { %v3231_v49 = vadd.f32 %v6671_v7, %v3230_v45  ;;  %v4740_v51 = vpop.f32.mrb[150].mxu1 }
 0x487   : > { %v3391_v36 = vadd.f32 %v3359_v12, %v3239_v5  ;;  %v3242_v50 = vadd.f32 %v4740_v51, %v6671_v7  ;;  %v3233_v4 = vpop.f32.mrb[151].mxu1  ;;  %v5175_v5 = vld [vmem:[%s5749_s8 + $0x38] sm:$0xff]   ;;  %v5176_v51 = vld [vmem:[%s5749_s8 + $0x30] sm:$0xff]  }
 0x488   : > { %v3389_v42 = vadd.f32 %v3357_v1, %v3231_v49  ;;  %v3234_v10 = vadd.f32 %v6671_v7, %v3233_v4  ;;  %v3371_v45 = vunpack.c.l.bf16 %v5175_v5 }
 0x489   : > { %v3392_v37 = vadd.f32 %v3360_v25, %v3242_v50  ;;  %v3423_v20 = vmax.f32 %v3391_v36, 0.0  ;;  %v3369_v36 = vunpack.c.l.bf16 %v5176_v51 }
 0x48a   : > { %v3390_v60 = vadd.f32 %v3358_v52, %v3234_v10  ;;  %v3421_v38 = vmax.f32 %v3389_v42, 0.0  ;;  %v3372_v10 = vunpack.c.h.bf16 %v5175_v5 }
 0x48b   : > { %v3424_v33 = vmax.f32 %v3392_v37, 0.0 }
 0x48c   : > { %v3422_v41 = vmax.f32 %v3390_v60, 0.0  ;;  %v4743_v35 = vpop.f32.mrb[152].mxu1 }
 0x48d   : > { %v3980_v17 = vpack.c.bf16 %v3424_v33, %v3423_v20  ;;  %v3255_v32 = vadd.f32 %v4743_v35, %v6671_v7  ;;  %v3246_v57 = vpop.f32.mrb[153].mxu1  ;;  %v3370_v33 = vunpack.c.h.bf16 %v5176_v51 }
 0x48e   : > { %v3975_v18 = vpack.c.bf16 %v3422_v41, %v3421_v38  ;;  %v3247_v11 = vadd.f32 %v6671_v7, %v3246_v57  ;;  %v4744_v47 = vpop.f32.mrb[154].mxu1  ;;  %v5177_v57 = vld [vmem:[%s5749_s8 + $0x48] sm:$0xff]  }
 0x48f   : > { %4052 = vst [vmem:[%s6685_s19 + $0x8] sm:$0xff] %v3980_v17   ;;  %v3395_v16 = vadd.f32 %v3363_v34, %v3255_v32  ;;  %v3258_v27 = vadd.f32 %v4744_v47, %v6671_v7  ;;  %v3249_v22 = vpop.f32.mrb[155].mxu1 }
 0x490   : > { %3976 = vst [vmem:[%s6685_s19] sm:$0xff] %v3975_v18   ;;  %v3393_v43 = vadd.f32 %v3361_v40, %v3247_v11  ;;  %v3250_v56 = vadd.f32 %v6671_v7, %v3249_v22  ;;  %v5178_v18 = vld [vmem:[%s5749_s8 + $0x40] sm:$0xff]  }
 0x491   : > { %v3396_v15 = vadd.f32 %v3364_v24, %v3258_v27  ;;  %v3427_v44 = vmax.f32 %v3395_v16, 0.0  ;;  %v3375_v24 = vunpack.c.l.bf16 %v5177_v57  ;;  %v3373_v11 = vunpack.c.l.bf16 %v5178_v18 }
 0x492   : > { %v3394_v6 = vadd.f32 %v3362_v62, %v3250_v56  ;;  %v3425_v14 = vmax.f32 %v3393_v43, 0.0  ;;  %v3376_v56 = vunpack.c.h.bf16 %v5177_v57 }
 0x493   : > { %v3428_v48 = vmax.f32 %v3396_v15, 0.0  ;;  %v3374_v15 = vunpack.c.h.bf16 %v5178_v18 }
 0x494   : > { %v3426_v31 = vmax.f32 %v3394_v6, 0.0  ;;  %v4747_v46 = vpop.f32.mrb[156].mxu1 }
 0x495   : > { %v3990_v26 = vpack.c.bf16 %v3428_v48, %v3427_v44  ;;  %v3271_v30 = vadd.f32 %v4747_v46, %v6671_v7  ;;  %v3262_v21 = vpop.f32.mrb[157].mxu1 }
 0x496   : > { %v3985_v13 = vpack.c.bf16 %v3426_v31, %v3425_v14  ;;  %v3263_v58 = vadd.f32 %v6671_v7, %v3262_v21  ;;  %v4748_v59 = vpop.f32.mrb[158].mxu1  ;;  %v5179_v21 = vld [vmem:[%s5749_s8 + $0x58] sm:$0xff]  }
 0x497   : > { %4054 = vst [vmem:[%s6685_s19 + $0x18] sm:$0xff] %v3990_v26   ;;  %v3399_v53 = vadd.f32 %v3367_v9, %v3271_v30  ;;  %v3274_v63 = vadd.f32 %v4748_v59, %v6671_v7  ;;  %v3265_v19 = vpop.f32.mrb[159].mxu1 }
 0x498   : > { %4053 = vst [vmem:[%s6685_s19 + $0x10] sm:$0xff] %v3985_v13   ;;  %v3397_v3 = vadd.f32 %v3365_v23, %v3263_v58  ;;  %v3266_v39 = vadd.f32 %v6671_v7, %v3265_v19 }
 0x499   : > { %v3400_v12 = vadd.f32 %v3368_v0, %v3274_v63  ;;  %v3431_v1 = vmax.f32 %v3399_v53, 0.0  ;;  %v3379_v0 = vunpack.c.l.bf16 %v5179_v21 }
 0x49a   : > { %v3398_v61 = vadd.f32 %v3366_v2, %v3266_v39  ;;  %v3429_v25 = vmax.f32 %v3397_v3, 0.0  ;;  %v5180_v2 = vld [vmem:[%s5749_s8 + $0x50] sm:$0xff]   ;;  %v3380_v39 = vunpack.c.h.bf16 %v5179_v21 }
 0x49b   : > { %v3432_v55 = vmax.f32 %v3400_v12, 0.0  ;;  %v3377_v53 = vunpack.c.l.bf16 %v5180_v2 }
 0x49c   : > { %v3430_v52 = vmax.f32 %v3398_v61, 0.0  ;;  %v4751_v49 = vpop.f32.mrb[160].mxu1 }
 0x49d   : > { %v4000_v50 = vpack.c.bf16 %v3432_v55, %v3431_v1  ;;  %v3287_v4 = vadd.f32 %v4751_v49, %v6671_v7  ;;  %v3278_v42 = vpop.f32.mrb[161].mxu1  ;;  %v3378_v55 = vunpack.c.h.bf16 %v5180_v2 }
 0x49e   : > { %v3995_v37 = vpack.c.bf16 %v3430_v52, %v3429_v25  ;;  %v3279_v60 = vadd.f32 %v6671_v7, %v3278_v42  ;;  %v4752_v20 = vpop.f32.mrb[162].mxu1  ;;  %v5181_v42 = vld [vmem:[%s5749_s8 + $0x68] sm:$0xff]  }
 0x49f   : > { %4056 = vst [vmem:[%s6685_s19 + $0x28] sm:$0xff] %v4000_v50   ;;  %v3403_v54 = vadd.f32 %v3371_v45, %v3287_v4  ;;  %v3290_v34 = vadd.f32 %v4752_v20, %v6671_v7  ;;  %v3281_v38 = vpop.f32.mrb[163].mxu1 }
 0x4a0   : > { %4055 = vst [vmem:[%s6685_s19 + $0x20] sm:$0xff] %v3995_v37   ;;  %v3401_v41 = vadd.f32 %v3369_v36, %v3279_v60  ;;  %v3282_v35 = vadd.f32 %v6671_v7, %v3281_v38 }
 0x4a1   : > { %v3404_v29 = vadd.f32 %v3372_v10, %v3290_v34  ;;  %v3435_v17 = vmax.f32 %v3403_v54, 0.0  ;;  %v3383_v10 = vunpack.c.l.bf16 %v5181_v42 }
 0x4a2   : > { %v3402_v40 = vadd.f32 %v3370_v33, %v3282_v35  ;;  %v3433_v47 = vmax.f32 %v3401_v41, 0.0  ;;  %v5182_v33 = vld [vmem:[%s5749_s8 + $0x60] sm:$0xff]   ;;  %v3384_v35 = vunpack.c.h.bf16 %v5181_v42 }
 0x4a3   : > { %v3436_v32 = vmax.f32 %v3404_v29, 0.0  ;;  %v3381_v54 = vunpack.c.l.bf16 %v5182_v33 }
 0x4a4   : > { %v3434_v62 = vmax.f32 %v3402_v40, 0.0  ;;  %v4755_v16 = vpop.f32.mrb[164].mxu1 }
 0x4a5   : > { %v4010_v27 = vpack.c.bf16 %v3436_v32, %v3435_v17  ;;  %v3303_v22 = vadd.f32 %v4755_v16, %v6671_v7  ;;  %v3294_v43 = vpop.f32.mrb[165].mxu1  ;;  %v3382_v32 = vunpack.c.h.bf16 %v5182_v33 }
 0x4a6   : > { %v4005_v6 = vpack.c.bf16 %v3434_v62, %v3433_v47  ;;  %v3295_v44 = vadd.f32 %v6671_v7, %v3294_v43  ;;  %v4756_v48 = vpop.f32.mrb[166].mxu1  ;;  %v5183_v43 = vld [vmem:[%s5749_s8 + $0x78] sm:$0xff]  }
 0x4a7   : > { %4058 = vst [vmem:[%s6685_s19 + $0x38] sm:$0xff] %v4010_v27   ;;  %v3407_v28 = vadd.f32 %v3375_v24, %v3303_v22  ;;  %v3306_v9 = vadd.f32 %v4756_v48, %v6671_v7  ;;  %v3297_v14 = vpop.f32.mrb[167].mxu1  ;;  %v5184_v48 = vld [vmem:[%s5749_s8 + $0x70] sm:$0xff]   ;;  %s3614_s8 = scalar_lea.sflag [#allocation4], %s5743_s6 }
 0x4a8   : > { %4057 = vst [vmem:[%s6685_s19 + $0x30] sm:$0xff] %v4005_v6   ;;  %v3405_v31 = vadd.f32 %v3373_v11, %v3295_v44  ;;  %v3298_v46 = vadd.f32 %v6671_v7, %v3297_v14 }
 0x4a9   : > { %v3408_v8 = vadd.f32 %v3376_v56, %v3306_v9  ;;  %v3439_v26 = vmax.f32 %v3407_v28, 0.0  ;;  %v3387_v56 = vunpack.c.l.bf16 %v5183_v43  ;;  %v3385_v28 = vunpack.c.l.bf16 %v5184_v48 }
 0x4aa   : > { %v3406_v23 = vadd.f32 %v3374_v15, %v3298_v46  ;;  %v3437_v13 = vmax.f32 %v3405_v31, 0.0  ;;  %v3388_v46 = vunpack.c.h.bf16 %v5183_v43 }
 0x4ab   : > { %v3440_v30 = vmax.f32 %v3408_v8, 0.0 }
 0x4ac   : > { %v3438_v58 = vmax.f32 %v3406_v23, 0.0  ;;  %v4759_v59 = vpop.f32.mrb[168].mxu1 }
 0x4ad   : > { %v4020_v63 = vpack.c.bf16 %v3440_v30, %v3439_v26  ;;  %v3319_v19 = vadd.f32 %v4759_v59, %v6671_v7  ;;  %v3310_v3 = vpop.f32.mrb[169].mxu1  ;;  %v3386_v30 = vunpack.c.h.bf16 %v5184_v48 }
 0x4ae   : > { %v4015_v12 = vpack.c.bf16 %v3438_v58, %v3437_v13  ;;  %v3311_v61 = vadd.f32 %v6671_v7, %v3310_v3  ;;  %v4760_v1 = vpop.f32.mrb[170].mxu1 }
 0x4af   : > { %4060 = vst [vmem:[%s6685_s19 + $0x48] sm:$0xff] %v4020_v63   ;;  %v3411_v5 = vadd.f32 %v3379_v0, %v3319_v19  ;;  %v3322_v45 = vadd.f32 %v4760_v1, %v6671_v7  ;;  %v3313_v25 = vpop.f32.mrb[171].mxu1 }
 0x4b0   : > { %4059 = vst [vmem:[%s6685_s19 + $0x40] sm:$0xff] %v4015_v12   ;;  %v3409_v52 = vadd.f32 %v3377_v53, %v3311_v61  ;;  %v3314_v49 = vadd.f32 %v6671_v7, %v3313_v25 }
 0x4b1   : > { %v3412_v51 = vadd.f32 %v3380_v39, %v3322_v45  ;;  %v3443_v50 = vmax.f32 %v3411_v5, 0.0 }
 0x4b2   : > { %v3410_v36 = vadd.f32 %v3378_v55, %v3314_v49  ;;  %v3441_v37 = vmax.f32 %v3409_v52, 0.0 }
 0x4b3   : > { %v3444_v4 = vmax.f32 %v3412_v51, 0.0 }
 0x4b4   : > { %v3442_v60 = vmax.f32 %v3410_v36, 0.0  ;;  %v4763_v20 = vpop.f32.mrb[172].mxu1 }
 0x4b5   : > { %v4030_v34 = vpack.c.bf16 %v3444_v4, %v3443_v50  ;;  %v3335_v38 = vadd.f32 %v4763_v20, %v6671_v7  ;;  %v3326_v41 = vpop.f32.mrb[173].mxu1 }
 0x4b6   : > { %v4025_v29 = vpack.c.bf16 %v3442_v60, %v3441_v37  ;;  %v3327_v40 = vadd.f32 %v6671_v7, %v3326_v41  ;;  %v4764_v17 = vpop.f32.mrb[174].mxu1 }
 0x4b7   : > { %4062 = vst [vmem:[%s6685_s19 + $0x58] sm:$0xff] %v4030_v34   ;;  %v3415_v57 = vadd.f32 %v3383_v10, %v3335_v38  ;;  %v3338_v24 = vadd.f32 %v4764_v17, %v6671_v7  ;;  %v3329_v18 = vpop.f32.mrb[175].mxu1 }
 0x4b8   : > { %4061 = vst [vmem:[%s6685_s19 + $0x50] sm:$0xff] %v4025_v29   ;;  %v3413_v11 = vadd.f32 %v3381_v54, %v3327_v40  ;;  %v3330_v47 = vadd.f32 %v6671_v7, %v3329_v18 }
 0x4b9   : > { %v3416_v62 = vadd.f32 %v3384_v35, %v3338_v24  ;;  %v3447_v27 = vmax.f32 %v3415_v57, 0.0 }
 0x4ba   : > { %v3414_v16 = vadd.f32 %v3382_v32, %v3330_v47  ;;  %v3445_v15 = vmax.f32 %v3413_v11, 0.0 }
 0x4bb   : > { %v3448_v22 = vmax.f32 %v3416_v62, 0.0 }
 0x4bc   : > { %v3446_v6 = vmax.f32 %v3414_v16, 0.0  ;;  %v4767_v44 = vpop.f32.mrb[176].mxu1 }
 0x4bd   : > { %v4040_v9 = vpack.c.bf16 %v3448_v22, %v3447_v27  ;;  %v3351_v14 = vadd.f32 %v4767_v44, %v6671_v7  ;;  %v3342_v31 = vpop.f32.mrb[177].mxu1 }
 0x4be   : > { %v4035_v8 = vpack.c.bf16 %v3446_v6, %v3445_v15  ;;  %v3343_v23 = vadd.f32 %v6671_v7, %v3342_v31  ;;  %v4768_v26 = vpop.f32.mrb[178].mxu1 }
 0x4bf   : > { %4064 = vst [vmem:[%s6685_s19 + $0x68] sm:$0xff] %v4040_v9   ;;  %v3419_v21 = vadd.f32 %v3387_v56, %v3351_v14  ;;  %v3354_v0 = vadd.f32 %v4768_v26, %v6671_v7  ;;  %v3345_v13 = vpop.f32.mrb[179].mxu1 }
 0x4c0   : > { %4063 = vst [vmem:[%s6685_s19 + $0x60] sm:$0xff] %v4035_v8   ;;  %v3417_v58 = vadd.f32 %v3385_v28, %v3343_v23  ;;  %v3346_v59 = vadd.f32 %v6671_v7, %v3345_v13 }
 0x4c1   : > { %v3420_v2 = vadd.f32 %v3388_v46, %v3354_v0  ;;  %v3451_v63 = vmax.f32 %v3419_v21, 0.0 }
 0x4c2   : > { %v3418_v53 = vadd.f32 %v3386_v30, %v3346_v59  ;;  %v3449_v3 = vmax.f32 %v3417_v58, 0.0 }
 0x4c3   : > { %v3452_v19 = vmax.f32 %v3420_v2, 0.0 }
 0x4c4   : > { %v3450_v39 = vmax.f32 %v3418_v53, 0.0 }
 0x4c5   : > { %v4050_v12 = vpack.c.bf16 %v3452_v19, %v3451_v63 }
 0x4c6   : > { %v4045_v7 = vpack.c.bf16 %v3450_v39, %v3449_v3 }
 0x4c7   : > { %4066 = vst [vmem:[%s6685_s19 + $0x78] sm:$0xff] %v4050_v12  }
 0x4c8   : > { %4065 = vst [vmem:[%s6685_s19 + $0x70] sm:$0xff] %v4045_v7  }
 0x4c9   : > { %5342 = shalt.err (!%p5339_p11)
}
 0x4ca   : > { %s5343_s11 = scalar_lea.hbm %s6744_s23, 2048  ;;  %s5347_s21 = scalar_lea.hbm %s6854_s24, 4096 }
 0x4cb   : > { %p5344_p12 = scmp.ne.s32.totalorder %s6744_s23, %s5343_s11  ;;  %p5348_p9 = scmp.lt.u32.totalorder %s6744_s23, %s6854_s24 }
 0x4cc   : > { %p5349_p0 = scmp.lt.u32.totalorder %s5347_s21, %s5343_s11  ;;  %p5351_p4 = scmp.lt.u32.totalorder %s5343_s11, %s6744_s23 }
 0x4cd   : > { %p5345_p6 = pnand %p5344_p12, %p5636_p10 }
 0x4ce   : > { %p5350_p2 = por %p5349_p0, %p5348_p9 }
 0x4cf   : > { %p5346_p7 = pneg %p5345_p6 }
 0x4d0   : > { %p5352_p8 = por %p5351_p4, %p5350_p2 }
 0x4d2   : > { %p5353_p1 = pnand %p5352_p8, %p5346_p7 }
 0x4d4   : > { %5356 = shalt.err (!%p5353_p1)
}
 0x4d5   : > { %s5433_s19 = smov 64   ;;  %s5434_s17 = smov 4  }
 0x4d6   : > { %4961 = dma.vmem_to_hbm [thread:$0]  (%p5636_p10), %s6746_s22, 2048, %s6744_s23, %s3614_s8, %s5433_s19, %s5433_s19, %s5434_s17  }
 0x4d7 PF: > { %s6855_s2 = sld [smem:[#allocation17_spill]]  ;;  %s6856_s14 = sld [smem:[#allocation19_spill]] }
 0x4d8   : > { %p6858_p3 = scmp.ge.s32.totalorder %s5423_s10, 2 }
 0x4dd   : > { %s3645_s16 = sand.u32 1, %s6855_s2   ;;  %p6857_p13 = scmp.ne.s32.totalorder %s6856_s14, 0 }
 0x4de   : > { %s3646_s0 = scalar_lea.sflag [#allocation4], %s3645_s16 }
 0x4df   : > { %p4981_p5 = pnand %p6858_p3, %p6857_p13 }
 0x4e1   : > { %5398 = dma.done.wait (!%p4981_p5), %s3646_s0, 2048  }
 0x4e2   : > { %5400 = vsyncadd (!%p4981_p5), %s3646_s0, 4294965248  ;;  %s28_s10 = sadd.s32 1, %s5423_s10   ;;  %s6859_s27 = smov %s5407_s28 }
 0x4e3   : > { %p25_p11 = scmp.ge.s32.totalorder %s28_s10, 4   ;;  %s6860_s28 = smov %s5411_s29 }
 0x4e4   : > { %s6861_s29 = smov %s5651_s12  ;;  %s6862_s30 = smov %s5419_s9 }
 0x4e5   : > { %s6863_s9 = smov %s6865_s18  ;;  %27 = sbr.rel (!%p25_p11) target bundleno = 15 (0xf), region = 124 }
 0x4ec   :  { %3651 = vsyncpa [#allocation3], 1 }
 0x4ed   :  { %3653 = vsyncpa [#allocation3 + $0x1], 1 }
 0x4ee   :  { %3654 = vsyncpa [#allocation6], 1 }
 0x4ef   :  { %3656 = vsyncpa [#allocation6 + $0x1], 1 }
 0x4f0   :  { %3657 = vsyncpa [#allocation9], 1 }
 0x4f1   :  { %3658 = vsyncpa [#allocation4], 1 }
 0x4f2   :  { %3660 = vsyncpa [#allocation4 + $0x1], 1 }

// kernel: tpu_custom_call.1
= control target key start
LH: loop header
LB: loop body
LE: loop exit
PB: predicated region body
PF: predicated region fallthrough
CT: control target
= control target key end

     0   :  { %s6797_s0 = inlined_call_operand.hbm [shape: bf16[2,16,16,128], index: 0, kind: input, shape index: {}]   ;;  %s6798_s1 = inlined_call_operand.hbm [shape: bf16[2,2,16,128], index: 1, kind: input, shape index: {}]   ;;  %s6799_s2 = inlined_call_operand.hbm [shape: bf16[128,128], index: 2, kind: input, shape index: {}]   ;;  %s6800_s3 = inlined_call_operand.vmem [shape: f32[1,128], index: 3, kind: input, shape index: {}]   ;;  %s6801_s4 = inlined_call_operand.hbm [shape: bf16[3,384,128], index: 4, kind: input, shape index: {}]   ;;  %s6802_s5 = inlined_call_operand.vmem [shape: f32[1,128], index: 5, kind: input, shape index: {}]   ;;  %s6803_s6 = inlined_call_operand.hbm [shape: bf16[128,128], index: 6, kind: input, shape index: {}]   ;;  %s6804_s7 = inlined_call_operand.vmem [shape: f32[1,128], index: 7, kind: input, shape index: {}]   ;;  %s6805_s8 = inlined_call_operand.hbm [shape: bf16[2,16,16,128], index: 8, kind: output, shape index: {}]  }
   0x1   :  { %6818 = sst [smem:[#allocation22_spill]] %s6797_s0 }
   0x2   :  { %6819 = sst [smem:[#allocation23_spill]] %s6799_s2 }
   0x3   :  { %6820 = sst [smem:[#allocation24_spill]] %s6801_s4 }
   0x4   :  { %6821 = sst [smem:[#allocation25_spill]] %s6803_s6 }
   0x5   :  { %6822 = sst [smem:[#allocation26_spill]] %s6805_s8 }
   0x6   :  { %13 = vsyncpa [#allocation3], 0 }
   0x7   :  { %15 = vsyncpa [#allocation3 + $0x1], 0 }
   0x8   :  { %16 = vsyncpa [#allocation6], 0 }
   0x9   :  { %18 = vsyncpa [#allocation6 + $0x1], 0 }
   0xa   :  { %19 = vsyncpa [#allocation9], 0 }
   0xb   :  { %20 = vsyncpa [#allocation4], 0 }
   0xc   :  { %22 = vsyncpa [#allocation4 + $0x1], 0  ;;  %s5480_s27 = smov 0   ;;  %s5482_s28 = smov 0  }
   0xd   :  { %s5484_s29 = smov 0   ;;  %s5486_s30 = smov 0  }
   0xe   :  { %s5488_s9 = smov 0   ;;  %s5490_s10 = smov 0  }
   0xf LB: > { %6823 = sst [smem:[#allocation17_spill]] %s5403_s27  ;;  %s5511_s11 = sadd.s32 4294967295, %s5423_s10   ;;  %s5423_s10 = sphi %s5490_s10, %s28_s10   ;;  %s5419_s9 = sphi %s5488_s9, %s6863_s9   ;;  %s5415_s30 = sphi %s5486_s30, %s6862_s30   ;;  %s5411_s29 = sphi %s5484_s29, %s6861_s29   ;;  %s5407_s28 = sphi %s5482_s28, %s6860_s28   ;;  %s5403_s27 = sphi %s5480_s27, %s6859_s27  }
  0x10   : > { %6824 = sst [smem:[#allocation18_spill]] %s5415_s30  ;;  %s3772_s12 = sadd.s32 4294967294, %s5423_s10  }
  0x11   : > { %p62_p0 = scmp.ne.s32.totalorder %s5407_s28, %s5403_s27  ;;  %p6806_p1 = scmp.eq.s32.totalorder %s5511_s11, 0 }
  0x12   : > { %p248_p3 = scmp.eq.s32.totalorder %s3772_s12, 1  ;;  %p3773_p5 = scmp.ge.s32.totalorder %s5423_s10, 1 }
  0x13   : > { %p5520_p4 = por %p6806_p1, %p62_p0  ;;  %p255_p7 = scmp.lt.s32.totalorder %s5423_s10, 3 }
  0x14   : > { %p5525_p6 = por %p248_p3, %p62_p0  ;;  %s5425_s16 = smov [#allocation7]  }
  0x15   : > { %s6825_s13 = scalar_select %p5520_p4, 1, 0 }
  0x16   : > { %s6826_s14 = scalar_select %p5525_p6, 1, 0 }
  0x17   : > { %p5530_p8 = pnand %p3773_p5, %p255_p7  ;;  %s267_s17 = sshll.u32 %s5425_s16, 4  ;;  %s5534_s17 = int_to_ptr.vmem [resolvable:$true] %s267_s17 }
  0x18   : > { %6827 = sst [smem:[#allocation19_spill]] %s6826_s14  ;;  %s5426_s19 = smov [#allocation8]  }
  0x19   : > { %s6828_s15 = scalar_select %p5530_p8, 1, 0 }
  0x1a   : > { %p4963_p9 = pneg %p5530_p8  ;;  %s283_s20 = sshll.u32 %s5426_s19, 4  ;;  %s5545_s20 = int_to_ptr.vmem [resolvable:$true] %s283_s20 }
  0x1b   : > { %s5427_s21 = smov [#allocation10]   ;;  %s6830_s2 = sld [smem:[#allocation23_spill]] }
  0x1c   : > { %p5541_p11 = pnand %p4963_p9, %p6806_p1  ;;  %s5547_s22 = sshll.u32 %s5427_s21, 4  ;;  %s300_s22 = int_to_ptr.vmem [resolvable:$true] %s5547_s22 }
  0x1e   : > { %p5557_p13 = pneg %p5541_p11 }
  0x21   : > { %s5185_s25 = scalar_lea.hbm %s6830_s2, 1024 }
  0x22   : > { %p5186_p12 = scmp.ne.s32.totalorder %s6830_s2, %s5185_s25  ;;  %p5192_p5 = scmp.lt.u32.totalorder %s5185_s25, %s6830_s2 }
  0x24   : > { %p5188_p0 = pnand %p5557_p13, %p5186_p12 }
  0x26   : > { %p5189_p3 = pneg %p5188_p0 }
  0x28   : > { %p5194_p7 = pnand %p5192_p5, %p5189_p3 }
  0x2a   : > { %5197 = shalt.err (!%p5194_p7)
}
  0x2b   : > { %s5198_s23 = scalar_lea.vmem %s5534_s17, 1024  ;;  %p5206_p2 = scmp.lt.s32.totalorder %s5534_s17, %s5534_s17 }
  0x2c   : > { %p5199_p9 = scmp.ne.s32.totalorder %s5534_s17, %s5198_s23  ;;  %p5207_p6 = scmp.lt.s32.totalorder %s5198_s23, %s5198_s23 }
  0x2e   : > { %p5201_p10 = pnand %p5199_p9, %p5557_p13  ;;  %p5208_p12 = por %p5207_p6, %p5206_p2 }
  0x30   : > { %p5202_p1 = pneg %p5201_p10 }
  0x32   : > { %p5209_p0 = pnand %p5208_p12, %p5202_p1 }
  0x34   : > { %5212 = shalt.err (!%p5209_p0)
}
  0x35   : > { %s6812_s24 = smov 64   ;;  %s6814_s25 = smov 4  }
  0x36   : > { %4966 = dma.hbm_to_vmem [thread:$0]  (!%p5541_p11), %s6830_s2, 1024, %s5534_s17, [#allocation6], %s6812_s24, %s6812_s24, %s6814_s25  }
  0x37   : > { %s6832_s4 = sld [smem:[#allocation24_spill]] }
  0x3d   : > { %s5213_s23 = scalar_lea.hbm %s6832_s4, 9216 }
  0x3e   : > { %p5214_p1 = scmp.ne.s32.totalorder %s6832_s4, %s5213_s23  ;;  %p5220_p10 = scmp.lt.u32.totalorder %s5213_s23, %s6832_s4 }
  0x40   : > { %p5216_p2 = pnand %p5214_p1, %p5557_p13 }
  0x42   : > { %p5217_p6 = pneg %p5216_p2 }
  0x44   : > { %p5222_p3 = pnand %p5220_p10, %p5217_p6 }
  0x46   : > { %5225 = shalt.err (!%p5222_p3)
}
  0x47   : > { %s5226_s17 = scalar_lea.vmem %s5545_s20, 9216  ;;  %p5234_p12 = scmp.lt.s32.totalorder %s5545_s20, %s5545_s20 }
  0x48   : > { %p5227_p5 = scmp.ne.s32.totalorder %s5545_s20, %s5226_s17  ;;  %p5235_p0 = scmp.lt.s32.totalorder %s5226_s17, %s5226_s17 }
  0x4a   : > { %p5229_p7 = pnand %p5227_p5, %p5557_p13  ;;  %p5236_p1 = por %p5235_p0, %p5234_p12 }
  0x4c   : > { %p5230_p9 = pneg %p5229_p7 }
  0x4e   : > { %p5237_p2 = pnand %p5236_p1, %p5230_p9 }
  0x50   : > { %5240 = shalt.err (!%p5237_p2)
}
  0x51   : > { %4969 = dma.hbm_to_vmem [thread:$0]  (!%p5541_p11), %s6832_s4, 9216, %s5545_s20, [#allocation9], %s6812_s24, %s6812_s24, %s6814_s25  }
  0x52   : > { %s6833_s6 = sld [smem:[#allocation25_spill]] }
  0x58   : > { %s5241_s26 = scalar_lea.hbm %s6833_s6, 1024 }
  0x59   : > { %p5242_p6 = scmp.ne.s32.totalorder %s6833_s6, %s5241_s26  ;;  %p5248_p5 = scmp.lt.u32.totalorder %s5241_s26, %s6833_s6 }
  0x5b   : > { %p5244_p10 = pnand %p5242_p6, %p5557_p13 }
  0x5d   : > { %p5245_p3 = pneg %p5244_p10 }
  0x5f   : > { %p5250_p7 = pnand %p5248_p5, %p5245_p3 }
  0x61   : > { %5253 = shalt.err (!%p5250_p7)
}
  0x62   : > { %s5254_s17 = scalar_lea.vmem %s300_s22, 1024  ;;  %p5262_p1 = scmp.lt.s32.totalorder %s300_s22, %s300_s22 }
  0x63   : > { %p5255_p9 = scmp.ne.s32.totalorder %s300_s22, %s5254_s17  ;;  %p5263_p2 = scmp.lt.s32.totalorder %s5254_s17, %s5254_s17 }
  0x65   : > { %p5257_p12 = pnand %p5255_p9, %p5557_p13  ;;  %p5264_p4 = por %p5263_p2, %p5262_p1 }
  0x67   : > { %p5258_p0 = pneg %p5257_p12 }
  0x69   : > { %p5265_p8 = pnand %p5264_p4, %p5258_p0 }
  0x6b   : > { %5268 = shalt.err (!%p5265_p8)
}
  0x6c   : > { %4972 = dma.hbm_to_vmem [thread:$0]  (!%p5541_p11), %s6833_s6, 1024, %s300_s22, [#allocation9], %s6812_s24, %s6812_s24, %s6814_s25  }
  0x6d   : > { %s49_s16 = sadd.s32 1, %s5411_s29  ;;  %s40_s18 = sadd.s32 1, %s5419_s9 }
  0x6e   : > { %p56_p4 = scmp.ne.s32.totalorder %s5411_s29, %s5407_s28  ;;  %p42_p8 = scmp.ge.s32.totalorder %s40_s18, 2 }
  0x6f   : > { %p57_p13 = scmp.eq.s32.totalorder %s5423_s10, 0  ;;  %p6834_p6 = scmp.eq.s32.totalorder %s5511_s11, 1 }
  0x70   : > { %p4987_p3 = scmp.lt.s32.totalorder %s5423_s10, 2  ;;  %s6865_s18 = smov (%p42_p8, %s40_s18), 0 }
  0x71   : > { %p5636_p10 = por %p6834_p6, %p56_p4  ;;  %p58_p5 = por %p57_p13, %p56_p4 }
  0x72   : > { %s5644_s30 = sand.u32 1, %s5411_s29   ;;  %s44_s22 = ssub.s32 %s5419_s9, %s6865_s18 }
  0x73   : > { %p47_p11 = scmp.eq.s32.totalorder %s44_s22, 0  ;;  %s3778_s14 = sshll.u32 %s5644_s30, 7 }
  0x74   : > { %s3937_s26 = sshll.u32 %s5419_s9, 11  ;;  %s6836_s0 = sld [smem:[#allocation22_spill]] }
  0x75   : > { %s5651_s12 = scalar_select %p47_p11, %s5411_s29, %s49_s16  }
  0x76   : > { %s320_s17 = scalar_lea.vmem [#allocation2], %s3778_s14  ;;  %p5662_p7 = pnand %p4987_p3, %p58_p5 }
  0x77   : > { %s330_s20 = sshll.u32 %s320_s17, 4  ;;  %s3781_s22 = sshll.u32 %s5644_s30, 4  ;;  %s5658_s20 = int_to_ptr.vmem [resolvable:$true] %s330_s20 }
  0x78   : > { %s317_s19 = scalar_lea.sflag [#allocation3], %s5644_s30  ;;  %p5271_p12 = pneg %p5662_p7 }
  0x7a   : > { %s5656_s23 = scalar_lea.hbm %s6836_s0, %s3937_s26  ;;  %s5274_s17 = scalar_lea.hbm %s6836_s0, 4096 }
  0x7b   : > { %s5269_s26 = scalar_lea.hbm %s5656_s23, 2048  ;;  %p5275_p2 = scmp.lt.u32.totalorder %s5656_s23, %s6836_s0 }
  0x7c   : > { %p5270_p9 = scmp.ne.s32.totalorder %s5656_s23, %s5269_s26  ;;  %p5276_p4 = scmp.lt.u32.totalorder %s5274_s17, %s5269_s26 }
  0x7d   : > { %p5278_p13 = scmp.lt.u32.totalorder %s5269_s26, %s5656_s23 }
  0x7e   : > { %p5272_p0 = pnand %p5271_p12, %p5270_p9  ;;  %p5277_p8 = por %p5276_p4, %p5275_p2 }
  0x80   : > { %p5273_p1 = pneg %p5272_p0  ;;  %p5279_p6 = por %p5278_p13, %p5277_p8 }
  0x82   : > { %p5280_p3 = pnand %p5279_p6, %p5273_p1 }
  0x84   : > { %5283 = shalt.err (!%p5280_p3)
}
  0x85   : > { %s5284_s16 = scalar_lea.vmem %s5658_s20, 2048  ;;  %s5430_s14 = smov [#allocation2]  }
  0x86   : > { %p5285_p5 = scmp.ne.s32.totalorder %s5658_s20, %s5284_s16  ;;  %s5289_s21 = sshll.u32 %s5430_s14, 4  ;;  %s5290_s21 = int_to_ptr.vmem [resolvable:$false] %s5289_s21 }
  0x87   : > { %s5291_s24 = scalar_lea.vmem %s5290_s21, 4096  ;;  %p5292_p0 = scmp.lt.s32.totalorder %s5658_s20, %s5290_s21 }
  0x88   : > { %p5287_p11 = pnand %p5285_p5, %p5271_p12  ;;  %p5293_p2 = scmp.lt.s32.totalorder %s5291_s24, %s5284_s16 }
  0x8a   : > { %p5288_p9 = pneg %p5287_p11  ;;  %p5294_p4 = por %p5293_p2, %p5292_p0 }
  0x8c   : > { %p5295_p8 = pnand %p5294_p4, %p5288_p9 }
  0x8e   : > { %5298 = shalt.err (!%p5295_p8)
}
  0x8f   : > { %s6838_s25 = smov 4   ;;  %s6839_s26 = smov 64  }
  0x90   : > { %4976 = dma.hbm_to_vmem [thread:$0]  (!%p5662_p7), %s5656_s23, 2048, %s5658_s20, %s317_s19, %s6839_s26, %s6839_s26, %s6838_s25  }
  0x91   : > { %s3938_s17 = sshll.u32 %s5419_s9, 8  ;;  %s344_s24 = scalar_lea.vmem [#allocation5], %s3781_s22 }
  0x92   : > { %s5703_s21 = scalar_lea.hbm %s6798_s1, %s3938_s17  ;;  %s354_s0 = sshll.u32 %s344_s24, 4  ;;  %s5707_s0 = int_to_ptr.vmem [resolvable:$true] %s354_s0 }
  0x93   : > { %s6840_s2 = sand.u32 1, %s5423_s10   ;;  %s5299_s6 = scalar_lea.hbm %s5703_s21, 256 }
  0x94   : > { %s5711_s4 = scalar_lea.sflag [#allocation6], %s6840_s2  ;;  %p5300_p1 = scmp.ne.s32.totalorder %s5703_s21, %s5299_s6 }
  0x95   : > { %s5304_s30 = scalar_lea.hbm %s6798_s1, 512  ;;  %p5305_p3 = scmp.lt.u32.totalorder %s5703_s21, %s6798_s1 }
  0x96   : > { %p5302_p13 = pnand %p5300_p1, %p5271_p12  ;;  %p5306_p5 = scmp.lt.u32.totalorder %s5304_s30, %s5299_s6 }
  0x97   : > { %p5308_p9 = scmp.lt.u32.totalorder %s5299_s6, %s5703_s21 }
  0x98   : > { %p5303_p6 = pneg %p5302_p13  ;;  %p5307_p11 = por %p5306_p5, %p5305_p3 }
  0x9a   : > { %p5309_p0 = por %p5308_p9, %p5307_p11 }
  0x9c   : > { %p5310_p2 = pnand %p5309_p0, %p5303_p6 }
  0x9e   : > { %5313 = shalt.err (!%p5310_p2)
}
  0x9f   : > { %s5314_s2 = scalar_lea.vmem %s5707_s0, 256  ;;  %s5431_s22 = smov [#allocation5]  }
  0xa0   : > { %p5315_p4 = scmp.ne.s32.totalorder %s5707_s0, %s5314_s2  ;;  %s5319_s14 = sshll.u32 %s5431_s22, 4  ;;  %s5320_s14 = int_to_ptr.vmem [resolvable:$false] %s5319_s14 }
  0xa1   : > { %s5321_s16 = scalar_lea.vmem %s5320_s14, 512  ;;  %p5322_p13 = scmp.lt.s32.totalorder %s5707_s0, %s5320_s14 }
  0xa2   : > { %p5317_p8 = pnand %p5315_p4, %p5271_p12  ;;  %p5323_p3 = scmp.lt.s32.totalorder %s5321_s16, %s5314_s2 }
  0xa4   : > { %p5318_p1 = pneg %p5317_p8  ;;  %p5324_p5 = por %p5323_p3, %p5322_p13 }
  0xa6   : > { %p5325_p11 = pnand %p5324_p5, %p5318_p1 }
  0xa8   : > { %5328 = shalt.err (!%p5325_p11)
}
  0xa9   : > { %4979 = dma.hbm_to_vmem [thread:$0]  (!%p5662_p7), %s5703_s21, 256, %s5707_s0, %s5711_s4, %s6839_s26, %s6839_s26, %s6838_s25  }
  0xaa   : > { %p6841_p12 = scmp.ne.s32.totalorder %s6828_s15, 0 }
  0xac   : > { %366 = sbr.rel (%p6841_p12) target bundleno = 1239 (0x4d7), region = 52 }
  0xb3   : > { %s5743_s6 = sand.u32 1, %s5407_s28   ;;  %p6842_p6 = scmp.ne.s32.totalorder %s6825_s13, 0 }
  0xb4   : > { %s3785_s24 = sshll.u32 %s5743_s6, 7  ;;  %s369_s23 = scalar_lea.sflag [#allocation3], %s5743_s6 }
  0xb5   : > { %s5749_s8 = scalar_lea.vmem [#allocation2], %s3785_s24 }
  0xb6   : > { %5382 = dma.done.wait (%p6842_p6), %s369_s23, 2048  }
  0xb7   : > { %5384 = vsyncadd (%p6842_p6), %s369_s23, 4294965248  ;;  %s377_s0 = sand.u32 1, %s5511_s11   ;;  %s3786_s4 = sshll.u32 %s5743_s6, 4 }
  0xb8   : > { %s378_s15 = scalar_lea.sflag [#allocation6], %s377_s0  ;;  %s5757_s25 = scalar_lea.vmem [#allocation5], %s3786_s4 }
  0xb9   : > { %5386 = dma.done.wait (%p6842_p6), %s378_s15, 256  }
  0xba   : > { %5388 = vsyncadd (%p6842_p6), %s378_s15, 4294967040  ;;  %p6843_p7 = scmp.eq.s32.totalorder %s5511_s11, 0 }
  0xbc   : > { %5390 = dma.done.wait (%p6843_p7), [#allocation6], 1024   ;;  %p6844_p9 = pmov %p6843_p7 }
  0xbd   : > { %p6845_p0 = pmov %p6843_p7 }
  0xbe   : > { %5392 = vsyncadd (%p6844_p9), [#allocation6], 4294966272 }
  0xbf   : > { %5394 = dma.done.wait (%p6845_p0), [#allocation9], 10240   ;;  %p6846_p2 = pmov %p6845_p0 }
  0xc0   : > { %v5047_v0 = vld [vmem:[#allocation7] sm:$0xff]   ;;  %v5048_v1 = vld [vmem:[#allocation7 + $0x8] sm:$0xff]   ;;  %v5049_v2 = vld [vmem:[#allocation7 + $0x10] sm:$0xff]   ;;  %vm1079_vm0 = vcmask 1040384   ;;  %vm1080_vm1 = vsmask.f32 256 }
  0xc1   : > { %5396 = vsyncadd (%p6846_p2), [#allocation9], 4294957056  ;;  %4525 = vmatprep.subr.bf16.mxu0 %v5047_v0  ;;  %4769 = vmatprep.subr.bf16.mxu1 %v5047_v0  ;;  %v5050_v3 = vld [vmem:[#allocation7 + $0x18] sm:$0xff]   ;;  %v435_v4 = vld [vmem:[%s5749_s8] sm:$0xff]   ;;  %vm1389_vm3 = vcmask 1046528   ;;  %s6685_s19 = scalar_lea.vmem [#allocation11], %s3785_s24 }
  0xc2   : > { %4526 = vmatpush3.bf16.msra.mxu0 %v5047_v0  ;;  %4777 = vmatpush3.bf16.msra.mxu1 %v5047_v0  ;;  %v451_v5 = vld [vmem:[%s5749_s8 + $0x40] sm:$0xff]   ;;  %v5052_v7 = vld [vmem:[#allocation7 + $0x28] sm:$0xff]   ;;  %v5053_v8 = vld [vmem:[#allocation7 + $0x30] sm:$0xff]   ;;  %vm1118_vm4 = vsmask.f32 7424  ;;  %s6853_s17 = sld [smem:[#allocation18_spill]] }
  0xc3   : > { %4527 = vmatprep.subr.bf16.mxu0 %v5048_v1  ;;  %4770 = vmatprep.subr.bf16.mxu1 %v5048_v1  ;;  %v5051_v6 = vld [vmem:[#allocation7 + $0x20] sm:$0xff]   ;;  %v5054_v9 = vld [vmem:[#allocation7 + $0x38] sm:$0xff]   ;;  %v437_v10 = vld [vmem:[%s5749_s8 + $0x8] sm:$0xff]   ;;  %s3630_s22 = sshll.u32 %s6685_s19, 4  ;;  %s6854_s24 = sld [smem:[#allocation26_spill]]  ;;  %s6746_s22 = int_to_ptr.vmem [resolvable:$true] %s3630_s22 }
  0xc4   : > { %4541 = vmatprep.mubr.bf16.mxu0 %v435_v4  ;;  %4557 = vmatprep.mubr.bf16.mxu1 %v451_v5  ;;  %v439_v11 = vld [vmem:[%s5749_s8 + $0x10] sm:$0xff]   ;;  %v453_v12 = vld [vmem:[%s5749_s8 + $0x48] sm:$0xff]   ;;  %v5073_v13 = vld [vmem:[#allocation8 + $0x140] sm:$0xff]   ;;  %s5329_s0 = scalar_lea.vmem %s6746_s22, 2048  ;;  %s5432_s4 = smov [#allocation11]  }
  0xc5   : > { %v455_v14 = vld [vmem:[%s5749_s8 + $0x50] sm:$0xff]   ;;  %v5075_v15 = vld [vmem:[#allocation8 + $0x100] sm:$0xff]   ;;  %v5074_v16 = vld [vmem:[#allocation8 + $0x148] sm:$0xff]   ;;  %p5330_p4 = scmp.ne.s32.totalorder %s6746_s22, %s5329_s0  ;;  %s5333_s15 = sshll.u32 %s5432_s4, 4  ;;  %s5334_s15 = int_to_ptr.vmem [resolvable:$false] %s5333_s15 }
  0xc6   : > { %4528 = vmatpush3.bf16.msra.mxu0 %v5048_v1  ;;  %4778 = vmatpush3.bf16.msra.mxu1 %v5048_v1  ;;  %v5076_v17 = vld [vmem:[#allocation8 + $0xc0] sm:$0xff]   ;;  %v5078_v18 = vld [vmem:[#allocation8 + $0x108] sm:$0xff]   ;;  %v441_v19 = vld [vmem:[%s5749_s8 + $0x18] sm:$0xff]   ;;  %p5336_p13 = scmp.lt.s32.totalorder %s6746_s22, %s5334_s15 }
  0xc7   : > { %4529 = vmatprep.subr.bf16.mxu0 %v5049_v2  ;;  %4771 = vmatprep.subr.bf16.mxu1 %v5049_v2  ;;  %v443_v20 = vld [vmem:[%s5749_s8 + $0x20] sm:$0xff]   ;;  %v457_v21 = vld [vmem:[%s5749_s8 + $0x58] sm:$0xff]   ;;  %v5077_v23 = vld [vmem:[#allocation8 + $0x150] sm:$0xff]   ;;  %p5331_p8 = pnand %p5330_p4, %p5636_p10 }
  0xc8   : > { %v459_v22 = vld [vmem:[%s5749_s8 + $0x60] sm:$0xff]   ;;  %v5079_v24 = vld [vmem:[#allocation8 + $0xc8] sm:$0xff]   ;;  %v447_v26 = vld [vmem:[%s5749_s8 + $0x30] sm:$0xff]   ;;  %s3971_s2 = sshll.u32 %s6853_s17, 11 }
  0xc9   : > { %v445_v25 = vld [vmem:[%s5749_s8 + $0x28] sm:$0xff]   ;;  %v463_v28 = vld [vmem:[%s5749_s8 + $0x70] sm:$0xff]   ;;  %v449_v29 = vld [vmem:[%s5749_s8 + $0x38] sm:$0xff]   ;;  %s6744_s23 = scalar_lea.hbm %s6854_s24, %s3971_s2  ;;  %p5332_p1 = pneg %p5331_p8 }
  0xca   : > { %4530 = vmatpush3.bf16.msra.mxu0 %v5049_v2  ;;  %4779 = vmatpush3.bf16.msra.mxu1 %v5049_v2  ;;  %v461_v27 = vld [vmem:[%s5749_s8 + $0x68] sm:$0xff]   ;;  %v465_v30 = vld [vmem:[%s5749_s8 + $0x78] sm:$0xff]   ;;  %v5071_v31 = vld [vmem:[%s5757_s25] sm:$0xff]  }
  0xcb   : > { %4531 = vmatprep.subr.bf16.mxu0 %v5050_v3  ;;  %4772 = vmatprep.subr.bf16.mxu1 %v5050_v3  ;;  %v5072_v32 = vld [vmem:[%s5757_s25 + $0x8] sm:$0xff]   ;;  %v5081_v34 = vld [vmem:[#allocation8 + $0x110] sm:$0xff]   ;;  %v5083_v36 = vld [vmem:[#allocation8 + $0x160] sm:$0xff]   ;;  %s5335_s25 = scalar_lea.vmem %s5334_s15, 4096 }
  0xcc   : > { %v5080_v33 = vld [vmem:[#allocation8 + $0x158] sm:$0xff]   ;;  %v5082_v35 = vld [vmem:[#allocation8 + $0xd0] sm:$0xff]   ;;  %v5086_v39 = vld [vmem:[#allocation8 + $0x168] sm:$0xff]   ;;  %p5337_p3 = scmp.lt.s32.totalorder %s5335_s25, %s5329_s0 }
  0xcd   : > { %v5084_v37 = vld [vmem:[#allocation8 + $0x118] sm:$0xff]   ;;  %v5087_v40 = vld [vmem:[#allocation8 + $0x120] sm:$0xff]   ;;  %v5089_v42 = vld [vmem:[#allocation8 + $0x170] sm:$0xff]  }
  0xce   : > { %4532 = vmatpush3.bf16.msra.mxu0 %v5050_v3  ;;  %4780 = vmatpush3.bf16.msra.mxu1 %v5050_v3  ;;  %v5085_v38 = vld [vmem:[#allocation8 + $0xd8] sm:$0xff]   ;;  %v5088_v41 = vld [vmem:[#allocation8 + $0xe0] sm:$0xff]   ;;  %v5090_v43 = vld [vmem:[#allocation8 + $0x128] sm:$0xff]   ;;  %p5338_p5 = por %p5337_p3, %p5336_p13 }
  0xcf   : > { %4533 = vmatprep.subr.bf16.mxu0 %v5051_v6  ;;  %4773 = vmatprep.subr.bf16.mxu1 %v5051_v6  ;;  %v5091_v44 = vld [vmem:[#allocation8 + $0xe8] sm:$0xff]   ;;  %v5092_v45 = vld [vmem:[#allocation8 + $0x178] sm:$0xff]   ;;  %v5093_v46 = vld [vmem:[#allocation8 + $0x130] sm:$0xff]  }
  0xd0   : > { %v5094_v47 = vld [vmem:[#allocation8 + $0xf0] sm:$0xff]   ;;  %v5096_v48 = vld [vmem:[#allocation8 + $0x138] sm:$0xff]   ;;  %v5789_v50 = vld [vmem:[#allocation8 + $0x80] sm:$0xff]   ;;  %p5339_p11 = pnand %p5338_p5, %p5332_p1 }
  0xd1   : > { %v5097_v49 = vld [vmem:[#allocation8 + $0xf8] sm:$0xff]   ;;  %v5105_v51 = vld [vmem:[#allocation8 + $0x40] sm:$0xff]   ;;  %vm5817_vm2 = vmand %vm1079_vm0, %vm1080_vm1 }
  0xd2   : > { %4534 = vmatpush3.bf16.msra.mxu0 %v5051_v6  ;;  %4781 = vmatpush3.bf16.msra.mxu1 %v5051_v6  ;;  %v5795_v52 = vld [vmem:[%s6800_s3] ss:$0 sm:$0xff] }
  0xd3   : > { %4535 = vmatprep.subr.bf16.mxu0 %v5052_v7  ;;  %4774 = vmatprep.subr.bf16.mxu1 %v5052_v7 }
  0xd6   : > { %4536 = vmatpush3.bf16.msra.mxu0 %v5052_v7  ;;  %4782 = vmatpush3.bf16.msra.mxu1 %v5052_v7 }
  0xd7   : > { %4537 = vmatprep.subr.bf16.mxu0 %v5053_v8  ;;  %4775 = vmatprep.subr.bf16.mxu1 %v5053_v8 }
  0xda   : > { %4538 = vmatpush3.bf16.msra.mxu0 %v5053_v8  ;;  %4783 = vmatpush3.bf16.msra.mxu1 %v5053_v8 }
  0xdb   : > { %4539 = vmatprep.subr.bf16.mxu0 %v5054_v9  ;;  %4776 = vmatprep.subr.bf16.mxu1 %v5054_v9 }
  0xde   : > { %4540 = vmatpush3.bf16.msra.mxu0 %v5054_v9  ;;  %4784 = vmatpush3.bf16.msra.mxu1 %v5054_v9 }
  0xdf   : > { %4577 = vmatprep.subr.bf16.mxu0 %v5073_v13  ;;  %4093 = vmatprep.subr.bf16.mxu1 %v5075_v15 }
  0xe1   : > { %4542 = vmatmul.mubr.bf16.vlgmr.msra.gmra.mrb[0].mxu0 %v437_v10  ;;  %4558 = vmatmul.mubr.bf16.vlgmr.msra.gmra.mrb[0].mxu1 %v453_v12 }
  0xe2   : > { %4545 = vmatprep.mubr.bf16.mxu0 %v439_v11  ;;  %4561 = vmatprep.mubr.bf16.mxu1 %v455_v14 }
  0xe3   : > { %4578 = vmatpush3.bf16.msra.mxu0 %v5073_v13  ;;  %4094 = vmatpush3.bf16.msra.mxu1 %v5076_v17 }
  0xe4   : > { %4579 = vmatprep.subr.bf16.mxu0 %v5074_v16  ;;  %4095 = vmatprep.subr.bf16.mxu1 %v5078_v18 }
  0xe7   : > { %4580 = vmatpush3.bf16.msra.mxu0 %v5074_v16  ;;  %4096 = vmatpush3.bf16.msra.mxu1 %v5079_v24 }
  0xe8   : > { %4581 = vmatprep.subr.bf16.mxu0 %v5077_v23  ;;  %4097 = vmatprep.subr.bf16.mxu1 %v5081_v34 }
  0xe9   : > { %4546 = vmatmul.mubr.bf16.gmra.mrb[4].mxu0 %v441_v19  ;;  %4562 = vmatmul.mubr.bf16.gmra.mrb[4].mxu1 %v457_v21 }
  0xea   : > { %4549 = vmatprep.mubr.bf16.mxu0 %v443_v20  ;;  %4565 = vmatprep.mubr.bf16.mxu1 %v459_v22 }
  0xeb   : > { %4582 = vmatpush3.bf16.msra.mxu0 %v5077_v23  ;;  %4098 = vmatpush3.bf16.msra.mxu1 %v5082_v35 }
  0xec   : > { %4583 = vmatprep.subr.bf16.mxu0 %v5080_v33  ;;  %4099 = vmatprep.subr.bf16.mxu1 %v5084_v37 }
  0xef   : > { %4584 = vmatpush3.bf16.msra.mxu0 %v5080_v33  ;;  %4100 = vmatpush3.bf16.msra.mxu1 %v5085_v38 }
  0xf0   : > { %4585 = vmatprep.subr.bf16.mxu0 %v5083_v36  ;;  %4101 = vmatprep.subr.bf16.mxu1 %v5087_v40 }
  0xf1   : > { %4550 = vmatmul.mubr.bf16.gmra.mrb[8].mxu0 %v445_v25  ;;  %4566 = vmatmul.mubr.bf16.gmra.mrb[8].mxu1 %v461_v27 }
  0xf2   : > { %4553 = vmatprep.mubr.bf16.mxu0 %v447_v26  ;;  %4569 = vmatprep.mubr.bf16.mxu1 %v463_v28  ;;  %v6847_v28 = vmov 0 }
  0xf3   : > { %4586 = vmatpush3.bf16.msra.mxu0 %v5083_v36  ;;  %4102 = vmatpush3.bf16.msra.mxu1 %v5088_v41  ;;  %v6848_v28 = vsel %vm5817_vm2, 4294967295, %v6847_v28 }
  0xf4   : > { %4587 = vmatprep.subr.bf16.mxu0 %v5086_v39  ;;  %4103 = vmatprep.subr.bf16.mxu1 %v5090_v43  ;;  %6849 = vst [vmem:[#allocation20_spill] sm:$0xff] %v6848_v28 }
  0xf7   : > { %4588 = vmatpush3.bf16.msra.mxu0 %v5086_v39  ;;  %4104 = vmatpush3.bf16.msra.mxu1 %v5091_v44 }
  0xf8   : > { %4589 = vmatprep.subr.bf16.mxu0 %v5089_v42  ;;  %4105 = vmatprep.subr.bf16.mxu1 %v5093_v46 }
  0xf9   : > { %4554 = vmatmul.mubr.bf16.gmra.mrb[12].mxu0 %v449_v29  ;;  %4570 = vmatmul.mubr.bf16.gmra.mrb[12].mxu1 %v465_v30 }
  0xfa   : > { %4573 = vmatprep.mubr.bf16.mxu1 %v5071_v31 }
  0xfb   : > { %4590 = vmatpush3.bf16.msra.mxu0 %v5089_v42  ;;  %4106 = vmatpush3.bf16.msra.mxu1 %v5094_v47 }
  0xfc   : > { %4591 = vmatprep.subr.bf16.mxu0 %v5092_v45  ;;  %4107 = vmatprep.subr.bf16.mxu1 %v5096_v48 }
  0xff   : > { %4592 = vmatpush3.bf16.msra.mxu0 %v5092_v45  ;;  %4108 = vmatpush3.bf16.msra.mxu1 %v5097_v49 }
 0x100   : > { %4625 = vmatprep.subr.bf16.mxu0 %v5789_v50  ;;  %4229 = vmatprep.subr.bf16.mxu1 %v5105_v51 }
 0x101   : > { %4574 = vmatmul.mubr.bf16.gmra.mrb[16].mxu1 %v5072_v32 }
 0x1b4   : > { %v4543_v53 = vpop.f32.mrb[0].mxu0  ;;  %v4559_v56 = vpop.f32.mrb[0].mxu1 }
 0x1b5   : > { %v693_v54 = vadd.f32 %v4543_v53, %v5795_v52  ;;  %v684_v55 = vpop.f32.mrb[1].mxu0  ;;  %v757_v59 = vadd.f32 %v4559_v56, %v5795_v52  ;;  %v748_v60 = vpop.f32.mrb[1].mxu1 }
 0x1b6   : > { %v685_v57 = vadd.f32 %v5795_v52, %v684_v55  ;;  %v4544_v58 = vpop.f32.mrb[2].mxu0  ;;  %v749_v63 = vadd.f32 %v5795_v52, %v748_v60  ;;  %v4560_v0 = vpop.f32.mrb[2].mxu1 }
 0x1b7   : > { %v696_v61 = vadd.f32 %v4544_v58, %v5795_v52  ;;  %v687_v62 = vpop.f32.mrb[3].mxu0  ;;  %v845_v2 = vmax.f32 %v757_v59, 0.0  ;;  %v760_v3 = vadd.f32 %v4560_v0, %v5795_v52  ;;  %v751_v4 = vpop.f32.mrb[3].mxu1  ;;  %v829_v5 = vmax.f32 %v693_v54, 0.0 }
 0x1b8   : > { %v688_v1 = vadd.f32 %v5795_v52, %v687_v62  ;;  %v843_v7 = vmax.f32 %v749_v63, 0.0  ;;  %v752_v8 = vadd.f32 %v5795_v52, %v751_v4  ;;  %v827_v9 = vmax.f32 %v685_v57, 0.0 }
 0x1b9   : > { %v830_v6 = vmax.f32 %v696_v61, 0.0  ;;  %v846_v11 = vmax.f32 %v760_v3, 0.0 }
 0x1ba   : > { %v828_v10 = vmax.f32 %v688_v1, 0.0  ;;  %v844_v13 = vmax.f32 %v752_v8, 0.0 }
 0x1bb   : > { %v864_v12 = vpack.c.bf16 %v830_v6, %v829_v5  ;;  %v5805_v16 = vpack.c.bf16 %v846_v11, %v845_v2 }
 0x1bc   : > { %v863_v14 = vpack.c.bf16 %v828_v10, %v827_v9  ;;  %v4547_v15 = vpop.f32.mrb[4].mxu0  ;;  %v5808_v20 = vpack.c.bf16 %v844_v13, %v843_v7  ;;  %v5810_v21 = vpop.f32.mrb[4].mxu1  ;;  %v5098_v7 = vld [vmem:[#allocation8 + $0x88] sm:$0xff]  }
 0x1bd   : > { %v932_v17 = vshrl.u32 %v864_v12, 16  ;;  %v709_v18 = vadd.f32 %v4547_v15, %v5795_v52  ;;  %v700_v19 = vpop.f32.mrb[5].mxu0  ;;  %v5813_v25 = vpop.f32.mrb[5].mxu1  ;;  %v935_v27 = vshll.u32 %v864_v12, 16  ;;  %v988_v46 = vshrl.u32 %v5805_v16, 16 }
 0x1be   : > { %v925_v22 = vshrl.u32 %v863_v14, 16  ;;  %v701_v23 = vadd.f32 %v5795_v52, %v700_v19  ;;  %v4548_v24 = vpop.f32.mrb[6].mxu0  ;;  %v5822_v31 = vpop.f32.mrb[6].mxu1  ;;  %v928_v33 = vshll.u32 %v863_v14, 16  ;;  %v981_v53 = vshrl.u32 %v5808_v20, 16 }
 0x1bf   : > { %v934_v26 = vrot.slane %v932_v17, 7  ;;  %v712_v29 = vadd.f32 %v4548_v24, %v5795_v52  ;;  %v703_v30 = vpop.f32.mrb[7].mxu0  ;;  %v5825_v35 = vpop.f32.mrb[7].mxu1  ;;  %v833_v37 = vmax.f32 %v709_v18, 0.0  ;;  %v991_v24 = vshll.u32 %v5805_v16, 16 }
 0x1c0   : > { %v927_v32 = vrot.slane %v925_v22, 7  ;;  %v704_v34 = vadd.f32 %v5795_v52, %v703_v30  ;;  %v831_v40 = vmax.f32 %v701_v23, 0.0  ;;  %v5878_v30 = vrot.slane %v988_v46, 7 }
 0x1c1   : > { %v937_v36 = vor.u32 %v935_v27, %v934_v26  ;;  %v834_v38 = vmax.f32 %v712_v29, 0.0  ;;  %v5835_v44 = vsel %vm5817_vm2, %v934_v26, 0 }
 0x1c2   : > { %v930_v39 = vor.u32 %v928_v33, %v927_v32  ;;  %v832_v41 = vmax.f32 %v704_v34, 0.0  ;;  %v1101_v42 = vsel %vm5817_vm2, %v927_v32, 0  ;;  %v1397_v60 = vrot.slane %v5835_v44, 1  ;;  %v5099_v32 = vld [vmem:[#allocation8 + $0x90] sm:$0xff]  }
 0x1c3   : > { %v5831_v43 = vsel %vm5817_vm2, 0, %v937_v36  ;;  %v866_v45 = vpack.c.bf16 %v834_v38, %v833_v37  ;;  %v1394_v58 = vrot.slane %v1101_v42, 1  ;;  %v1139_v0 = vshll.u32 %v1101_v42, 16 }
 0x1c4   : > { %v5840_v47 = vsel %vm5817_vm2, 0, %v930_v39  ;;  %v865_v48 = vpack.c.bf16 %v832_v41, %v831_v40  ;;  %v4551_v49 = vpop.f32.mrb[8].mxu0  ;;  %v1396_v51 = vrot.slane %v5831_v43, 1  ;;  %v5846_v59 = vpop.f32.mrb[8].mxu1  ;;  %v5880_v37 = vrot.slane %v981_v53, 7 }
 0x1c5   : > { %v946_v54 = vshrl.u32 %v866_v45, 16  ;;  %v725_v55 = vadd.f32 %v4551_v49, %v5795_v52  ;;  %v716_v56 = vpop.f32.mrb[9].mxu0  ;;  %v1393_v57 = vrot.slane %v5840_v47, 1  ;;  %v5850_v1 = vpop.f32.mrb[9].mxu1  ;;  %v949_v3 = vshll.u32 %v866_v45, 16 }
 0x1c6   : > { %v939_v61 = vshrl.u32 %v865_v48, 16  ;;  %v717_v62 = vadd.f32 %v5795_v52, %v716_v56  ;;  %v4552_v63 = vpop.f32.mrb[10].mxu0  ;;  %v5858_v8 = vpop.f32.mrb[10].mxu1  ;;  %v942_v10 = vshll.u32 %v865_v48, 16  ;;  %v5865_v12 = vsel %vm1389_vm3, %v1396_v51, %v1397_v60 }
 0x1c7   : > { %v5852_v2 = vrot.slane %v946_v54, 7  ;;  %v728_v4 = vadd.f32 %v4552_v63, %v5795_v52  ;;  %v719_v5 = vpop.f32.mrb[11].mxu0  ;;  %v5856_v6 = vsel %vm1389_vm3, %v1393_v57, %v1394_v58  ;;  %v5867_v13 = vpop.f32.mrb[11].mxu1  ;;  %v837_v15 = vmax.f32 %v725_v55, 0.0  ;;  %v5106_v54 = vld [vmem:[#allocation8] sm:$0xff]   ;;  %v5111_v63 = vld [vmem:[#allocation8 + $0x48] sm:$0xff]  }
 0x1c8   : > { %v5860_v9 = vrot.slane %v939_v61, 7  ;;  %v720_v11 = vadd.f32 %v5795_v52, %v719_v5  ;;  %4593 = vmatprep.mubr.bf16.mxu0 %v5856_v6  ;;  %v1134_v18 = vshll.u32 %v5840_v47, 16  ;;  %v835_v22 = vmax.f32 %v717_v62, 0.0  ;;  %v5100_v61 = vld [vmem:[#allocation8 + $0x98] sm:$0xff]  }
 0x1c9   : > { %v951_v14 = vor.u32 %v949_v3, %v5852_v2  ;;  %v838_v17 = vmax.f32 %v728_v4, 0.0  ;;  %4594 = vmatmul.mubr.bf16.vlgmr.msra.gmra.mrb[16].mxu0 %v5865_v12  ;;  %v1132_v27 = vshrl.u32 %v5840_v47, 16  ;;  %v1141_v36 = vrot.slane %v1139_v0, 1 }
 0x1ca   : > { %v944_v19 = vor.u32 %v942_v10, %v5860_v9  ;;  %v836_v23 = vmax.f32 %v720_v11, 0.0  ;;  %4626 = vmatpush3.bf16.msra.mxu0 %v5789_v50  ;;  %v1136_v29 = vrot.slane %v1134_v18, 1  ;;  %v1146_v38 = vshll.u32 %v5831_v43, 16 }
 0x1cb   : > { %v5875_v26 = vpack.c.bf16 %v838_v17, %v837_v15  ;;  %4627 = vmatprep.subr.bf16.mxu0 %v5098_v7  ;;  %v5885_v50 = vsel %vm5817_vm2, 0, %v951_v14  ;;  %v984_v51 = vshll.u32 %v5808_v20, 16  ;;  %v1144_v58 = vshrl.u32 %v5831_v43, 16 }
 0x1cc   : > { %v867_v33 = vpack.c.bf16 %v836_v23, %v835_v22  ;;  %v4555_v34 = vpop.f32.mrb[12].mxu0  ;;  %v1137_v40 = vor.u32 %v1136_v29, %v1132_v27  ;;  %v5889_v42 = vpop.f32.mrb[12].mxu1  ;;  %v5893_v45 = vsel %vm5817_vm2, 0, %v944_v19  ;;  %v1148_v4 = vrot.slane %v1146_v38, 1 }
 0x1cd   : > { %v960_v16 = vshrl.u32 %v5875_v26, 16  ;;  %v741_v39 = vadd.f32 %v4555_v34, %v5795_v52  ;;  %v732_v41 = vpop.f32.mrb[13].mxu0  ;;  %v5897_v53 = vpop.f32.mrb[13].mxu1  ;;  %v963_v55 = vshll.u32 %v5875_v26, 16  ;;  %v1151_v11 = vshll.u32 %v5835_v44, 16  ;;  %v5101_v44 = vld [vmem:[#allocation8 + $0xa0] sm:$0xff]  }
 0x1ce   : > { %v953_v46 = vshrl.u32 %v867_v33, 16  ;;  %v733_v48 = vadd.f32 %v5795_v52, %v732_v41  ;;  %v4556_v49 = vpop.f32.mrb[14].mxu0  ;;  %4628 = vmatpush3.bf16.msra.mxu0 %v5098_v7  ;;  %v5901_v56 = vsel %vm1118_vm4, %v1137_v40, %v1141_v36  ;;  %v5905_v62 = vpop.f32.mrb[14].mxu1  ;;  %v956_v3 = vshll.u32 %v867_v33, 16  ;;  %v5112_v34 = vld [vmem:[#allocation8 + $0x8] sm:$0xff]  }
 0x1cf   : > { %v744_v57 = vadd.f32 %v4556_v49, %v5795_v52  ;;  %v735_v60 = vpop.f32.mrb[15].mxu0  ;;  %4629 = vmatprep.subr.bf16.mxu0 %v5099_v32  ;;  %v5907_v20 = vrot.slane %v960_v16, 7  ;;  %1735 = vmatprep.mubr.bf16.mxu1 %v5901_v56  ;;  %v5912_v5 = vpop.f32.mrb[15].mxu1  ;;  %v841_v7 = vmax.f32 %v741_v39, 0.0  ;;  %v1149_v17 = vor.u32 %v1148_v4, %v1144_v58  ;;  %v5117_v49 = vld [vmem:[#allocation8 + $0x50] sm:$0xff]  }
 0x1d0   : > { %v5909_v0 = vrot.slane %v953_v46, 7  ;;  %1736 = vmatmul.mubr.bf16.vlgmr.msra.gmra.mrb[20].mxu1 %v5840_v47  ;;  %v736_v14 = vadd.f32 %v5795_v52, %v735_v60  ;;  %v839_v15 = vmax.f32 %v733_v48, 0.0  ;;  %v5920_v18 = vsel %vm5817_vm2, %v5860_v9, 0  ;;  %v5118_v4 = vld [vmem:[#allocation8 + $0x10] sm:$0xff]  }
 0x1d1   : > { %v842_v10 = vmax.f32 %v744_v57, 0.0  ;;  %v1399_v19 = vrot.slane %v5893_v45, 1  ;;  %4230 = vmatpush3.bf16.msra.mxu1 %v5106_v54  ;;  %v1153_v26 = vrot.slane %v1151_v11, 1  ;;  %v5927_v29 = vor.u32 %v991_v24, %v5878_v30 }
 0x1d2   : > { %4630 = vmatpush3.bf16.msra.mxu0 %v5099_v32  ;;  %v958_v22 = vor.u32 %v956_v3, %v5909_v0  ;;  %v840_v27 = vmax.f32 %v736_v14, 0.0  ;;  %4231 = vmatprep.subr.bf16.mxu1 %v5111_v63  ;;  %v1400_v33 = vrot.slane %v5920_v18, 1  ;;  %v5933_v9 = vsel %vm5817_vm2, %v5852_v2, 0  ;;  %v5123_v14 = vld [vmem:[#allocation8 + $0x58] sm:$0xff]  }
 0x1d3   : > { %v5924_v23 = vpack.c.bf16 %v842_v10, %v841_v7  ;;  %4631 = vmatprep.subr.bf16.mxu0 %v5100_v61  ;;  %v1402_v32 = vrot.slane %v5885_v50, 1  ;;  %v965_v36 = vor.u32 %v963_v55, %v5907_v20  ;;  %v5939_v16 = vsel %vm1118_vm4, %v1149_v17, %v1153_v26 }
 0x1d4   : > { %v869_v39 = vpack.c.bf16 %v840_v27, %v839_v15  ;;  %v5941_v24 = vpop.f32.mrb[16].mxu1  ;;  %1743 = vmatprep.mubr.bf16.mxu1 %v5939_v16  ;;  %v5945_v40 = vsel %vm1389_vm3, %v1399_v19, %v1400_v33  ;;  %v1403_v2 = vrot.slane %v5933_v9, 1  ;;  %v773_v41 = vadd.f32 %v5810_v21, %v5795_v52 }
 0x1d5   : > { %v974_v38 = vshrl.u32 %v5924_v23, 16  ;;  %v765_v46 = vadd.f32 %v5795_v52, %v5813_v25  ;;  %v5952_v48 = vpop.f32.mrb[17].mxu1  ;;  %v5956_v54 = vsel %vm5817_vm2, 0, %v958_v22  ;;  %v5959_v55 = vor.u32 %v984_v51, %v5880_v37  ;;  %4597 = vmatprep.mubr.bf16.mxu0 %v5945_v40  ;;  %v5102_v25 = vld [vmem:[#allocation8 + $0xa8] sm:$0xff]   ;;  %4232 = vmatpush3.bf16.msra.mxu1 %v5112_v34 }
 0x1d6   : > { %4632 = vmatpush3.bf16.msra.mxu0 %v5100_v61  ;;  %v967_v57 = vshrl.u32 %v869_v39, 16  ;;  %v776_v21 = vadd.f32 %v5822_v31, %v5795_v52  ;;  %v5964_v58 = vpop.f32.mrb[18].mxu1  ;;  %v5967_v60 = vsel %vm1389_vm3, %v1402_v32, %v1403_v2  ;;  %v849_v61 = vmax.f32 %v773_v41, 0.0  ;;  %4233 = vmatprep.subr.bf16.mxu1 %v5117_v49  ;;  %v5103_v32 = vld [vmem:[#allocation8 + $0xb0] sm:$0xff]   ;;  %v5127_v41 = vld [vmem:[#allocation8 + $0x60] sm:$0xff]  }
 0x1d7   : > { %4633 = vmatprep.subr.bf16.mxu0 %v5101_v44  ;;  %v847_v63 = vmax.f32 %v765_v46, 0.0  ;;  %v768_v3 = vadd.f32 %v5795_v52, %v5825_v35  ;;  %v5971_v51 = vpop.f32.mrb[19].mxu1  ;;  %v5975_v7 = vsel %vm5817_vm2, 0, %v965_v36  ;;  %v5977_v31 = vrot.slane %v974_v38, 7  ;;  %4598 = vmatmul.mubr.bf16.gmra.mrb[20].mxu0 %v5967_v60 }
 0x1d8   : > { %v5979_v10 = vrot.slane %v967_v57, 7  ;;  %v850_v11 = vmax.f32 %v776_v21, 0.0  ;;  %1744 = vmatmul.mubr.bf16.gmra.mrb[24].mxu1 %v5831_v43  ;;  %v1158_v35 = vshll.u32 %v5893_v45, 16  ;;  %v1163_v17 = vshll.u32 %v5920_v18, 16 }
 0x1d9   : > { %v848_v15 = vmax.f32 %v768_v3, 0.0  ;;  %v5988_v19 = vsel %vm5817_vm2, %v5909_v0, 0  ;;  %v977_v22 = vshll.u32 %v5924_v23, 16  ;;  %v970_v26 = vshll.u32 %v869_v39, 16  ;;  %4234 = vmatpush3.bf16.msra.mxu1 %v5118_v4  ;;  %v5124_v0 = vld [vmem:[#allocation8 + $0x18] sm:$0xff]  }
 0x1da   : > { %4634 = vmatpush3.bf16.msra.mxu0 %v5101_v44  ;;  %v874_v27 = vpack.c.bf16 %v850_v11, %v849_v61  ;;  %v1405_v33 = vrot.slane %v5956_v54, 1  ;;  %v1156_v36 = vshrl.u32 %v5893_v45, 16  ;;  %v1160_v18 = vrot.slane %v1158_v35, 1  ;;  %4235 = vmatprep.subr.bf16.mxu1 %v5123_v14  ;;  %v5128_v35 = vld [vmem:[#allocation8 + $0x20] sm:$0xff]  }
 0x1db   : > { %4635 = vmatprep.subr.bf16.mxu0 %v5102_v25  ;;  %v5992_v34 = vpack.c.bf16 %v848_v15, %v847_v63  ;;  %v1406_v38 = vrot.slane %v5988_v19, 1  ;;  %v979_v44 = vor.u32 %v977_v22, %v5977_v31  ;;  %v972_v2 = vor.u32 %v970_v26, %v5979_v10  ;;  %v5104_v15 = vld [vmem:[#allocation8 + $0xb8] sm:$0xff]  }
 0x1dc   : > { %v1002_v23 = vshrl.u32 %v874_v27, 16  ;;  %v6001_v39 = vsel %vm5817_vm2, %v5907_v20, 0  ;;  %v1161_v49 = vor.u32 %v1160_v18, %v1156_v36  ;;  %v1165_v57 = vrot.slane %v1163_v17, 1 }
 0x1dd   : > { %v995_v46 = vshrl.u32 %v5992_v34, 16  ;;  %v6005_v21 = vsel %vm1389_vm3, %v1405_v33, %v1406_v38  ;;  %v1005_v61 = vshll.u32 %v874_v27, 16  ;;  %v1408_v63 = vrot.slane %v5975_v7, 1  ;;  %4236 = vmatpush3.bf16.msra.mxu1 %v5124_v0 }
 0x1de   : > { %4636 = vmatpush3.bf16.msra.mxu0 %v5102_v25  ;;  %4601 = vmatprep.mubr.bf16.mxu0 %v6005_v21  ;;  %v1409_v3 = vrot.slane %v6001_v39, 1  ;;  %v789_v20 = vadd.f32 %v5846_v59, %v5795_v52  ;;  %v6012_v4 = vrot.slane %v1002_v23, 7  ;;  %v6015_v11 = vsel %vm1118_vm4, %v1161_v49, %v1165_v57  ;;  %v5132_v57 = vld [vmem:[#allocation8 + $0x28] sm:$0xff]  }
 0x1df   : > { %4637 = vmatprep.subr.bf16.mxu0 %v5103_v32  ;;  %v781_v14 = vadd.f32 %v5795_v52, %v5850_v1  ;;  %v792_v25 = vadd.f32 %v5858_v8, %v5795_v52  ;;  %v6023_v17 = vsel %vm5817_vm2, 0, %v972_v2  ;;  %1751 = vmatprep.mubr.bf16.mxu1 %v6015_v11  ;;  %v784_v26 = vadd.f32 %v5795_v52, %v5867_v13  ;;  %v5130_v1 = vld [vmem:[#allocation8 + $0x68] sm:$0xff]  }
 0x1e0   : > { %v6027_v59 = vsel %vm1389_vm3, %v1408_v63, %v1409_v3  ;;  %v853_v22 = vmax.f32 %v789_v20, 0.0  ;;  %4237 = vmatprep.subr.bf16.mxu1 %v5127_v41  ;;  %v6031_v27 = vrot.slane %v995_v46, 7  ;;  %v998_v8 = vshll.u32 %v5992_v34, 16  ;;  %1752 = vmatmul.mubr.bf16.gmra.mrb[28].mxu1 %v5893_v45 }
 0x1e1   : > { %4602 = vmatmul.mubr.bf16.gmra.mrb[24].mxu0 %v6027_v59  ;;  %v851_v33 = vmax.f32 %v781_v14, 0.0  ;;  %v854_v36 = vmax.f32 %v792_v25, 0.0  ;;  %v6038_v18 = vsel %vm5817_vm2, 0, %v979_v44  ;;  %v852_v38 = vmax.f32 %v784_v26, 0.0  ;;  %v5107_v44 = vld [vmem:[#allocation8 + $0x1c0] sm:$0xff]   ;;  %4238 = vmatpush3.bf16.msra.mxu1 %v5128_v35  ;;  %v5133_v26 = vld [vmem:[#allocation8 + $0x70] sm:$0xff]  }
 0x1e2   : > { %v1170_v0 = vshll.u32 %v5885_v50, 16  ;;  %v1175_v13 = vshll.u32 %v5933_v9, 16  ;;  %4638 = vmatpush3.bf16.msra.mxu0 %v5103_v32  ;;  %v1007_v2 = vor.u32 %v1005_v61, %v6012_v4  ;;  %v6048_v34 = vsel %vm5817_vm2, %v5979_v10, 0  ;;  %4239 = vmatprep.subr.bf16.mxu1 %v5130_v1 }
 0x1e3   : > { %v6043_v23 = vpack.c.bf16 %v854_v36, %v853_v22  ;;  %v1411_v41 = vrot.slane %v6023_v17, 1  ;;  %4639 = vmatprep.subr.bf16.mxu0 %v5104_v15  ;;  %v6051_v46 = vpack.c.bf16 %v852_v38, %v851_v33  ;;  %v1168_v49 = vshrl.u32 %v5885_v50, 16  ;;  %v5134_v36 = vld [vmem:[#allocation8 + $0x30] sm:$0xff]  }
 0x1e4   : > { %v1172_v9 = vrot.slane %v1170_v0, 1  ;;  %v1412_v32 = vrot.slane %v6048_v34, 1  ;;  %v6058_v61 = vsel %vm5817_vm2, 0, %v5927_v29  ;;  %v1000_v10 = vor.u32 %v998_v8, %v6031_v27 }
 0x1e5   : > { %v6064_v63 = vsel %vm5817_vm2, %v5977_v31, 0  ;;  %v1414_v3 = vrot.slane %v6038_v18, 1  ;;  %v6070_v20 = vsel %vm5817_vm2, 0, %v5959_v55  ;;  %v1177_v25 = vrot.slane %v1175_v13, 1  ;;  %4240 = vmatpush3.bf16.msra.mxu1 %v5132_v57 }
 0x1e6   : > { %v1173_v14 = vor.u32 %v1172_v9, %v1168_v49  ;;  %v6073_v35 = vsel %vm1389_vm3, %v1411_v41, %v1412_v32  ;;  %4640 = vmatpush3.bf16.msra.mxu0 %v5104_v15  ;;  %v1009_v29 = vshrl.u32 %v6051_v46, 16  ;;  %v1415_v31 = vrot.slane %v6064_v63, 1  ;;  %4241 = vmatprep.subr.bf16.mxu1 %v5133_v26 }
 0x1e7   : > { %4605 = vmatprep.mubr.bf16.mxu0 %v6073_v35  ;;  %v6081_v22 = vsel %vm5817_vm2, %v5880_v37, 0  ;;  %v1417_v55 = vrot.slane %v6070_v20, 1  ;;  %4365 = vmatprep.subr.bf16.mxu0 %v5107_v44  ;;  %v6086_v1 = vsel %vm5817_vm2, 0, %v1007_v2  ;;  %v805_v33 = vadd.f32 %v5889_v42, %v5795_v52  ;;  %v5136_v2 = vld [vmem:[#allocation8 + $0x78] sm:$0xff]  }
 0x1e8   : > { %v6089_v15 = vsel %vm1118_vm4, %v1173_v14, %v1177_v25  ;;  %v1418_v8 = vrot.slane %v6081_v22, 1  ;;  %v6096_v37 = vsel %vm5817_vm2, 0, %v1000_v10  ;;  %v6100_v38 = vsel %vm1389_vm3, %v1414_v3, %v1415_v31  ;;  %v5137_v25 = vld [vmem:[#allocation8 + $0x38] sm:$0xff]  }
 0x1e9   : > { %1759 = vmatprep.mubr.bf16.mxu1 %v6089_v15  ;;  %v797_v0 = vadd.f32 %v5795_v52, %v5897_v53  ;;  %v808_v13 = vadd.f32 %v5905_v62, %v5795_v52  ;;  %v1016_v42 = vshrl.u32 %v6043_v23, 16  ;;  %4606 = vmatmul.mubr.bf16.gmra.mrb[28].mxu0 %v6100_v38  ;;  %v857_v44 = vmax.f32 %v805_v33, 0.0 }
 0x1ea   : > { %v6109_v41 = vsel %vm1389_vm3, %v1417_v55, %v1418_v8  ;;  %1760 = vmatmul.mubr.bf16.gmra.mrb[32].mxu1 %v5885_v50  ;;  %v800_v49 = vadd.f32 %v5795_v52, %v5912_v5  ;;  %v1011_v9 = vrot.slane %v1009_v29, 7  ;;  %v1012_v53 = vshll.u32 %v6051_v46, 16 }
 0x1eb   : > { %4609 = vmatprep.mubr.bf16.mxu0 %v6109_v41  ;;  %v855_v62 = vmax.f32 %v797_v0, 0.0  ;;  %v858_v32 = vmax.f32 %v808_v13, 0.0  ;;  %v1019_v57 = vshll.u32 %v6043_v23, 16  ;;  %v1182_v3 = vshll.u32 %v5956_v54, 16  ;;  %4242 = vmatpush3.bf16.msra.mxu1 %v5134_v36 }
 0x1ec   : > { %v856_v10 = vmax.f32 %v800_v49, 0.0  ;;  %v1187_v14 = vshll.u32 %v5988_v19, 16  ;;  %v6124_v5 = vsel %vm5817_vm2, %v5878_v30, 0  ;;  %v1420_v46 = vrot.slane %v6058_v61, 1  ;;  %4243 = vmatprep.subr.bf16.mxu1 %v5136_v2 }
 0x1ed   : > { %v6119_v31 = vpack.c.bf16 %v858_v32, %v857_v44  ;;  %v6130_v23 = vsel %vm5817_vm2, %v6031_v27, 0  ;;  %v1180_v19 = vshrl.u32 %v5956_v54, 16  ;;  %v1184_v55 = vrot.slane %v1182_v3, 1 }
 0x1ee   : > { %v877_v29 = vpack.c.bf16 %v856_v10, %v855_v62  ;;  %v1421_v26 = vrot.slane %v6124_v5, 1  ;;  %v1018_v8 = vrot.slane %v1016_v42, 7  ;;  %v1014_v33 = vor.u32 %v1012_v53, %v1011_v9 }
 0x1ef   : > { %v1423_v36 = vrot.slane %v6096_v37, 1  ;;  %v1424_v30 = vrot.slane %v6130_v23, 1  ;;  %v1185_v44 = vor.u32 %v1184_v55, %v1180_v19  ;;  %v1189_v49 = vrot.slane %v1187_v14, 1  ;;  %4244 = vmatpush3.bf16.msra.mxu1 %v5137_v25 }
 0x1f0   : > { %v1023_v0 = vshrl.u32 %v877_v29, 16  ;;  %v1026_v13 = vshll.u32 %v877_v29, 16  ;;  %v6137_v27 = vsel %vm1389_vm3, %v1420_v46, %v1421_v26  ;;  %v821_v62 = vadd.f32 %v5941_v24, %v5795_v52 }
 0x1f1   : > { %v6140_v2 = vsel %vm1389_vm3, %v1423_v36, %v1424_v30  ;;  %v813_v42 = vadd.f32 %v5795_v52, %v5952_v48  ;;  %v6147_v32 = vsel %vm1118_vm4, %v1185_v44, %v1189_v49  ;;  %4610 = vmatmul.mubr.bf16.gmra.mrb[32].mxu0 %v6137_v27  ;;  %v824_v10 = vadd.f32 %v5964_v58, %v5795_v52 }
 0x1f2   : > { %v1025_v53 = vrot.slane %v1023_v0, 7  ;;  %v816_v3 = vadd.f32 %v5795_v52, %v5971_v51  ;;  %v1021_v14 = vor.u32 %v1019_v57, %v1018_v8  ;;  %v6156_v25 = vsel %vm5817_vm2, 0, %v1014_v33  ;;  %1767 = vmatprep.mubr.bf16.mxu1 %v6147_v32  ;;  %4613 = vmatprep.mubr.bf16.mxu0 %v6140_v2 }
 0x1f3   : > { %v861_v24 = vmax.f32 %v821_v62, 0.0  ;;  %v859_v48 = vmax.f32 %v813_v42, 0.0  ;;  %v1030_v46 = vshrl.u32 %v6119_v31, 16  ;;  %v862_v29 = vmax.f32 %v824_v10, 0.0  ;;  %1768 = vmatmul.mubr.bf16.gmra.mrb[36].mxu1 %v5956_v54 }
 0x1f4   : > { %v860_v58 = vmax.f32 %v816_v3, 0.0  ;;  %v1194_v19 = vshll.u32 %v5975_v7, 16  ;;  %v1192_v52 = vshrl.u32 %v5975_v7, 16  ;;  %v1199_v51 = vshll.u32 %v6001_v39, 16 }
 0x1f5   : > { %v6168_v57 = vsel %vm5817_vm2, %v6012_v4, 0  ;;  %v1426_v55 = vrot.slane %v6086_v1, 1  ;;  %v1028_v26 = vor.u32 %v1026_v13, %v1025_v53  ;;  %v6171_v33 = vpack.c.bf16 %v862_v29, %v861_v24 }
 0x1f6   : > { %v879_v36 = vpack.c.bf16 %v860_v58, %v859_v48  ;;  %v1196_v30 = vrot.slane %v1194_v19, 1  ;;  %v6175_v0 = vsel %vm5817_vm2, 0, %v1021_v14  ;;  %v1427_v44 = vrot.slane %v6168_v57, 1 }
 0x1f7   : > { %6850 = vst [vmem:[#allocation21_spill] sm:$0xff] %v6171_v33  ;;  %v6180_v39 = vsel %vm5817_vm2, %v1011_v9, 0  ;;  %v1429_v4 = vrot.slane %v6156_v25, 1  ;;  %v1033_v49 = vshll.u32 %v6119_v31, 16  ;;  %v1201_v10 = vrot.slane %v1199_v51, 1 }
 0x1f8   : > { %v898_v62 = vmul.bf16 0.0, %v879_v36  ;;  %v1197_v13 = vor.u32 %v1196_v30, %v1192_v52  ;;  %v1430_v42 = vrot.slane %v6180_v39, 1  ;;  %v6186_v3 = vsel %vm1389_vm3, %v1426_v55, %v1427_v44 }
 0x1f9   : > { %v1206_v14 = vshll.u32 %v6023_v17, 16  ;;  %v1211_v24 = vshll.u32 %v6048_v34, 16  ;;  %v1032_v48 = vrot.slane %v1030_v46, 7  ;;  %v6192_v9 = vsel %vm5817_vm2, 0, %v1028_v26  ;;  %4614 = vmatmul.mubr.bf16.gmra.mrb[36].mxu0 %v6186_v3 }
 0x1fa   : > { %v918_v29 = vshrl.u32 %v898_v62, 16  ;;  %v1204_v31 = vshrl.u32 %v6023_v17, 16  ;;  %v921_v58 = vshll.u32 %v898_v62, 16  ;;  %v6197_v19 = vsel %vm1118_vm4, %v1197_v13, %v1201_v10 }
 0x1fb   : > { %v6200_v52 = vsel %vm1389_vm3, %v1429_v4, %v1430_v42  ;;  %v1208_v51 = vrot.slane %v1206_v14, 1  ;;  %1775 = vmatprep.mubr.bf16.mxu1 %v6197_v19  ;;  %v1213_v34 = vrot.slane %v1211_v24, 1  ;;  %v6206_v46 = vsel %vm5817_vm2, %v1018_v8, 0 }
 0x1fc   : > { %v920_v55 = vrot.slane %v918_v29, 7  ;;  %4617 = vmatprep.mubr.bf16.mxu0 %v6200_v52  ;;  %v1432_v26 = vrot.slane %v6175_v0, 1  ;;  %1776 = vmatmul.mubr.bf16.gmra.mrb[40].mxu1 %v5975_v7  ;;  %v1433_v30 = vrot.slane %v6206_v46, 1  ;;  %v6213_v44 = vsel %vm5817_vm2, %v1025_v53, 0 }
 0x1fd   : > { %v1209_v36 = vor.u32 %v1208_v51, %v1204_v31  ;;  %v1435_v4 = vrot.slane %v6192_v9, 1  ;;  %v1035_v62 = vor.u32 %v1033_v49, %v1032_v48  ;;  %v1436_v13 = vrot.slane %v6213_v44, 1 }
 0x1fe   : > { %v923_v42 = vor.u32 %v921_v58, %v920_v55  ;;  %v1218_v10 = vshll.u32 %v6038_v18, 16  ;;  %v1223_v14 = vshll.u32 %v6064_v63, 16  ;;  %v6227_v53 = vsel %vm1389_vm3, %v1432_v26, %v1433_v30 }
 0x1ff   : > { %v6218_v8 = vsel %vm1118_vm4, %v1209_v36, %v1213_v34  ;;  %v6224_v24 = vsel %vm1389_vm3, %v1435_v4, %v1436_v13  ;;  %v1216_v49 = vshrl.u32 %v6038_v18, 16  ;;  %v6232_v31 = vsel %vm5817_vm2, %v1032_v48, 0 }
 0x200   : > { %1783 = vmatprep.mubr.bf16.mxu1 %v6218_v8  ;;  %v1220_v29 = vrot.slane %v1218_v10, 1  ;;  %v6237_v63 = vsel %vm5817_vm2, %v920_v55, 0  ;;  %v1230_v58 = vshll.u32 %v6070_v20, 16  ;;  %v6242_v51 = vsel %vm5817_vm2, 0, %v1035_v62 }
 0x201   : > { %4618 = vmatmul.mubr.bf16.gmra.mrb[40].mxu0 %v6227_v53  ;;  %v6246_v34 = vsel %vm5817_vm2, 0, %v923_v42  ;;  %v1225_v26 = vrot.slane %v1223_v14, 1  ;;  %v1438_v36 = vrot.slane %v6242_v51, 1  ;;  %v1439_v30 = vrot.slane %v6232_v31, 1 }
 0x202   : > { %4621 = vmatprep.mubr.bf16.mxu0 %v6224_v24  ;;  %v1221_v48 = vor.u32 %v1220_v29, %v1216_v49  ;;  %v1390_v55 = vrot.slane %v6246_v34, 1  ;;  %v1391_v4 = vrot.slane %v6237_v63, 1  ;;  %v1228_v13 = vshrl.u32 %v6070_v20, 16 }
 0x203   : > { %v1232_v42 = vrot.slane %v1230_v58, 1  ;;  %v1235_v10 = vshll.u32 %v6081_v22, 16  ;;  %v6262_v49 = vsel %vm1389_vm3, %v1438_v36, %v1439_v30  ;;  %v1242_v33 = vshll.u32 %v6058_v61, 16  ;;  %v5108_v36 = vld [vmem:[#allocation8 + $0x180] sm:$0xff]   ;;  %v5109_v30 = vld [vmem:[#allocation8 + $0x1c8] sm:$0xff]  }
 0x204   : > { %1784 = vmatmul.mubr.bf16.gmra.mrb[44].mxu1 %v6023_v17  ;;  %v6255_v62 = vsel %vm1118_vm4, %v1221_v48, %v1225_v26  ;;  %v1392_v14 = vsel %vm1389_vm3, %v1390_v55, %v1391_v4  ;;  %v1240_v22 = vshrl.u32 %v6058_v61, 16  ;;  %v1247_v26 = vshll.u32 %v6124_v5, 16 }
 0x205   : > { %1791 = vmatprep.mubr.bf16.mxu1 %v6255_v62  ;;  %v1233_v29 = vor.u32 %v1232_v42, %v1228_v13  ;;  %v1237_v28 = vrot.slane %v1235_v10, 1  ;;  %v1244_v48 = vrot.slane %v1242_v33, 1  ;;  %v1254_v13 = vshll.u32 %v6096_v37, 16  ;;  %v5113_v42 = vld [vmem:[#allocation8 + $0x1d0] sm:$0xff]  }
 0x206   : > { %v1249_v4 = vrot.slane %v1247_v26, 1  ;;  %v1252_v33 = vshrl.u32 %v6096_v37, 16  ;;  %v1266_v26 = vshll.u32 %v6086_v1, 16 }
 0x207   : > { %v6268_v58 = vsel %vm1118_vm4, %v1233_v29, %v1237_v28  ;;  %v1245_v55 = vor.u32 %v1244_v48, %v1240_v22  ;;  %v5110_v28 = vld [vmem:[#allocation8 + $0x188] sm:$0xff]   ;;  %v1256_v10 = vrot.slane %v1254_v13, 1  ;;  %v5115_v29 = vld [vmem:[#allocation8 + $0x1d8] sm:$0xff]   ;;  %v1271_v13 = vshll.u32 %v6168_v57, 16 }
 0x209   : > { %4622 = vmatmul.mubr.bf16.gmra.mrb[44].mxu0 %v6262_v49  ;;  %v6278_v5 = vsel %vm1118_vm4, %v1245_v55, %v1249_v4  ;;  %v1257_v22 = vor.u32 %v1256_v10, %v1252_v33  ;;  %v1264_v55 = vshrl.u32 %v6086_v1, 16  ;;  %v1268_v4 = vrot.slane %v1266_v26, 1 }
 0x20a   : > { %4641 = vmatprep.mubr.bf16.mxu0 %v1392_v14  ;;  %v1259_v14 = vshll.u32 %v6130_v23, 16  ;;  %v1273_v10 = vrot.slane %v1271_v13, 1  ;;  %v1283_v26 = vshll.u32 %v6180_v39, 16  ;;  %v1290_v13 = vshll.u32 %v6175_v0, 16 }
 0x20b   : > { %v1269_v33 = vor.u32 %v1268_v4, %v1264_v55 }
 0x20c   : > { %1792 = vmatmul.mubr.bf16.gmra.mrb[48].mxu1 %v6038_v18  ;;  %v1261_v48 = vrot.slane %v1259_v14, 1  ;;  %v1278_v14 = vshll.u32 %v6156_v25, 16  ;;  %v1285_v4 = vrot.slane %v1283_v26, 1  ;;  %v1300_v26 = vshrl.u32 %v6192_v9, 16 }
 0x20d   : > { %1799 = vmatprep.mubr.bf16.mxu1 %v6268_v58  ;;  %v6298_v57 = vsel %vm1118_vm4, %v1269_v33, %v1273_v10  ;;  %v1288_v33 = vshrl.u32 %v6175_v0, 16  ;;  %v1292_v10 = vrot.slane %v1290_v13, 1 }
 0x20e   : > { %v6288_v23 = vsel %vm1118_vm4, %v1257_v22, %v1261_v48  ;;  %v1276_v22 = vshrl.u32 %v6156_v25, 16  ;;  %v1280_v48 = vrot.slane %v1278_v14, 1  ;;  %v1295_v14 = vshll.u32 %v6206_v46, 16 }
 0x210   : > { %v1281_v55 = vor.u32 %v1280_v48, %v1276_v22  ;;  %v1302_v22 = vshll.u32 %v6192_v9, 16 }
 0x211   : > { %4642 = vmatmul.mubr.bf16.vlgmr.msra.gmra.mrb[16].mxu0 %v5856_v6  ;;  %v5114_v6 = vld [vmem:[#allocation8 + $0x190] sm:$0xff]  }
 0x212   : > { %4366 = vmatpush3.bf16.msra.mxu0 %v5108_v36  ;;  %4645 = vmatprep.mubr.bf16.mxu0 %v5865_v12  ;;  %v5116_v36 = vld [vmem:[#allocation8 + $0x198] sm:$0xff]   ;;  %v6308_v39 = vsel %vm1118_vm4, %v1281_v55, %v1285_v4  ;;  %v1304_v46 = vrot.slane %v1302_v22, 1  ;;  %v1314_v4 = vshll.u32 %v6242_v51, 16  ;;  %v1120_v22 = vshrl.u32 %v6246_v34, 16 }
 0x213   : > { %4367 = vmatprep.subr.bf16.mxu0 %v5109_v30  ;;  %v5119_v30 = vld [vmem:[#allocation8 + $0x1e0] sm:$0xff]  }
 0x214   : > { %1800 = vmatmul.mubr.bf16.gmra.mrb[52].mxu1 %v6070_v20 }
 0x215   : > { %1807 = vmatprep.mubr.bf16.mxu1 %v6278_v5 }
 0x216   : > { %4368 = vmatpush3.bf16.msra.mxu0 %v5110_v28  ;;  %v5120_v28 = vld [vmem:[#allocation8 + $0x1a0] sm:$0xff]  }
 0x217   : > { %4369 = vmatprep.subr.bf16.mxu0 %v5113_v42  ;;  %v5121_v42 = vld [vmem:[#allocation8 + $0x1e8] sm:$0xff]  }
 0x219   : > { %4646 = vmatmul.mubr.bf16.gmra.mrb[20].mxu0 %v5945_v40 }
 0x21a   : > { %4649 = vmatprep.mubr.bf16.mxu0 %v5967_v60  ;;  %4370 = vmatpush3.bf16.msra.mxu0 %v5114_v6  ;;  %v5122_v6 = vld [vmem:[#allocation8 + $0x1a8] sm:$0xff]  }
 0x21b   : > { %4371 = vmatprep.subr.bf16.mxu0 %v5115_v29  ;;  %v5125_v29 = vld [vmem:[#allocation8 + $0x1f0] sm:$0xff]  }
 0x21c   : > { %1808 = vmatmul.mubr.bf16.gmra.mrb[56].mxu1 %v6058_v61 }
 0x21d   : > { %1815 = vmatprep.mubr.bf16.mxu1 %v6288_v23 }
 0x21e   : > { %4372 = vmatpush3.bf16.msra.mxu0 %v5116_v36  ;;  %v5126_v36 = vld [vmem:[#allocation8 + $0x1b0] sm:$0xff]  }
 0x21f   : > { %4373 = vmatprep.subr.bf16.mxu0 %v5119_v30  ;;  %v5129_v30 = vld [vmem:[#allocation8 + $0x1f8] sm:$0xff]  }
 0x221   : > { %4650 = vmatmul.mubr.bf16.gmra.mrb[24].mxu0 %v6005_v21 }
 0x222   : > { %4653 = vmatprep.mubr.bf16.mxu0 %v6027_v59  ;;  %4374 = vmatpush3.bf16.msra.mxu0 %v5120_v28  ;;  %v5131_v28 = vld [vmem:[#allocation8 + $0x1b8] sm:$0xff]  }
 0x223   : > { %4375 = vmatprep.subr.bf16.mxu0 %v5121_v42  ;;  %v5135_v42 = vld [vmem:[#allocation8 + $0x200] sm:$0xff]  }
 0x224   : > { %1816 = vmatmul.mubr.bf16.gmra.mrb[60].mxu1 %v6096_v37 }
 0x225   : > { %1823 = vmatprep.mubr.bf16.mxu1 %v6298_v57 }
 0x226   : > { %4376 = vmatpush3.bf16.msra.mxu0 %v5122_v6  ;;  %v1293_v6 = vor.u32 %v1292_v10, %v1288_v33  ;;  %v1316_v33 = vrot.slane %v1314_v4, 1  ;;  %v5140_v4 = vld [vmem:[#allocation8 + $0x218] sm:$0xff]  }
 0x227   : > { %4377 = vmatprep.subr.bf16.mxu0 %v5125_v29  ;;  %v1297_v29 = vrot.slane %v1295_v14, 1 }
 0x229   : > { %4654 = vmatmul.mubr.bf16.gmra.mrb[28].mxu0 %v6073_v35  ;;  %v6318_v48 = vsel %vm1118_vm4, %v1293_v6, %v1297_v29  ;;  %v1122_v6 = vshll.u32 %v6246_v34, 16 }
 0x22a   : > { %4657 = vmatprep.mubr.bf16.mxu0 %v6100_v38  ;;  %4378 = vmatpush3.bf16.msra.mxu0 %v5126_v36  ;;  %v1307_v36 = vshll.u32 %v6213_v44, 16  ;;  %v1319_v44 = vshll.u32 %v6232_v31, 16  ;;  %v1127_v31 = vshll.u32 %v6237_v63, 16  ;;  %v5139_v63 = vld [vmem:[#allocation8 + $0x210] sm:$0xff]  }
 0x22b   : > { %4379 = vmatprep.subr.bf16.mxu0 %v5129_v30  ;;  %v1305_v30 = vor.u32 %v1304_v46, %v1300_v26  ;;  %v1124_v26 = vrot.slane %v1122_v6, 1 }
 0x22c   : > { %1824 = vmatmul.mubr.bf16.gmra.mrb[64].mxu1 %v6086_v1  ;;  %v1309_v55 = vrot.slane %v1307_v36, 1  ;;  %v1321_v14 = vrot.slane %v1319_v44, 1  ;;  %v1129_v36 = vrot.slane %v1127_v31, 1 }
 0x22d   : > { %1831 = vmatprep.mubr.bf16.mxu1 %v6308_v39  ;;  %v1125_v46 = vor.u32 %v1124_v26, %v1120_v22 }
 0x22e   : > { %4380 = vmatpush3.bf16.msra.mxu0 %v5131_v28  ;;  %v6328_v13 = vsel %vm1118_vm4, %v1305_v30, %v1309_v55  ;;  %v1312_v28 = vshrl.u32 %v6242_v51, 16  ;;  %v5138_v55 = vld [vmem:[#allocation8 + $0x208] sm:$0xff]  }
 0x22f   : > { %4673 = vmatprep.subr.bf16.mxu0 %v5135_v42  ;;  %v1130_v30 = vsel %vm1118_vm4, %v1125_v46, %v1129_v36 }
 0x230   : > { %v1317_v10 = vor.u32 %v1316_v33, %v1312_v28  ;;  %v5141_v28 = vld [vmem:[#allocation8 + $0x220] sm:$0xff]  }
 0x231   : > { %4658 = vmatmul.mubr.bf16.gmra.mrb[32].mxu0 %v6109_v41 }
 0x232   : > { %4661 = vmatprep.mubr.bf16.mxu0 %v6137_v27  ;;  %v6338_v29 = vsel %vm1118_vm4, %v1317_v10, %v1321_v14 }
 0x234   : > { %1832 = vmatmul.mubr.bf16.gmra.mrb[68].mxu1 %v6156_v25 }
 0x235   : > { %1839 = vmatprep.mubr.bf16.mxu1 %v6318_v48 }
 0x239   : > { %4662 = vmatmul.mubr.bf16.gmra.mrb[36].mxu0 %v6140_v2 }
 0x23a   : > { %4665 = vmatprep.mubr.bf16.mxu0 %v6186_v3 }
 0x23c   : > { %1840 = vmatmul.mubr.bf16.gmra.mrb[72].mxu1 %v6175_v0 }
 0x23d   : > { %1847 = vmatprep.mubr.bf16.mxu1 %v6328_v13 }
 0x241   : > { %4666 = vmatmul.mubr.bf16.gmra.mrb[40].mxu0 %v6200_v52 }
 0x242   : > { %4669 = vmatprep.mubr.bf16.mxu0 %v6227_v53 }
 0x244   : > { %1848 = vmatmul.mubr.bf16.gmra.mrb[76].mxu1 %v6192_v9 }
 0x245   : > { %1855 = vmatprep.mubr.bf16.mxu1 %v6338_v29 }
 0x249   : > { %4670 = vmatmul.mubr.bf16.gmra.mrb[44].mxu0 %v6224_v24 }
 0x24a   : > { %2716 = vmatprep.mubr.bf16.mxu0 %v5939_v16 }
 0x24c   : > { %1856 = vmatmul.mubr.bf16.gmra.mrb[80].mxu1 %v6242_v51 }
 0x24d   : > { %2201 = vmatprep.mubr.bf16.mxu1 %v1130_v30 }
 0x251   : > { %2717 = vmatmul.mubr.bf16.vlgmr.msra.gmra.mrb[48].mxu0 %v5831_v43 }
 0x252   : > { %4674 = vmatpush3.bf16.msra.mxu0 %v5135_v42  ;;  %2724 = vmatprep.mubr.bf16.mxu0 %v6015_v11  ;;  %v5142_v42 = vld [vmem:[#allocation8 + $0x228] sm:$0xff]  }
 0x253   : > { %4675 = vmatprep.subr.bf16.mxu0 %v5138_v55 }
 0x254   : > { %2202 = vmatmul.mubr.bf16.vlgmr.msra.gmra.mrb[84].mxu1 %v6246_v34  ;;  %v5144_v34 = vld [vmem:[#allocation8 + $0x238] sm:$0xff]  }
 0x255   : > { %2209 = vmatprep.mubr.bf16.mxu1 %v5901_v56  ;;  %v5143_v56 = vld [vmem:[#allocation8 + $0x230] sm:$0xff]  }
 0x256   : > { %4676 = vmatpush3.bf16.msra.mxu0 %v5138_v55 }
 0x257   : > { %4677 = vmatprep.subr.bf16.mxu0 %v5139_v63 }
 0x259   : > { %2725 = vmatmul.mubr.bf16.gmra.mrb[52].mxu0 %v5893_v45 }
 0x25a   : > { %2732 = vmatprep.mubr.bf16.mxu0 %v6089_v15  ;;  %4678 = vmatpush3.bf16.msra.mxu0 %v5139_v63 }
 0x25b   : > { %4679 = vmatprep.subr.bf16.mxu0 %v5140_v4 }
 0x25c   : > { %2210 = vmatmul.mubr.bf16.gmra.mrb[88].mxu1 %v5840_v47 }
 0x25d   : > { %2217 = vmatprep.mubr.bf16.mxu1 %v5939_v16 }
 0x25e   : > { %4680 = vmatpush3.bf16.msra.mxu0 %v5140_v4 }
 0x25f   : > { %4681 = vmatprep.subr.bf16.mxu0 %v5141_v28 }
 0x261   : > { %2733 = vmatmul.mubr.bf16.gmra.mrb[56].mxu0 %v5885_v50 }
 0x262   : > { %2740 = vmatprep.mubr.bf16.mxu0 %v6147_v32  ;;  %4682 = vmatpush3.bf16.msra.mxu0 %v5141_v28 }
 0x263   : > { %4683 = vmatprep.subr.bf16.mxu0 %v5142_v42 }
 0x264   : > { %2218 = vmatmul.mubr.bf16.gmra.mrb[92].mxu1 %v5831_v43  ;;  %v6851_v43 = vld [vmem:[#allocation21_spill] sm:$0xff] }
 0x265   : > { %2225 = vmatprep.mubr.bf16.mxu1 %v6015_v11  ;;  %v916_v47 = vmul.bf16 0.0, %v6851_v43 }
 0x266   : > { %4684 = vmatpush3.bf16.msra.mxu0 %v5142_v42 }
 0x267   : > { %4685 = vmatprep.subr.bf16.mxu0 %v5143_v56  ;;  %v1037_v11 = vshrl.u32 %v916_v47, 16 }
 0x269   : > { %2741 = vmatmul.mubr.bf16.gmra.mrb[60].mxu0 %v5956_v54 }
 0x26a   : > { %2748 = vmatprep.mubr.bf16.mxu0 %v6197_v19  ;;  %4686 = vmatpush3.bf16.msra.mxu0 %v5143_v56  ;;  %v5146_v56 = vld [vmem:[#allocation10 + $0x8] sm:$0xff]  }
 0x26b   : > { %4687 = vmatprep.subr.bf16.mxu0 %v5144_v34 }
 0x26c   : > { %2226 = vmatmul.mubr.bf16.gmra.mrb[96].mxu1 %v5893_v45 }
 0x26d   : > { %2233 = vmatprep.mubr.bf16.mxu1 %v6089_v15 }
 0x26e   : > { %4688 = vmatpush3.bf16.msra.mxu0 %v5144_v34 }
 0x271   : > { %2749 = vmatmul.mubr.bf16.gmra.mrb[64].mxu0 %v5975_v7 }
 0x272   : > { %2756 = vmatprep.mubr.bf16.mxu0 %v6218_v8 }
 0x274   : > { %2234 = vmatmul.mubr.bf16.gmra.mrb[100].mxu1 %v5885_v50 }
 0x275   : > { %2241 = vmatprep.mubr.bf16.mxu1 %v6147_v32 }
 0x279   : > { %2757 = vmatmul.mubr.bf16.gmra.mrb[68].mxu0 %v6023_v17 }
 0x27a   : > { %2764 = vmatprep.mubr.bf16.mxu0 %v6255_v62 }
 0x27c   : > { %2242 = vmatmul.mubr.bf16.gmra.mrb[104].mxu1 %v5956_v54 }
 0x27d   : > { %2249 = vmatprep.mubr.bf16.mxu1 %v6197_v19 }
 0x281   : > { %2765 = vmatmul.mubr.bf16.gmra.mrb[72].mxu0 %v6038_v18 }
 0x282   : > { %2772 = vmatprep.mubr.bf16.mxu0 %v6268_v58 }
 0x284   : > { %2250 = vmatmul.mubr.bf16.gmra.mrb[108].mxu1 %v5975_v7 }
 0x285   : > { %2257 = vmatprep.mubr.bf16.mxu1 %v6218_v8 }
 0x289   : > { %2773 = vmatmul.mubr.bf16.gmra.mrb[76].mxu0 %v6070_v20 }
 0x28a   : > { %2780 = vmatprep.mubr.bf16.mxu0 %v6278_v5 }
 0x28c   : > { %2258 = vmatmul.mubr.bf16.gmra.mrb[112].mxu1 %v6023_v17 }
 0x28d   : > { %2265 = vmatprep.mubr.bf16.mxu1 %v6255_v62 }
 0x291   : > { %2781 = vmatmul.mubr.bf16.gmra.mrb[80].mxu0 %v6058_v61 }
 0x292   : > { %2788 = vmatprep.mubr.bf16.mxu0 %v6288_v23 }
 0x294   : > { %2266 = vmatmul.mubr.bf16.gmra.mrb[116].mxu1 %v6038_v18  ;;  %v1039_v18 = vrot.slane %v1037_v11, 7 }
 0x295   : > { %2273 = vmatprep.mubr.bf16.mxu1 %v6268_v58 }
 0x296   : > { %v6417_v22 = vsel %vm5817_vm2, %v1039_v18, 0 }
 0x297   : > { %v1331_v46 = vshll.u32 %v6417_v22, 16 }
 0x299   : > { %2789 = vmatmul.mubr.bf16.gmra.mrb[84].mxu0 %v6096_v37  ;;  %v1333_v55 = vrot.slane %v1331_v46, 1 }
 0x29a   : > { %2796 = vmatprep.mubr.bf16.mxu0 %v6298_v57 }
 0x29c   : > { %2274 = vmatmul.mubr.bf16.gmra.mrb[120].mxu1 %v6070_v20  ;;  %v1040_v20 = vshll.u32 %v916_v47, 16 }
 0x29d   : > { %2281 = vmatprep.mubr.bf16.mxu1 %v6278_v5  ;;  %v5145_v5 = vld [vmem:[#allocation10] sm:$0xff]  }
 0x29e   : > { %v1042_v62 = vor.u32 %v1040_v20, %v1039_v18  ;;  %4721 = vmatprep.subr.bf16.mxu1 %v5145_v5 }
 0x29f   : > { %4722 = vmatpush3.bf16.msra.mxu1 %v5145_v5 }
 0x2a0   : > { %v6407_v33 = vsel %vm5817_vm2, 0, %v1042_v62  ;;  %4723 = vmatprep.subr.bf16.mxu1 %v5146_v56 }
 0x2a1   : > { %2797 = vmatmul.mubr.bf16.gmra.mrb[88].mxu0 %v6086_v1  ;;  %v1326_v14 = vshll.u32 %v6407_v33, 16  ;;  %v1324_v31 = vshrl.u32 %v6407_v33, 16 }
 0x2a2   : > { %2804 = vmatprep.mubr.bf16.mxu0 %v6308_v39 }
 0x2a3   : > { %v4109_v50 = vpop.f32.mrb[20].mxu1  ;;  %4724 = vmatpush3.bf16.msra.mxu1 %v5146_v56 }
 0x2a4   : > { %v4110_v45 = vpop.f32.mrb[21].mxu1  ;;  %2282 = vmatmul.mubr.bf16.gmra.mrb[124].mxu1 %v6058_v61 }
 0x2a5   : > { %v6391_v16 = vadd.f32 %v4110_v45, %v4109_v50  ;;  %v4112_v54 = vpop.f32.mrb[22].mxu1  ;;  %2289 = vmatprep.mubr.bf16.mxu1 %v6288_v23 }
 0x2a6   : > { %v4113_v7 = vpop.f32.mrb[23].mxu1 }
 0x2a7   : > { %v6394_v17 = vadd.f32 %v4113_v7, %v4112_v54  ;;  %v5147_v54 = vld [vmem:[#allocation10 + $0x10] sm:$0xff]  }
 0x2a8   : > { %4725 = vmatprep.subr.bf16.mxu1 %v5147_v54 }
 0x2a9   : > { %2805 = vmatmul.mubr.bf16.gmra.mrb[92].mxu0 %v6156_v25  ;;  %4726 = vmatpush3.bf16.msra.mxu1 %v5147_v54 }
 0x2aa   : > { %2812 = vmatprep.mubr.bf16.mxu0 %v6318_v48 }
 0x2ab   : > { %v4115_v15 = vpop.f32.mrb[24].mxu1 }
 0x2ac   : > { %v4116_v32 = vpop.f32.mrb[25].mxu1  ;;  %2290 = vmatmul.mubr.bf16.gmra.mrb[128].mxu1 %v6096_v37 }
 0x2ad   : > { %v6399_v61 = vadd.f32 %v4116_v32, %v4115_v15  ;;  %v4118_v19 = vpop.f32.mrb[26].mxu1  ;;  %2297 = vmatprep.mubr.bf16.mxu1 %v6298_v57 }
 0x2ae   : > { %v4119_v8 = vpop.f32.mrb[27].mxu1 }
 0x2af   : > { %v6402_v58 = vadd.f32 %v4119_v8, %v4118_v19 }
 0x2b1   : > { %2813 = vmatmul.mubr.bf16.gmra.mrb[96].mxu0 %v6175_v0 }
 0x2b2   : > { %2820 = vmatprep.mubr.bf16.mxu0 %v6328_v13 }
 0x2b3   : > { %v4121_v37 = vpop.f32.mrb[28].mxu1 }
 0x2b4   : > { %2298 = vmatmul.mubr.bf16.gmra.mrb[132].mxu1 %v6086_v1  ;;  %v4122_v44 = vpop.f32.mrb[29].mxu1  ;;  %v1328_v1 = vrot.slane %v1326_v14, 1 }
 0x2b5   : > { %2305 = vmatprep.mubr.bf16.mxu1 %v6308_v39  ;;  %v6412_v57 = vadd.f32 %v4122_v44, %v4121_v37  ;;  %v4124_v10 = vpop.f32.mrb[30].mxu1 }
 0x2b6   : > { %v4125_v6 = vpop.f32.mrb[31].mxu1  ;;  %v1329_v30 = vor.u32 %v1328_v1, %v1324_v31 }
 0x2b7   : > { %v6419_v26 = vadd.f32 %v4125_v6, %v4124_v10 }
 0x2b8   : > { %v1334_v34 = vsel %vm1118_vm4, %v1329_v30, %v1333_v55 }
 0x2b9   : > { %2821 = vmatmul.mubr.bf16.gmra.mrb[100].mxu0 %v6192_v9 }
 0x2ba   : > { %2828 = vmatprep.mubr.bf16.mxu0 %v6338_v29 }
 0x2bc   : > { %2306 = vmatmul.mubr.bf16.gmra.mrb[136].mxu1 %v6156_v25 }
 0x2bd   : > { %v4127_v39 = vpop.f32.mrb[32].mxu1  ;;  %2313 = vmatprep.mubr.bf16.mxu1 %v6318_v48 }
 0x2be   : > { %v4128_v36 = vpop.f32.mrb[33].mxu1 }
 0x2bf   : > { %v6427_v63 = vadd.f32 %v4128_v36, %v4127_v39  ;;  %v4130_v4 = vpop.f32.mrb[34].mxu1 }
 0x2c0   : > { %v4131_v28 = vpop.f32.mrb[35].mxu1 }
 0x2c1   : > { %v6429_v42 = vadd.f32 %v4131_v28, %v4130_v4  ;;  %2829 = vmatmul.mubr.bf16.gmra.mrb[104].mxu0 %v6242_v51 }
 0x2c2   : > { %2836 = vmatprep.mubr.bf16.mxu0 %v1334_v34 }
 0x2c4   : > { %2314 = vmatmul.mubr.bf16.gmra.mrb[140].mxu1 %v6175_v0 }
 0x2c5   : > { %2321 = vmatprep.mubr.bf16.mxu1 %v6328_v13 }
 0x2c6   : > { %v4133_v25 = vpop.f32.mrb[36].mxu1 }
 0x2c7   : > { %v4134_v48 = vpop.f32.mrb[37].mxu1 }
 0x2c8   : > { %v6435_v29 = vadd.f32 %v4134_v48, %v4133_v25  ;;  %v4136_v43 = vpop.f32.mrb[38].mxu1 }
 0x2c9   : > { %2837 = vmatmul.mubr.bf16.gmra.mrb[108].mxu0 %v6407_v33  ;;  %v4137_v47 = vpop.f32.mrb[39].mxu1 }
 0x2ca   : > { %4689 = vmatprep.mubr.bf16.mxu0 %v5865_v12  ;;  %v6439_v51 = vadd.f32 %v4137_v47, %v4136_v43 }
 0x2cc   : > { %2322 = vmatmul.mubr.bf16.gmra.mrb[144].mxu1 %v6192_v9 }
 0x2cf   : > { %v4139_v50 = vpop.f32.mrb[40].mxu1 }
 0x2d0   : > { %v4140_v45 = vpop.f32.mrb[41].mxu1 }
 0x2d1   : > { %v6442_v0 = vadd.f32 %v4140_v45, %v4139_v50  ;;  %4690 = vmatmul.mubr.bf16.vlgmr.msra.gmra.mrb[16].mxu0 %v5945_v40  ;;  %v4142_v13 = vpop.f32.mrb[42].mxu1 }
 0x2d2   : > { %4693 = vmatprep.mubr.bf16.mxu0 %v5967_v60  ;;  %v4143_v7 = vpop.f32.mrb[43].mxu1  ;;  %v5148_v60 = vld [vmem:[#allocation10 + $0x18] sm:$0xff]  }
 0x2d3   : > { %v6446_v11 = vadd.f32 %v4143_v7, %v4142_v13  ;;  %4727 = vmatprep.subr.bf16.mxu1 %v5148_v60 }
 0x2d4   : > { %4728 = vmatpush3.bf16.msra.mxu1 %v5148_v60 }
 0x2d7   : > { %v4145_v12 = vpop.f32.mrb[44].mxu1 }
 0x2d8   : > { %v4146_v18 = vpop.f32.mrb[45].mxu1 }
 0x2d9   : > { %v6448_v20 = vadd.f32 %v4146_v18, %v4145_v12  ;;  %4694 = vmatmul.mubr.bf16.gmra.mrb[20].mxu0 %v6005_v21  ;;  %v4148_v9 = vpop.f32.mrb[46].mxu1  ;;  %v5151_v12 = vld [vmem:[#allocation10 + $0x30] sm:$0xff]  }
 0x2da   : > { %4697 = vmatprep.mubr.bf16.mxu0 %v6027_v59  ;;  %v4149_v15 = vpop.f32.mrb[47].mxu1 }
 0x2db   : > { %v6452_v32 = vadd.f32 %v4149_v15, %v4148_v9 }
 0x2df   : > { %v4151_v40 = vpop.f32.mrb[48].mxu1 }
 0x2e0   : > { %v4152_v19 = vpop.f32.mrb[49].mxu1 }
 0x2e1   : > { %v6454_v8 = vadd.f32 %v4152_v19, %v4151_v40  ;;  %4698 = vmatmul.mubr.bf16.gmra.mrb[24].mxu0 %v6073_v35  ;;  %v4154_v62 = vpop.f32.mrb[50].mxu1 }
 0x2e2   : > { %4701 = vmatprep.mubr.bf16.mxu0 %v6100_v38  ;;  %v4155_v5 = vpop.f32.mrb[51].mxu1  ;;  %v5149_v38 = vld [vmem:[#allocation10 + $0x20] sm:$0xff]  }
 0x2e3   : > { %v6458_v23 = vadd.f32 %v4155_v5, %v4154_v62  ;;  %4729 = vmatprep.subr.bf16.mxu1 %v5149_v38 }
 0x2e4   : > { %4730 = vmatpush3.bf16.msra.mxu1 %v5149_v38 }
 0x2e7   : > { %v4157_v21 = vpop.f32.mrb[52].mxu1 }
 0x2e8   : > { %v4158_v59 = vpop.f32.mrb[53].mxu1 }
 0x2e9   : > { %v6460_v37 = vadd.f32 %v4158_v59, %v4157_v21  ;;  %4702 = vmatmul.mubr.bf16.gmra.mrb[28].mxu0 %v6109_v41  ;;  %v4160_v44 = vpop.f32.mrb[54].mxu1 }
 0x2ea   : > { %4705 = vmatprep.mubr.bf16.mxu0 %v6137_v27  ;;  %v4161_v10 = vpop.f32.mrb[55].mxu1 }
 0x2eb   : > { %v6464_v14 = vadd.f32 %v4161_v10, %v4160_v44  ;;  %v5152_v44 = vld [vmem:[#allocation10 + $0x38] sm:$0xff]  }
 0x2ef   : > { %v4163_v35 = vpop.f32.mrb[56].mxu1 }
 0x2f0   : > { %v4164_v6 = vpop.f32.mrb[57].mxu1 }
 0x2f1   : > { %v6466_v31 = vadd.f32 %v4164_v6, %v4163_v35  ;;  %4706 = vmatmul.mubr.bf16.gmra.mrb[32].mxu0 %v6140_v2  ;;  %v4166_v1 = vpop.f32.mrb[58].mxu1 }
 0x2f2   : > { %4709 = vmatprep.mubr.bf16.mxu0 %v6186_v3  ;;  %v4167_v46 = vpop.f32.mrb[59].mxu1  ;;  %v5150_v3 = vld [vmem:[#allocation10 + $0x28] sm:$0xff]  }
 0x2f3   : > { %v6470_v39 = vadd.f32 %v4167_v46, %v4166_v1  ;;  %4731 = vmatprep.subr.bf16.mxu1 %v5150_v3 }
 0x2f4   : > { %4732 = vmatpush3.bf16.msra.mxu1 %v5150_v3 }
 0x2f5   : > { %4733 = vmatprep.subr.bf16.mxu1 %v5151_v12 }
 0x2f7   : > { %v4169_v41 = vpop.f32.mrb[60].mxu1 }
 0x2f8   : > { %v4170_v27 = vpop.f32.mrb[61].mxu1  ;;  %4734 = vmatpush3.bf16.msra.mxu1 %v5151_v12 }
 0x2f9   : > { %v6472_v36 = vadd.f32 %v4170_v27, %v4169_v41  ;;  %4710 = vmatmul.mubr.bf16.gmra.mrb[36].mxu0 %v6200_v52  ;;  %v4172_v30 = vpop.f32.mrb[62].mxu1  ;;  %v1441_v52 = vrot.slane %v6407_v33, 1  ;;  %4735 = vmatprep.subr.bf16.mxu1 %v5152_v44 }
 0x2fa   : > { %4713 = vmatprep.mubr.bf16.mxu0 %v6227_v53  ;;  %v4173_v55 = vpop.f32.mrb[63].mxu1  ;;  %v1442_v53 = vrot.slane %v6417_v22, 1 }
 0x2fb   : > { %v6476_v4 = vadd.f32 %v4173_v55, %v4172_v30 }
 0x2fc   : > { %v1443_v50 = vsel %vm1389_vm3, %v1441_v52, %v1442_v53  ;;  %4736 = vmatpush3.bf16.msra.mxu1 %v5152_v44 }
 0x2ff   : > { %v4175_v2 = vpop.f32.mrb[64].mxu1 }
 0x300   : > { %v4176_v28 = vpop.f32.mrb[65].mxu1 }
 0x301   : > { %v6478_v56 = vadd.f32 %v4176_v28, %v4175_v2  ;;  %4714 = vmatmul.mubr.bf16.gmra.mrb[40].mxu0 %v6224_v24  ;;  %v4178_v34 = vpop.f32.mrb[66].mxu1 }
 0x302   : > { %4717 = vmatprep.mubr.bf16.mxu0 %v6262_v49  ;;  %v4179_v25 = vpop.f32.mrb[67].mxu1 }
 0x303   : > { %v6482_v48 = vadd.f32 %v4179_v25, %v4178_v34 }
 0x307   : > { %v4181_v43 = vpop.f32.mrb[68].mxu1 }
 0x308   : > { %v4182_v47 = vpop.f32.mrb[69].mxu1 }
 0x309   : > { %v6487_v45 = vadd.f32 %v4182_v47, %v4181_v43  ;;  %4718 = vmatmul.mubr.bf16.gmra.mrb[44].mxu0 %v1443_v50  ;;  %v4184_v24 = vpop.f32.mrb[70].mxu1 }
 0x30a   : > { %v4185_v54 = vpop.f32.mrb[71].mxu1 }
 0x30b   : > { %v6489_v13 = vadd.f32 %v4185_v54, %v4184_v24 }
 0x30f   : > { %v4187_v49 = vpop.f32.mrb[72].mxu1 }
 0x310   : > { %v4188_v7 = vpop.f32.mrb[73].mxu1 }
 0x311   : > { %v6491_v18 = vadd.f32 %v4188_v7, %v4187_v49  ;;  %v4190_v9 = vpop.f32.mrb[74].mxu1 }
 0x312   : > { %v4191_v33 = vpop.f32.mrb[75].mxu1 }
 0x313   : > { %v6493_v22 = vadd.f32 %v4191_v33, %v4190_v9 }
 0x317   : > { %v4193_v15 = vpop.f32.mrb[76].mxu1 }
 0x318   : > { %v4194_v40 = vpop.f32.mrb[77].mxu1 }
 0x319   : > { %v6495_v19 = vadd.f32 %v4194_v40, %v4193_v15  ;;  %v4196_v60 = vpop.f32.mrb[78].mxu1 }
 0x31a   : > { %v4197_v62 = vpop.f32.mrb[79].mxu1 }
 0x31b   : > { %v6497_v5 = vadd.f32 %v4197_v62, %v4196_v60 }
 0x31f   : > { %v4199_v21 = vpop.f32.mrb[80].mxu1 }
 0x320   : > { %v4200_v59 = vpop.f32.mrb[81].mxu1 }
 0x321   : > { %v6499_v10 = vadd.f32 %v4200_v59, %v4199_v21  ;;  %v4202_v35 = vpop.f32.mrb[82].mxu1 }
 0x322   : > { %v4203_v6 = vpop.f32.mrb[83].mxu1 }
 0x323   : > { %v6501_v38 = vadd.f32 %v4203_v6, %v4202_v35 }
 0x324   : > { %v4381_v1 = vpop.f32.mrb[48].mxu0 }
 0x325   : > { %v4382_v46 = vpop.f32.mrb[49].mxu0 }
 0x326   : > { %v4383_v41 = vadd.f32 %v4382_v46, %v4381_v1  ;;  %v4384_v27 = vpop.f32.mrb[50].mxu0 }
 0x327   : > { %v4385_v30 = vpop.f32.mrb[51].mxu0  ;;  %v4245_v55 = vpop.f32.mrb[84].mxu1 }
 0x328   : > { %v4386_v2 = vadd.f32 %v4385_v30, %v4384_v27  ;;  %v4246_v28 = vpop.f32.mrb[85].mxu1 }
 0x329   : > { %v4247_v3 = vadd.f32 %v4246_v28, %v4245_v55  ;;  %v4248_v34 = vpop.f32.mrb[86].mxu1 }
 0x32a   : > { %v4249_v25 = vpop.f32.mrb[87].mxu1 }
 0x32b   : > { %v4788_v52 = vadd.f32 %v4247_v3, %v6391_v16  ;;  %v4250_v53 = vadd.f32 %v4249_v25, %v4248_v34 }
 0x32c   : > { %v4387_v43 = vpop.f32.mrb[52].mxu0 }
 0x32d   : > { %v4794_v47 = vadd.f32 %v4250_v53, %v6394_v17  ;;  %v4388_v50 = vpop.f32.mrb[53].mxu0  ;;  %v6505_v24 = vadd.f32 %v4788_v52, %v4383_v41 }
 0x32e   : > { %v4389_v54 = vadd.f32 %v4388_v50, %v4387_v43  ;;  %v4390_v49 = vpop.f32.mrb[54].mxu0 }
 0x32f   : > { %v4391_v7 = vpop.f32.mrb[55].mxu0  ;;  %v4251_v12 = vpop.f32.mrb[88].mxu1  ;;  %v6507_v9 = vadd.f32 %v4794_v47, %v4386_v2 }
 0x330   : > { %v4392_v33 = vadd.f32 %v4391_v7, %v4390_v49  ;;  %v4252_v15 = vpop.f32.mrb[89].mxu1 }
 0x331   : > { %v4253_v40 = vadd.f32 %v4252_v15, %v4251_v12  ;;  %v4254_v60 = vpop.f32.mrb[90].mxu1 }
 0x332   : > { %v4255_v62 = vpop.f32.mrb[91].mxu1 }
 0x333   : > { %v4785_v16 = vadd.f32 %v4253_v40, %v6399_v61  ;;  %v4256_v21 = vadd.f32 %v4255_v62, %v4254_v60 }
 0x334   : > { %v4393_v59 = vpop.f32.mrb[56].mxu0 }
 0x335   : > { %v4791_v17 = vadd.f32 %v4256_v21, %v6402_v58  ;;  %v4394_v44 = vpop.f32.mrb[57].mxu0  ;;  %v6511_v35 = vadd.f32 %v4785_v16, %v4389_v54 }
 0x336   : > { %v4395_v6 = vadd.f32 %v4394_v44, %v4393_v59  ;;  %v4396_v1 = vpop.f32.mrb[58].mxu0 }
 0x337   : > { %v4397_v46 = vpop.f32.mrb[59].mxu0  ;;  %v4257_v41 = vpop.f32.mrb[92].mxu1  ;;  %v6513_v27 = vadd.f32 %v4791_v17, %v4392_v33 }
 0x338   : > { %v4398_v30 = vadd.f32 %v4397_v46, %v4396_v1  ;;  %v4258_v55 = vpop.f32.mrb[93].mxu1 }
 0x339   : > { %v4259_v2 = vadd.f32 %v4258_v55, %v4257_v41  ;;  %v4260_v28 = vpop.f32.mrb[94].mxu1 }
 0x33a   : > { %v4261_v3 = vpop.f32.mrb[95].mxu1 }
 0x33b   : > { %v4800_v61 = vadd.f32 %v4259_v2, %v6412_v57  ;;  %v4262_v34 = vadd.f32 %v4261_v3, %v4260_v28 }
 0x33c   : > { %v4399_v25 = vpop.f32.mrb[60].mxu0 }
 0x33d   : > { %v4806_v58 = vadd.f32 %v4262_v34, %v6419_v26  ;;  %v4400_v52 = vpop.f32.mrb[61].mxu0  ;;  %v6517_v53 = vadd.f32 %v4800_v61, %v4395_v6 }
 0x33e   : > { %v4401_v43 = vadd.f32 %v4400_v52, %v4399_v25  ;;  %v4402_v47 = vpop.f32.mrb[62].mxu0 }
 0x33f   : > { %v4403_v50 = vpop.f32.mrb[63].mxu0  ;;  %v4263_v54 = vpop.f32.mrb[96].mxu1  ;;  %v6519_v49 = vadd.f32 %v4806_v58, %v4398_v30 }
 0x340   : > { %v4404_v7 = vadd.f32 %v4403_v50, %v4402_v47  ;;  %v4264_v12 = vpop.f32.mrb[97].mxu1 }
 0x341   : > { %v4265_v33 = vadd.f32 %v4264_v12, %v4263_v54  ;;  %v4266_v15 = vpop.f32.mrb[98].mxu1 }
 0x342   : > { %v4267_v40 = vpop.f32.mrb[99].mxu1 }
 0x343   : > { %v4797_v57 = vadd.f32 %v4265_v33, %v6427_v63  ;;  %v4268_v60 = vadd.f32 %v4267_v40, %v4266_v15 }
 0x344   : > { %v4405_v62 = vpop.f32.mrb[64].mxu0 }
 0x345   : > { %v4803_v26 = vadd.f32 %v4268_v60, %v6429_v42  ;;  %v4406_v16 = vpop.f32.mrb[65].mxu0  ;;  %v6523_v21 = vadd.f32 %v4797_v57, %v4401_v43 }
 0x346   : > { %v4407_v59 = vadd.f32 %v4406_v16, %v4405_v62  ;;  %v4408_v17 = vpop.f32.mrb[66].mxu0 }
 0x347   : > { %v4409_v44 = vpop.f32.mrb[67].mxu0  ;;  %v4269_v6 = vpop.f32.mrb[100].mxu1  ;;  %v6525_v1 = vadd.f32 %v4803_v26, %v4404_v7 }
 0x348   : > { %v4410_v46 = vadd.f32 %v4409_v44, %v4408_v17  ;;  %v4270_v41 = vpop.f32.mrb[101].mxu1 }
 0x349   : > { %v4271_v30 = vadd.f32 %v4270_v41, %v4269_v6  ;;  %v4272_v55 = vpop.f32.mrb[102].mxu1 }
 0x34a   : > { %v4273_v2 = vpop.f32.mrb[103].mxu1 }
 0x34b   : > { %v4812_v63 = vadd.f32 %v4271_v30, %v6435_v29  ;;  %v4274_v28 = vadd.f32 %v4273_v2, %v4272_v55 }
 0x34c   : > { %v4411_v3 = vpop.f32.mrb[68].mxu0 }
 0x34d   : > { %v4818_v42 = vadd.f32 %v4274_v28, %v6439_v51  ;;  %v4412_v61 = vpop.f32.mrb[69].mxu0  ;;  %v6529_v34 = vadd.f32 %v4812_v63, %v4407_v59 }
 0x34e   : > { %v4413_v25 = vadd.f32 %v4412_v61, %v4411_v3  ;;  %v4414_v58 = vpop.f32.mrb[70].mxu0 }
 0x34f   : > { %v4415_v52 = vpop.f32.mrb[71].mxu0  ;;  %v4275_v43 = vpop.f32.mrb[104].mxu1  ;;  %v6531_v47 = vadd.f32 %v4818_v42, %v4410_v46 }
 0x350   : > { %v4416_v50 = vadd.f32 %v4415_v52, %v4414_v58  ;;  %v4276_v54 = vpop.f32.mrb[105].mxu1 }
 0x351   : > { %v4277_v7 = vadd.f32 %v4276_v54, %v4275_v43  ;;  %v4278_v12 = vpop.f32.mrb[106].mxu1 }
 0x352   : > { %v4279_v33 = vpop.f32.mrb[107].mxu1 }
 0x353   : > { %v4809_v29 = vadd.f32 %v4277_v7, %v6442_v0  ;;  %v4280_v15 = vadd.f32 %v4279_v33, %v4278_v12 }
 0x354   : > { %v4417_v40 = vpop.f32.mrb[72].mxu0 }
 0x355   : > { %v4815_v51 = vadd.f32 %v4280_v15, %v6446_v11  ;;  %v4418_v57 = vpop.f32.mrb[73].mxu0  ;;  %v6535_v60 = vadd.f32 %v4809_v29, %v4413_v25 }
 0x356   : > { %v4419_v62 = vadd.f32 %v4418_v57, %v4417_v40  ;;  %v4420_v26 = vpop.f32.mrb[74].mxu0 }
 0x357   : > { %v4421_v16 = vpop.f32.mrb[75].mxu0  ;;  %v4281_v59 = vpop.f32.mrb[108].mxu1  ;;  %v6537_v17 = vadd.f32 %v4815_v51, %v4416_v50 }
 0x358   : > { %v4422_v44 = vadd.f32 %v4421_v16, %v4420_v26  ;;  %v4282_v6 = vpop.f32.mrb[109].mxu1 }
 0x359   : > { %v4283_v46 = vadd.f32 %v4282_v6, %v4281_v59  ;;  %v4284_v41 = vpop.f32.mrb[110].mxu1 }
 0x35a   : > { %v4285_v30 = vpop.f32.mrb[111].mxu1 }
 0x35b   : > { %v4824_v0 = vadd.f32 %v4283_v46, %v6448_v20  ;;  %v4286_v55 = vadd.f32 %v4285_v30, %v4284_v41 }
 0x35c   : > { %v4423_v2 = vpop.f32.mrb[76].mxu0 }
 0x35d   : > { %v4830_v11 = vadd.f32 %v4286_v55, %v6452_v32  ;;  %v4424_v63 = vpop.f32.mrb[77].mxu0  ;;  %v6541_v28 = vadd.f32 %v4824_v0, %v4419_v62 }
 0x35e   : > { %v4425_v3 = vadd.f32 %v4424_v63, %v4423_v2  ;;  %v4426_v42 = vpop.f32.mrb[78].mxu0 }
 0x35f   : > { %v4427_v61 = vpop.f32.mrb[79].mxu0  ;;  %v4287_v25 = vpop.f32.mrb[112].mxu1  ;;  %v6543_v58 = vadd.f32 %v4830_v11, %v4422_v44 }
 0x360   : > { %v4428_v52 = vadd.f32 %v4427_v61, %v4426_v42  ;;  %v4288_v43 = vpop.f32.mrb[113].mxu1 }
 0x361   : > { %v4289_v50 = vadd.f32 %v4288_v43, %v4287_v25  ;;  %v4290_v54 = vpop.f32.mrb[114].mxu1 }
 0x362   : > { %v4291_v7 = vpop.f32.mrb[115].mxu1 }
 0x363   : > { %v4821_v20 = vadd.f32 %v4289_v50, %v6454_v8  ;;  %v4292_v12 = vadd.f32 %v4291_v7, %v4290_v54 }
 0x364   : > { %v4429_v33 = vpop.f32.mrb[80].mxu0 }
 0x365   : > { %v4827_v32 = vadd.f32 %v4292_v12, %v6458_v23  ;;  %v4430_v29 = vpop.f32.mrb[81].mxu0  ;;  %v6547_v15 = vadd.f32 %v4821_v20, %v4425_v3 }
 0x366   : > { %v4431_v40 = vadd.f32 %v4430_v29, %v4429_v33  ;;  %v4432_v51 = vpop.f32.mrb[82].mxu0 }
 0x367   : > { %v4433_v57 = vpop.f32.mrb[83].mxu0  ;;  %v4293_v62 = vpop.f32.mrb[116].mxu1  ;;  %v6549_v26 = vadd.f32 %v4827_v32, %v4428_v52 }
 0x368   : > { %v4434_v16 = vadd.f32 %v4433_v57, %v4432_v51  ;;  %v4294_v59 = vpop.f32.mrb[117].mxu1 }
 0x369   : > { %v4295_v44 = vadd.f32 %v4294_v59, %v4293_v62  ;;  %v4296_v6 = vpop.f32.mrb[118].mxu1 }
 0x36a   : > { %v4297_v46 = vpop.f32.mrb[119].mxu1 }
 0x36b   : > { %v4836_v8 = vadd.f32 %v4295_v44, %v6460_v37  ;;  %v4298_v41 = vadd.f32 %v4297_v46, %v4296_v6 }
 0x36c   : > { %v4435_v30 = vpop.f32.mrb[84].mxu0 }
 0x36d   : > { %v4842_v23 = vadd.f32 %v4298_v41, %v6464_v14  ;;  %v4436_v0 = vpop.f32.mrb[85].mxu0  ;;  %v6553_v55 = vadd.f32 %v4836_v8, %v4431_v40 }
 0x36e   : > { %v4437_v2 = vadd.f32 %v4436_v0, %v4435_v30  ;;  %v4438_v11 = vpop.f32.mrb[86].mxu0 }
 0x36f   : > { %v4439_v63 = vpop.f32.mrb[87].mxu0  ;;  %v4299_v3 = vpop.f32.mrb[120].mxu1  ;;  %v6555_v42 = vadd.f32 %v4842_v23, %v4434_v16 }
 0x370   : > { %v4440_v61 = vadd.f32 %v4439_v63, %v4438_v11  ;;  %v4300_v25 = vpop.f32.mrb[121].mxu1 }
 0x371   : > { %v4301_v52 = vadd.f32 %v4300_v25, %v4299_v3  ;;  %v4302_v43 = vpop.f32.mrb[122].mxu1 }
 0x372   : > { %v4303_v50 = vpop.f32.mrb[123].mxu1 }
 0x373   : > { %v4833_v37 = vadd.f32 %v4301_v52, %v6466_v31  ;;  %v4304_v54 = vadd.f32 %v4303_v50, %v4302_v43 }
 0x374   : > { %v4441_v7 = vpop.f32.mrb[88].mxu0 }
 0x375   : > { %v4839_v14 = vadd.f32 %v4304_v54, %v6470_v39  ;;  %v4442_v20 = vpop.f32.mrb[89].mxu0  ;;  %v6559_v12 = vadd.f32 %v4833_v37, %v4437_v2 }
 0x376   : > { %v4443_v33 = vadd.f32 %v4442_v20, %v4441_v7  ;;  %v4444_v32 = vpop.f32.mrb[90].mxu0 }
 0x377   : > { %v4445_v29 = vpop.f32.mrb[91].mxu0  ;;  %v4305_v40 = vpop.f32.mrb[124].mxu1  ;;  %v6561_v51 = vadd.f32 %v4839_v14, %v4440_v61 }
 0x378   : > { %v4446_v57 = vadd.f32 %v4445_v29, %v4444_v32  ;;  %v4306_v62 = vpop.f32.mrb[125].mxu1 }
 0x379   : > { %v4307_v16 = vadd.f32 %v4306_v62, %v4305_v40  ;;  %v4308_v59 = vpop.f32.mrb[126].mxu1 }
 0x37a   : > { %v4309_v44 = vpop.f32.mrb[127].mxu1 }
 0x37b   : > { %v4848_v31 = vadd.f32 %v4307_v16, %v6472_v36  ;;  %v4310_v6 = vadd.f32 %v4309_v44, %v4308_v59 }
 0x37c   : > { %v4447_v46 = vpop.f32.mrb[92].mxu0 }
 0x37d   : > { %v4854_v39 = vadd.f32 %v4310_v6, %v6476_v4  ;;  %v4448_v8 = vpop.f32.mrb[93].mxu0  ;;  %v6565_v41 = vadd.f32 %v4848_v31, %v4443_v33 }
 0x37e   : > { %v4449_v30 = vadd.f32 %v4448_v8, %v4447_v46  ;;  %v4450_v23 = vpop.f32.mrb[94].mxu0 }
 0x37f   : > { %v4451_v0 = vpop.f32.mrb[95].mxu0  ;;  %v4311_v2 = vpop.f32.mrb[128].mxu1  ;;  %v6567_v11 = vadd.f32 %v4854_v39, %v4446_v57 }
 0x380   : > { %v4452_v63 = vadd.f32 %v4451_v0, %v4450_v23  ;;  %v4312_v3 = vpop.f32.mrb[129].mxu1 }
 0x381   : > { %v4313_v61 = vadd.f32 %v4312_v3, %v4311_v2  ;;  %v4314_v25 = vpop.f32.mrb[130].mxu1 }
 0x382   : > { %v4315_v52 = vpop.f32.mrb[131].mxu1 }
 0x383   : > { %v4845_v36 = vadd.f32 %v4313_v61, %v6478_v56  ;;  %v4316_v43 = vadd.f32 %v4315_v52, %v4314_v25 }
 0x384   : > { %v4453_v50 = vpop.f32.mrb[96].mxu0 }
 0x385   : > { %v4851_v4 = vadd.f32 %v4316_v43, %v6482_v48  ;;  %v4454_v37 = vpop.f32.mrb[97].mxu0  ;;  %v6571_v54 = vadd.f32 %v4845_v36, %v4449_v30 }
 0x386   : > { %v4455_v7 = vadd.f32 %v4454_v37, %v4453_v50  ;;  %v4456_v14 = vpop.f32.mrb[98].mxu0 }
 0x387   : > { %v4457_v20 = vpop.f32.mrb[99].mxu0  ;;  %v4317_v33 = vpop.f32.mrb[132].mxu1  ;;  %v6573_v32 = vadd.f32 %v4851_v4, %v4452_v63 }
 0x388   : > { %v4458_v29 = vadd.f32 %v4457_v20, %v4456_v14  ;;  %v4318_v40 = vpop.f32.mrb[133].mxu1 }
 0x389   : > { %v4319_v57 = vadd.f32 %v4318_v40, %v4317_v33  ;;  %v4320_v62 = vpop.f32.mrb[134].mxu1 }
 0x38a   : > { %v4321_v16 = vpop.f32.mrb[135].mxu1 }
 0x38b   : > { %v4860_v56 = vadd.f32 %v4319_v57, %v6487_v45  ;;  %v4322_v59 = vadd.f32 %v4321_v16, %v4320_v62 }
 0x38c   : > { %v4459_v44 = vpop.f32.mrb[100].mxu0 }
 0x38d   : > { %v4866_v48 = vadd.f32 %v4322_v59, %v6489_v13  ;;  %v4460_v31 = vpop.f32.mrb[101].mxu0  ;;  %v6577_v6 = vadd.f32 %v4860_v56, %v4455_v7 }
 0x38e   : > { %v4461_v46 = vadd.f32 %v4460_v31, %v4459_v44  ;;  %v4462_v39 = vpop.f32.mrb[102].mxu0 }
 0x38f   : > { %v4463_v8 = vpop.f32.mrb[103].mxu0  ;;  %v4323_v30 = vpop.f32.mrb[136].mxu1  ;;  %v6579_v23 = vadd.f32 %v4866_v48, %v4458_v29 }
 0x390   : > { %v4464_v0 = vadd.f32 %v4463_v8, %v4462_v39  ;;  %v4324_v2 = vpop.f32.mrb[137].mxu1 }
 0x391   : > { %v4325_v63 = vadd.f32 %v4324_v2, %v4323_v30  ;;  %v4326_v3 = vpop.f32.mrb[138].mxu1 }
 0x392   : > { %v4327_v61 = vpop.f32.mrb[139].mxu1 }
 0x393   : > { %v4857_v45 = vadd.f32 %v4325_v63, %v6491_v18  ;;  %v4328_v25 = vadd.f32 %v4327_v61, %v4326_v3 }
 0x394   : > { %v4465_v52 = vpop.f32.mrb[104].mxu0 }
 0x395   : > { %v4863_v13 = vadd.f32 %v4328_v25, %v6493_v22  ;;  %v4466_v36 = vpop.f32.mrb[105].mxu0  ;;  %v6583_v43 = vadd.f32 %v4857_v45, %v4461_v46 }
 0x396   : > { %v4467_v50 = vadd.f32 %v4466_v36, %v4465_v52  ;;  %v4468_v4 = vpop.f32.mrb[106].mxu0 }
 0x397   : > { %v4469_v37 = vpop.f32.mrb[107].mxu0  ;;  %v4329_v7 = vpop.f32.mrb[140].mxu1  ;;  %v6585_v14 = vadd.f32 %v4863_v13, %v4464_v0 }
 0x398   : > { %v4470_v20 = vadd.f32 %v4469_v37, %v4468_v4  ;;  %v4330_v33 = vpop.f32.mrb[141].mxu1 }
 0x399   : > { %v4331_v29 = vadd.f32 %v4330_v33, %v4329_v7  ;;  %v4332_v40 = vpop.f32.mrb[142].mxu1 }
 0x39a   : > { %v4333_v57 = vpop.f32.mrb[143].mxu1 }
 0x39b   : > { %v4872_v18 = vadd.f32 %v4331_v29, %v6495_v19  ;;  %v4334_v62 = vadd.f32 %v4333_v57, %v4332_v40 }
 0x39c   : > { %v4471_v16 = vpop.f32.mrb[108].mxu0 }
 0x39d   : > { %v4878_v22 = vadd.f32 %v4334_v62, %v6497_v5  ;;  %v4472_v56 = vpop.f32.mrb[109].mxu0  ;;  %v6589_v59 = vadd.f32 %v4872_v18, %v4467_v50  ;;  %v6597_v5 = vld [vmem:[%s6802_s5] ss:$0 sm:$0xff] }
 0x39e   : > { %v4473_v44 = vadd.f32 %v4472_v56, %v4471_v16  ;;  %v4474_v48 = vpop.f32.mrb[110].mxu0 }
 0x39f   : > { %v4475_v31 = vpop.f32.mrb[111].mxu0  ;;  %v4335_v46 = vpop.f32.mrb[144].mxu1  ;;  %v6591_v39 = vadd.f32 %v4878_v22, %v4470_v20 }
 0x3a0   : > { %v4476_v8 = vadd.f32 %v4475_v31, %v4474_v48  ;;  %v4336_v30 = vpop.f32.mrb[145].mxu1 }
 0x3a1   : > { %v4337_v0 = vadd.f32 %v4336_v30, %v4335_v46  ;;  %v4338_v2 = vpop.f32.mrb[146].mxu1 }
 0x3a2   : > { %v4339_v63 = vpop.f32.mrb[147].mxu1 }
 0x3a3   : > { %v4869_v19 = vadd.f32 %v4337_v0, %v6499_v10  ;;  %v4340_v3 = vadd.f32 %v4339_v63, %v4338_v2 }
 0x3a4   : > { %v4691_v61 = vpop.f32.mrb[16].mxu0 }
 0x3a5   : > { %v4875_v45 = vadd.f32 %v4340_v3, %v6501_v38  ;;  %v4787_v25 = vadd.f32 %v6511_v35, %v4691_v61  ;;  %v2879_v52 = vpop.f32.mrb[17].mxu0  ;;  %v6601_v13 = vadd.f32 %v4869_v19, %v4473_v44 }
 0x3a6   : > { %v4790_v36 = vadd.f32 %v6505_v24, %v2879_v52  ;;  %v4692_v50 = vpop.f32.mrb[18].mxu0 }
 0x3a7   : > { %v3047_v4 = vadd.f32 %v4787_v25, %v6597_v5  ;;  %v4793_v10 = vadd.f32 %v6513_v27, %v4692_v50  ;;  %v2882_v37 = vpop.f32.mrb[19].mxu0  ;;  %v6606_v7 = vadd.f32 %v4875_v45, %v4476_v8 }
 0x3a8   : > { %v3045_v20 = vadd.f32 %v4790_v36, %v6597_v5  ;;  %v4796_v33 = vadd.f32 %v6507_v9, %v2882_v37 }
 0x3a9   : > { %v3048_v38 = vadd.f32 %v4793_v10, %v6597_v5  ;;  %v3079_v29 = vmax.f32 %v3047_v4, 0.0 }
 0x3aa   : > { %v3046_v35 = vadd.f32 %v4796_v33, %v6597_v5  ;;  %v3077_v57 = vmax.f32 %v3045_v20, 0.0 }
 0x3ab   : > { %v3080_v40 = vmax.f32 %v3048_v38, 0.0 }
 0x3ac   : > { %v3078_v24 = vmax.f32 %v3046_v35, 0.0  ;;  %v4695_v18 = vpop.f32.mrb[20].mxu0 }
 0x3ad   : > { %v3110_v62 = vpack.c.bf16 %v3080_v40, %v3079_v29  ;;  %v4799_v16 = vadd.f32 %v6523_v21, %v4695_v18  ;;  %v2895_v27 = vpop.f32.mrb[21].mxu0 }
 0x3ae   : > { %v4802_v22 = vadd.f32 %v6517_v53, %v2895_v27  ;;  %v4696_v56 = vpop.f32.mrb[22].mxu0  ;;  %v3109_v44 = vpack.c.bf16 %v3078_v24, %v3077_v57 }
 0x3af   : > { %v3051_v48 = vadd.f32 %v4799_v16, %v6597_v5  ;;  %v4805_v9 = vadd.f32 %v6525_v1, %v4696_v56  ;;  %v2898_v31 = vpop.f32.mrb[23].mxu0 }
 0x3b0   : > { %v3049_v46 = vadd.f32 %v4802_v22, %v6597_v5  ;;  %v4808_v8 = vadd.f32 %v6519_v49, %v2898_v31  ;;  %4737 = vmatprep.mubr.bf16.mxu1 %v3109_v44 }
 0x3b1   : > { %v3052_v30 = vadd.f32 %v4805_v9, %v6597_v5  ;;  %4738 = vmatmul.mubr.bf16.vlgmr.msra.gmra.mrb[148].mxu1 %v3110_v62  ;;  %v3083_v0 = vmax.f32 %v3051_v48, 0.0 }
 0x3b2   : > { %v3050_v21 = vadd.f32 %v4808_v8, %v6597_v5  ;;  %v3081_v53 = vmax.f32 %v3049_v46, 0.0 }
 0x3b3   : > { %v3084_v2 = vmax.f32 %v3052_v30, 0.0 }
 0x3b4   : > { %v3082_v63 = vmax.f32 %v3050_v21, 0.0  ;;  %v4699_v19 = vpop.f32.mrb[24].mxu0 }
 0x3b5   : > { %v4811_v3 = vadd.f32 %v6535_v60, %v4699_v19  ;;  %v2911_v61 = vpop.f32.mrb[25].mxu0  ;;  %v3112_v1 = vpack.c.bf16 %v3084_v2, %v3083_v0 }
 0x3b6   : > { %v4814_v45 = vadd.f32 %v6529_v34, %v2911_v61  ;;  %v4700_v25 = vpop.f32.mrb[26].mxu0  ;;  %v3111_v52 = vpack.c.bf16 %v3082_v63, %v3081_v53 }
 0x3b7   : > { %v3055_v49 = vadd.f32 %v4811_v3, %v6597_v5  ;;  %v4817_v36 = vadd.f32 %v6537_v17, %v4700_v25  ;;  %v2914_v50 = vpop.f32.mrb[27].mxu0 }
 0x3b8   : > { %v3053_v4 = vadd.f32 %v4814_v45, %v6597_v5  ;;  %v4820_v10 = vadd.f32 %v6531_v47, %v2914_v50  ;;  %4741 = vmatprep.mubr.bf16.mxu1 %v3111_v52 }
 0x3b9   : > { %v3056_v37 = vadd.f32 %v4817_v36, %v6597_v5  ;;  %4742 = vmatmul.mubr.bf16.gmra.mrb[152].mxu1 %v3112_v1  ;;  %v3087_v20 = vmax.f32 %v3055_v49, 0.0 }
 0x3ba   : > { %v3054_v60 = vadd.f32 %v4820_v10, %v6597_v5  ;;  %v3085_v34 = vmax.f32 %v3053_v4, 0.0 }
 0x3bb   : > { %v3088_v33 = vmax.f32 %v3056_v37, 0.0 }
 0x3bc   : > { %v3086_v38 = vmax.f32 %v3054_v60, 0.0  ;;  %v4703_v35 = vpop.f32.mrb[28].mxu0 }
 0x3bd   : > { %v4823_v29 = vadd.f32 %v6547_v15, %v4703_v35  ;;  %v2927_v40 = vpop.f32.mrb[29].mxu0  ;;  %v3114_v17 = vpack.c.bf16 %v3088_v33, %v3087_v20 }
 0x3be   : > { %v4826_v57 = vadd.f32 %v6541_v28, %v2927_v40  ;;  %v4704_v24 = vpop.f32.mrb[30].mxu0  ;;  %v3113_v18 = vpack.c.bf16 %v3086_v38, %v3085_v34 }
 0x3bf   : > { %v3059_v47 = vadd.f32 %v4823_v29, %v6597_v5  ;;  %v4829_v62 = vadd.f32 %v6549_v26, %v4704_v24  ;;  %v2930_v16 = vpop.f32.mrb[31].mxu0 }
 0x3c0   : > { %v3057_v27 = vadd.f32 %v4826_v57, %v6597_v5  ;;  %v4832_v22 = vadd.f32 %v6543_v58, %v2930_v16  ;;  %4745 = vmatprep.mubr.bf16.mxu1 %v3113_v18 }
 0x3c1   : > { %v3060_v56 = vadd.f32 %v4829_v62, %v6597_v5  ;;  %4746 = vmatmul.mubr.bf16.gmra.mrb[156].mxu1 %v3114_v17  ;;  %v3091_v44 = vmax.f32 %v3059_v47, 0.0 }
 0x3c2   : > { %v3058_v15 = vadd.f32 %v4832_v22, %v6597_v5  ;;  %v3089_v28 = vmax.f32 %v3057_v27, 0.0 }
 0x3c3   : > { %v3092_v48 = vmax.f32 %v3060_v56, 0.0 }
 0x3c4   : > { %v3090_v9 = vmax.f32 %v3058_v15, 0.0  ;;  %v4707_v31 = vpop.f32.mrb[32].mxu0 }
 0x3c5   : > { %v4835_v46 = vadd.f32 %v6559_v12, %v4707_v31  ;;  %v2943_v8 = vpop.f32.mrb[33].mxu0  ;;  %v3116_v26 = vpack.c.bf16 %v3092_v48, %v3091_v44 }
 0x3c6   : > { %v4838_v30 = vadd.f32 %v6553_v55, %v2943_v8  ;;  %v4708_v21 = vpop.f32.mrb[34].mxu0  ;;  %v3115_v0 = vpack.c.bf16 %v3090_v9, %v3089_v28 }
 0x3c7   : > { %v3063_v58 = vadd.f32 %v4835_v46, %v6597_v5  ;;  %v4841_v2 = vadd.f32 %v6561_v51, %v4708_v21  ;;  %v2946_v53 = vpop.f32.mrb[35].mxu0 }
 0x3c8   : > { %v3061_v63 = vadd.f32 %v4838_v30, %v6597_v5  ;;  %v4844_v19 = vadd.f32 %v6555_v42, %v2946_v53  ;;  %4749 = vmatprep.mubr.bf16.mxu1 %v3115_v0 }
 0x3c9   : > { %v3064_v3 = vadd.f32 %v4841_v2, %v6597_v5  ;;  %4750 = vmatmul.mubr.bf16.gmra.mrb[160].mxu1 %v3116_v26  ;;  %v3095_v61 = vmax.f32 %v3063_v58, 0.0 }
 0x3ca   : > { %v3062_v12 = vadd.f32 %v4844_v19, %v6597_v5  ;;  %v3093_v55 = vmax.f32 %v3061_v63, 0.0 }
 0x3cb   : > { %v3096_v1 = vmax.f32 %v3064_v3, 0.0 }
 0x3cc   : > { %v3094_v45 = vmax.f32 %v3062_v12, 0.0  ;;  %v4711_v25 = vpop.f32.mrb[36].mxu0 }
 0x3cd   : > { %v4847_v52 = vadd.f32 %v6571_v54, %v4711_v25  ;;  %v2959_v49 = vpop.f32.mrb[37].mxu0  ;;  %v3118_v51 = vpack.c.bf16 %v3096_v1, %v3095_v61  ;;  %v5170_v61 = vld [vmem:[%s5749_s8] sm:$0xff]  }
 0x3ce   : > { %v4850_v36 = vadd.f32 %v6565_v41, %v2959_v49  ;;  %v4712_v50 = vpop.f32.mrb[38].mxu0  ;;  %v3117_v4 = vpack.c.bf16 %v3094_v45, %v3093_v55  ;;  %v3357_v1 = vunpack.c.l.bf16 %v5170_v61 }
 0x3cf   : > { %v3067_v42 = vadd.f32 %v4847_v52, %v6597_v5  ;;  %v4853_v10 = vadd.f32 %v6573_v32, %v4712_v50  ;;  %v2962_v37 = vpop.f32.mrb[39].mxu0  ;;  %v3358_v52 = vunpack.c.h.bf16 %v5170_v61 }
 0x3d0   : > { %v3065_v60 = vadd.f32 %v4850_v36, %v6597_v5  ;;  %v4856_v20 = vadd.f32 %v6567_v11, %v2962_v37  ;;  %4753 = vmatprep.mubr.bf16.mxu1 %v3117_v4 }
 0x3d1   : > { %v3068_v33 = vadd.f32 %v4853_v10, %v6597_v5  ;;  %4754 = vmatmul.mubr.bf16.gmra.mrb[164].mxu1 %v3118_v51  ;;  %v3099_v34 = vmax.f32 %v3067_v42, 0.0 }
 0x3d2   : > { %v3066_v54 = vadd.f32 %v4856_v20, %v6597_v5  ;;  %v3097_v41 = vmax.f32 %v3065_v60, 0.0 }
 0x3d3   : > { %v3100_v38 = vmax.f32 %v3068_v33, 0.0 }
 0x3d4   : > { %v3098_v35 = vmax.f32 %v3066_v54, 0.0  ;;  %v4715_v29 = vpop.f32.mrb[40].mxu0  ;;  %v5171_v54 = vld [vmem:[%s5749_s8 + $0x18] sm:$0xff]  }
 0x3d5   : > { %v4859_v40 = vadd.f32 %v6583_v43, %v4715_v29  ;;  %v2975_v17 = vpop.f32.mrb[41].mxu0  ;;  %v3120_v32 = vpack.c.bf16 %v3100_v38, %v3099_v34  ;;  %v3363_v34 = vunpack.c.l.bf16 %v5171_v54  ;;  %v5172_v29 = vld [vmem:[%s5749_s8 + $0x10] sm:$0xff]  }
 0x3d6   : > { %v4862_v57 = vadd.f32 %v6577_v6, %v2975_v17  ;;  %v4716_v24 = vpop.f32.mrb[42].mxu0  ;;  %v3119_v18 = vpack.c.bf16 %v3098_v35, %v3097_v41 }
 0x3d7   : > { %v3071_v11 = vadd.f32 %v4859_v40, %v6597_v5  ;;  %v4865_v47 = vadd.f32 %v6585_v14, %v4716_v24  ;;  %v2978_v62 = vpop.f32.mrb[43].mxu0  ;;  %v3361_v40 = vunpack.c.l.bf16 %v5172_v29  ;;  %v3364_v24 = vunpack.c.h.bf16 %v5171_v54 }
 0x3d8   : > { %v3069_v16 = vadd.f32 %v4862_v57, %v6597_v5  ;;  %v4868_v27 = vadd.f32 %v6579_v23, %v2978_v62  ;;  %4757 = vmatprep.mubr.bf16.mxu1 %v3119_v18  ;;  %v3362_v62 = vunpack.c.h.bf16 %v5172_v29 }
 0x3d9   : > { %v3072_v22 = vadd.f32 %v4865_v47, %v6597_v5  ;;  %4758 = vmatmul.mubr.bf16.gmra.mrb[168].mxu1 %v3120_v32  ;;  %v3103_v56 = vmax.f32 %v3071_v11, 0.0 }
 0x3da   : > { %v3070_v43 = vadd.f32 %v4868_v27, %v6597_v5  ;;  %v3101_v6 = vmax.f32 %v3069_v16, 0.0 }
 0x3db   : > { %v3104_v15 = vmax.f32 %v3072_v22, 0.0 }
 0x3dc   : > { %v3102_v44 = vmax.f32 %v3070_v43, 0.0  ;;  %v4719_v48 = vpop.f32.mrb[44].mxu0 }
 0x3dd   : > { %v4871_v28 = vadd.f32 %v6601_v13, %v4719_v48  ;;  %v2991_v9 = vpop.f32.mrb[45].mxu0  ;;  %v3122_v14 = vpack.c.bf16 %v3104_v15, %v3103_v56 }
 0x3de   : > { %v4874_v31 = vadd.f32 %v6589_v59, %v2991_v9  ;;  %v4720_v46 = vpop.f32.mrb[46].mxu0  ;;  %v3121_v8 = vpack.c.bf16 %v3102_v44, %v3101_v6 }
 0x3df   : > { %v3075_v23 = vadd.f32 %v4871_v28, %v6597_v5  ;;  %v4877_v26 = vadd.f32 %v6606_v7, %v4720_v46  ;;  %v2994_v30 = vpop.f32.mrb[47].mxu0  ;;  %v6671_v7 = vld [vmem:[%s6804_s7] ss:$0 sm:$0xff]  ;;  %v5173_v28 = vld [vmem:[%s5749_s8 + $0x28] sm:$0xff]  }
 0x3e0   : > { %v3073_v21 = vadd.f32 %v4874_v31, %v6597_v5  ;;  %v4880_v0 = vadd.f32 %v6591_v39, %v2994_v30  ;;  %4761 = vmatprep.mubr.bf16.mxu1 %v3121_v8  ;;  %v5169_v39 = vld [vmem:[%s5749_s8 + $0x8] sm:$0xff]   ;;  %v3367_v9 = vunpack.c.l.bf16 %v5173_v28  ;;  %v5174_v8 = vld [vmem:[%s5749_s8 + $0x20] sm:$0xff]  }
 0x3e1   : > { %v3076_v13 = vadd.f32 %v4877_v26, %v6597_v5  ;;  %4762 = vmatmul.mubr.bf16.gmra.mrb[172].mxu1 %v3122_v14  ;;  %v3107_v59 = vmax.f32 %v3075_v23, 0.0  ;;  %v3359_v12 = vunpack.c.l.bf16 %v5169_v39  ;;  %v3360_v25 = vunpack.c.h.bf16 %v5169_v39 }
 0x3e2   : > { %v3074_v58 = vadd.f32 %v4880_v0, %v6597_v5  ;;  %v3105_v53 = vmax.f32 %v3073_v21, 0.0  ;;  %v3365_v23 = vunpack.c.l.bf16 %v5174_v8  ;;  %v3368_v0 = vunpack.c.h.bf16 %v5173_v28 }
 0x3e3   : > { %v3108_v2 = vmax.f32 %v3076_v13, 0.0 }
 0x3e4   : > { %v3106_v63 = vmax.f32 %v3074_v58, 0.0 }
 0x3e5   : > { %v3124_v19 = vpack.c.bf16 %v3108_v2, %v3107_v59  ;;  %v3366_v2 = vunpack.c.h.bf16 %v5174_v8 }
 0x3e6   : > { %v3123_v3 = vpack.c.bf16 %v3106_v63, %v3105_v53 }
 0x3e8   : > { %4765 = vmatprep.mubr.bf16.mxu1 %v3123_v3 }
 0x3e9   : > { %4766 = vmatmul.mubr.bf16.gmra.mrb[176].mxu1 %v3124_v19 }
 0x484   : > { %v4739_v55 = vpop.f32.mrb[148].mxu1 }
 0x485   : > { %v3239_v5 = vadd.f32 %v4739_v55, %v6671_v7  ;;  %v3230_v45 = vpop.f32.mrb[149].mxu1 }
 0x486   : > { %v3231_v49 = vadd.f32 %v6671_v7, %v3230_v45  ;;  %v4740_v51 = vpop.f32.mrb[150].mxu1 }
 0x487   : > { %v3391_v36 = vadd.f32 %v3359_v12, %v3239_v5  ;;  %v3242_v50 = vadd.f32 %v4740_v51, %v6671_v7  ;;  %v3233_v4 = vpop.f32.mrb[151].mxu1  ;;  %v5175_v5 = vld [vmem:[%s5749_s8 + $0x38] sm:$0xff]   ;;  %v5176_v51 = vld [vmem:[%s5749_s8 + $0x30] sm:$0xff]  }
 0x488   : > { %v3389_v42 = vadd.f32 %v3357_v1, %v3231_v49  ;;  %v3234_v10 = vadd.f32 %v6671_v7, %v3233_v4  ;;  %v3371_v45 = vunpack.c.l.bf16 %v5175_v5 }
 0x489   : > { %v3392_v37 = vadd.f32 %v3360_v25, %v3242_v50  ;;  %v3423_v20 = vmax.f32 %v3391_v36, 0.0  ;;  %v3369_v36 = vunpack.c.l.bf16 %v5176_v51 }
 0x48a   : > { %v3390_v60 = vadd.f32 %v3358_v52, %v3234_v10  ;;  %v3421_v38 = vmax.f32 %v3389_v42, 0.0  ;;  %v3372_v10 = vunpack.c.h.bf16 %v5175_v5 }
 0x48b   : > { %v3424_v33 = vmax.f32 %v3392_v37, 0.0 }
 0x48c   : > { %v3422_v41 = vmax.f32 %v3390_v60, 0.0  ;;  %v4743_v35 = vpop.f32.mrb[152].mxu1 }
 0x48d   : > { %v3980_v17 = vpack.c.bf16 %v3424_v33, %v3423_v20  ;;  %v3255_v32 = vadd.f32 %v4743_v35, %v6671_v7  ;;  %v3246_v57 = vpop.f32.mrb[153].mxu1  ;;  %v3370_v33 = vunpack.c.h.bf16 %v5176_v51 }
 0x48e   : > { %v3975_v18 = vpack.c.bf16 %v3422_v41, %v3421_v38  ;;  %v3247_v11 = vadd.f32 %v6671_v7, %v3246_v57  ;;  %v4744_v47 = vpop.f32.mrb[154].mxu1  ;;  %v5177_v57 = vld [vmem:[%s5749_s8 + $0x48] sm:$0xff]  }
 0x48f   : > { %4052 = vst [vmem:[%s6685_s19 + $0x8] sm:$0xff] %v3980_v17   ;;  %v3395_v16 = vadd.f32 %v3363_v34, %v3255_v32  ;;  %v3258_v27 = vadd.f32 %v4744_v47, %v6671_v7  ;;  %v3249_v22 = vpop.f32.mrb[155].mxu1 }
 0x490   : > { %3976 = vst [vmem:[%s6685_s19] sm:$0xff] %v3975_v18   ;;  %v3393_v43 = vadd.f32 %v3361_v40, %v3247_v11  ;;  %v3250_v56 = vadd.f32 %v6671_v7, %v3249_v22  ;;  %v5178_v18 = vld [vmem:[%s5749_s8 + $0x40] sm:$0xff]  }
 0x491   : > { %v3396_v15 = vadd.f32 %v3364_v24, %v3258_v27  ;;  %v3427_v44 = vmax.f32 %v3395_v16, 0.0  ;;  %v3375_v24 = vunpack.c.l.bf16 %v5177_v57  ;;  %v3373_v11 = vunpack.c.l.bf16 %v5178_v18 }
 0x492   : > { %v3394_v6 = vadd.f32 %v3362_v62, %v3250_v56  ;;  %v3425_v14 = vmax.f32 %v3393_v43, 0.0  ;;  %v3376_v56 = vunpack.c.h.bf16 %v5177_v57 }
 0x493   : > { %v3428_v48 = vmax.f32 %v3396_v15, 0.0  ;;  %v3374_v15 = vunpack.c.h.bf16 %v5178_v18 }
 0x494   : > { %v3426_v31 = vmax.f32 %v3394_v6, 0.0  ;;  %v4747_v46 = vpop.f32.mrb[156].mxu1 }
 0x495   : > { %v3990_v26 = vpack.c.bf16 %v3428_v48, %v3427_v44  ;;  %v3271_v30 = vadd.f32 %v4747_v46, %v6671_v7  ;;  %v3262_v21 = vpop.f32.mrb[157].mxu1 }
 0x496   : > { %v3985_v13 = vpack.c.bf16 %v3426_v31, %v3425_v14  ;;  %v3263_v58 = vadd.f32 %v6671_v7, %v3262_v21  ;;  %v4748_v59 = vpop.f32.mrb[158].mxu1  ;;  %v5179_v21 = vld [vmem:[%s5749_s8 + $0x58] sm:$0xff]  }
 0x497   : > { %4054 = vst [vmem:[%s6685_s19 + $0x18] sm:$0xff] %v3990_v26   ;;  %v3399_v53 = vadd.f32 %v3367_v9, %v3271_v30  ;;  %v3274_v63 = vadd.f32 %v4748_v59, %v6671_v7  ;;  %v3265_v19 = vpop.f32.mrb[159].mxu1 }
 0x498   : > { %4053 = vst [vmem:[%s6685_s19 + $0x10] sm:$0xff] %v3985_v13   ;;  %v3397_v3 = vadd.f32 %v3365_v23, %v3263_v58  ;;  %v3266_v39 = vadd.f32 %v6671_v7, %v3265_v19 }
 0x499   : > { %v3400_v12 = vadd.f32 %v3368_v0, %v3274_v63  ;;  %v3431_v1 = vmax.f32 %v3399_v53, 0.0  ;;  %v3379_v0 = vunpack.c.l.bf16 %v5179_v21 }
 0x49a   : > { %v3398_v61 = vadd.f32 %v3366_v2, %v3266_v39  ;;  %v3429_v25 = vmax.f32 %v3397_v3, 0.0  ;;  %v5180_v2 = vld [vmem:[%s5749_s8 + $0x50] sm:$0xff]   ;;  %v3380_v39 = vunpack.c.h.bf16 %v5179_v21 }
 0x49b   : > { %v3432_v55 = vmax.f32 %v3400_v12, 0.0  ;;  %v3377_v53 = vunpack.c.l.bf16 %v5180_v2 }
 0x49c   : > { %v3430_v52 = vmax.f32 %v3398_v61, 0.0  ;;  %v4751_v49 = vpop.f32.mrb[160].mxu1 }
 0x49d   : > { %v4000_v50 = vpack.c.bf16 %v3432_v55, %v3431_v1  ;;  %v3287_v4 = vadd.f32 %v4751_v49, %v6671_v7  ;;  %v3278_v42 = vpop.f32.mrb[161].mxu1  ;;  %v3378_v55 = vunpack.c.h.bf16 %v5180_v2 }
 0x49e   : > { %v3995_v37 = vpack.c.bf16 %v3430_v52, %v3429_v25  ;;  %v3279_v60 = vadd.f32 %v6671_v7, %v3278_v42  ;;  %v4752_v20 = vpop.f32.mrb[162].mxu1  ;;  %v5181_v42 = vld [vmem:[%s5749_s8 + $0x68] sm:$0xff]  }
 0x49f   : > { %4056 = vst [vmem:[%s6685_s19 + $0x28] sm:$0xff] %v4000_v50   ;;  %v3403_v54 = vadd.f32 %v3371_v45, %v3287_v4  ;;  %v3290_v34 = vadd.f32 %v4752_v20, %v6671_v7  ;;  %v3281_v38 = vpop.f32.mrb[163].mxu1 }
 0x4a0   : > { %4055 = vst [vmem:[%s6685_s19 + $0x20] sm:$0xff] %v3995_v37   ;;  %v3401_v41 = vadd.f32 %v3369_v36, %v3279_v60  ;;  %v3282_v35 = vadd.f32 %v6671_v7, %v3281_v38 }
 0x4a1   : > { %v3404_v29 = vadd.f32 %v3372_v10, %v3290_v34  ;;  %v3435_v17 = vmax.f32 %v3403_v54, 0.0  ;;  %v3383_v10 = vunpack.c.l.bf16 %v5181_v42 }
 0x4a2   : > { %v3402_v40 = vadd.f32 %v3370_v33, %v3282_v35  ;;  %v3433_v47 = vmax.f32 %v3401_v41, 0.0  ;;  %v5182_v33 = vld [vmem:[%s5749_s8 + $0x60] sm:$0xff]   ;;  %v3384_v35 = vunpack.c.h.bf16 %v5181_v42 }
 0x4a3   : > { %v3436_v32 = vmax.f32 %v3404_v29, 0.0  ;;  %v3381_v54 = vunpack.c.l.bf16 %v5182_v33 }
 0x4a4   : > { %v3434_v62 = vmax.f32 %v3402_v40, 0.0  ;;  %v4755_v16 = vpop.f32.mrb[164].mxu1 }
 0x4a5   : > { %v4010_v27 = vpack.c.bf16 %v3436_v32, %v3435_v17  ;;  %v3303_v22 = vadd.f32 %v4755_v16, %v6671_v7  ;;  %v3294_v43 = vpop.f32.mrb[165].mxu1  ;;  %v3382_v32 = vunpack.c.h.bf16 %v5182_v33 }
 0x4a6   : > { %v4005_v6 = vpack.c.bf16 %v3434_v62, %v3433_v47  ;;  %v3295_v44 = vadd.f32 %v6671_v7, %v3294_v43  ;;  %v4756_v48 = vpop.f32.mrb[166].mxu1  ;;  %v5183_v43 = vld [vmem:[%s5749_s8 + $0x78] sm:$0xff]  }
 0x4a7   : > { %4058 = vst [vmem:[%s6685_s19 + $0x38] sm:$0xff] %v4010_v27   ;;  %v3407_v28 = vadd.f32 %v3375_v24, %v3303_v22  ;;  %v3306_v9 = vadd.f32 %v4756_v48, %v6671_v7  ;;  %v3297_v14 = vpop.f32.mrb[167].mxu1  ;;  %v5184_v48 = vld [vmem:[%s5749_s8 + $0x70] sm:$0xff]   ;;  %s3614_s8 = scalar_lea.sflag [#allocation4], %s5743_s6 }
 0x4a8   : > { %4057 = vst [vmem:[%s6685_s19 + $0x30] sm:$0xff] %v4005_v6   ;;  %v3405_v31 = vadd.f32 %v3373_v11, %v3295_v44  ;;  %v3298_v46 = vadd.f32 %v6671_v7, %v3297_v14 }
 0x4a9   : > { %v3408_v8 = vadd.f32 %v3376_v56, %v3306_v9  ;;  %v3439_v26 = vmax.f32 %v3407_v28, 0.0  ;;  %v3387_v56 = vunpack.c.l.bf16 %v5183_v43  ;;  %v3385_v28 = vunpack.c.l.bf16 %v5184_v48 }
 0x4aa   : > { %v3406_v23 = vadd.f32 %v3374_v15, %v3298_v46  ;;  %v3437_v13 = vmax.f32 %v3405_v31, 0.0  ;;  %v3388_v46 = vunpack.c.h.bf16 %v5183_v43 }
 0x4ab   : > { %v3440_v30 = vmax.f32 %v3408_v8, 0.0 }
 0x4ac   : > { %v3438_v58 = vmax.f32 %v3406_v23, 0.0  ;;  %v4759_v59 = vpop.f32.mrb[168].mxu1 }
 0x4ad   : > { %v4020_v63 = vpack.c.bf16 %v3440_v30, %v3439_v26  ;;  %v3319_v19 = vadd.f32 %v4759_v59, %v6671_v7  ;;  %v3310_v3 = vpop.f32.mrb[169].mxu1  ;;  %v3386_v30 = vunpack.c.h.bf16 %v5184_v48 }
 0x4ae   : > { %v4015_v12 = vpack.c.bf16 %v3438_v58, %v3437_v13  ;;  %v3311_v61 = vadd.f32 %v6671_v7, %v3310_v3  ;;  %v4760_v1 = vpop.f32.mrb[170].mxu1 }
 0x4af   : > { %4060 = vst [vmem:[%s6685_s19 + $0x48] sm:$0xff] %v4020_v63   ;;  %v3411_v5 = vadd.f32 %v3379_v0, %v3319_v19  ;;  %v3322_v45 = vadd.f32 %v4760_v1, %v6671_v7  ;;  %v3313_v25 = vpop.f32.mrb[171].mxu1 }
 0x4b0   : > { %4059 = vst [vmem:[%s6685_s19 + $0x40] sm:$0xff] %v4015_v12   ;;  %v3409_v52 = vadd.f32 %v3377_v53, %v3311_v61  ;;  %v3314_v49 = vadd.f32 %v6671_v7, %v3313_v25 }
 0x4b1   : > { %v3412_v51 = vadd.f32 %v3380_v39, %v3322_v45  ;;  %v3443_v50 = vmax.f32 %v3411_v5, 0.0 }
 0x4b2   : > { %v3410_v36 = vadd.f32 %v3378_v55, %v3314_v49  ;;  %v3441_v37 = vmax.f32 %v3409_v52, 0.0 }
 0x4b3   : > { %v3444_v4 = vmax.f32 %v3412_v51, 0.0 }
 0x4b4   : > { %v3442_v60 = vmax.f32 %v3410_v36, 0.0  ;;  %v4763_v20 = vpop.f32.mrb[172].mxu1 }
 0x4b5   : > { %v4030_v34 = vpack.c.bf16 %v3444_v4, %v3443_v50  ;;  %v3335_v38 = vadd.f32 %v4763_v20, %v6671_v7  ;;  %v3326_v41 = vpop.f32.mrb[173].mxu1 }
 0x4b6   : > { %v4025_v29 = vpack.c.bf16 %v3442_v60, %v3441_v37  ;;  %v3327_v40 = vadd.f32 %v6671_v7, %v3326_v41  ;;  %v4764_v17 = vpop.f32.mrb[174].mxu1 }
 0x4b7   : > { %4062 = vst [vmem:[%s6685_s19 + $0x58] sm:$0xff] %v4030_v34   ;;  %v3415_v57 = vadd.f32 %v3383_v10, %v3335_v38  ;;  %v3338_v24 = vadd.f32 %v4764_v17, %v6671_v7  ;;  %v3329_v18 = vpop.f32.mrb[175].mxu1 }
 0x4b8   : > { %4061 = vst [vmem:[%s6685_s19 + $0x50] sm:$0xff] %v4025_v29   ;;  %v3413_v11 = vadd.f32 %v3381_v54, %v3327_v40  ;;  %v3330_v47 = vadd.f32 %v6671_v7, %v3329_v18 }
 0x4b9   : > { %v3416_v62 = vadd.f32 %v3384_v35, %v3338_v24  ;;  %v3447_v27 = vmax.f32 %v3415_v57, 0.0 }
 0x4ba   : > { %v3414_v16 = vadd.f32 %v3382_v32, %v3330_v47  ;;  %v3445_v15 = vmax.f32 %v3413_v11, 0.0 }
 0x4bb   : > { %v3448_v22 = vmax.f32 %v3416_v62, 0.0 }
 0x4bc   : > { %v3446_v6 = vmax.f32 %v3414_v16, 0.0  ;;  %v4767_v44 = vpop.f32.mrb[176].mxu1 }
 0x4bd   : > { %v4040_v9 = vpack.c.bf16 %v3448_v22, %v3447_v27  ;;  %v3351_v14 = vadd.f32 %v4767_v44, %v6671_v7  ;;  %v3342_v31 = vpop.f32.mrb[177].mxu1 }
 0x4be   : > { %v4035_v8 = vpack.c.bf16 %v3446_v6, %v3445_v15  ;;  %v3343_v23 = vadd.f32 %v6671_v7, %v3342_v31  ;;  %v4768_v26 = vpop.f32.mrb[178].mxu1 }
 0x4bf   : > { %4064 = vst [vmem:[%s6685_s19 + $0x68] sm:$0xff] %v4040_v9   ;;  %v3419_v21 = vadd.f32 %v3387_v56, %v3351_v14  ;;  %v3354_v0 = vadd.f32 %v4768_v26, %v6671_v7  ;;  %v3345_v13 = vpop.f32.mrb[179].mxu1 }
 0x4c0   : > { %4063 = vst [vmem:[%s6685_s19 + $0x60] sm:$0xff] %v4035_v8   ;;  %v3417_v58 = vadd.f32 %v3385_v28, %v3343_v23  ;;  %v3346_v59 = vadd.f32 %v6671_v7, %v3345_v13 }
 0x4c1   : > { %v3420_v2 = vadd.f32 %v3388_v46, %v3354_v0  ;;  %v3451_v63 = vmax.f32 %v3419_v21, 0.0 }
 0x4c2   : > { %v3418_v53 = vadd.f32 %v3386_v30, %v3346_v59  ;;  %v3449_v3 = vmax.f32 %v3417_v58, 0.0 }
 0x4c3   : > { %v3452_v19 = vmax.f32 %v3420_v2, 0.0 }
 0x4c4   : > { %v3450_v39 = vmax.f32 %v3418_v53, 0.0 }
 0x4c5   : > { %v4050_v12 = vpack.c.bf16 %v3452_v19, %v3451_v63 }
 0x4c6   : > { %v4045_v7 = vpack.c.bf16 %v3450_v39, %v3449_v3 }
 0x4c7   : > { %4066 = vst [vmem:[%s6685_s19 + $0x78] sm:$0xff] %v4050_v12  }
 0x4c8   : > { %4065 = vst [vmem:[%s6685_s19 + $0x70] sm:$0xff] %v4045_v7  }
 0x4c9   : > { %5342 = shalt.err (!%p5339_p11)
}
 0x4ca   : > { %s5343_s11 = scalar_lea.hbm %s6744_s23, 2048  ;;  %s5347_s21 = scalar_lea.hbm %s6854_s24, 4096 }
 0x4cb   : > { %p5344_p12 = scmp.ne.s32.totalorder %s6744_s23, %s5343_s11  ;;  %p5348_p9 = scmp.lt.u32.totalorder %s6744_s23, %s6854_s24 }
 0x4cc   : > { %p5349_p0 = scmp.lt.u32.totalorder %s5347_s21, %s5343_s11  ;;  %p5351_p4 = scmp.lt.u32.totalorder %s5343_s11, %s6744_s23 }
 0x4cd   : > { %p5345_p6 = pnand %p5344_p12, %p5636_p10 }
 0x4ce   : > { %p5350_p2 = por %p5349_p0, %p5348_p9 }
 0x4cf   : > { %p5346_p7 = pneg %p5345_p6 }
 0x4d0   : > { %p5352_p8 = por %p5351_p4, %p5350_p2 }
 0x4d2   : > { %p5353_p1 = pnand %p5352_p8, %p5346_p7 }
 0x4d4   : > { %5356 = shalt.err (!%p5353_p1)
}
 0x4d5   : > { %s5433_s19 = smov 64   ;;  %s5434_s17 = smov 4  }
 0x4d6   : > { %4961 = dma.vmem_to_hbm [thread:$0]  (%p5636_p10), %s6746_s22, 2048, %s6744_s23, %s3614_s8, %s5433_s19, %s5433_s19, %s5434_s17  }
 0x4d7 PF: > { %s6855_s2 = sld [smem:[#allocation17_spill]]  ;;  %s6856_s14 = sld [smem:[#allocation19_spill]] }
 0x4d8   : > { %p6858_p3 = scmp.ge.s32.totalorder %s5423_s10, 2 }
 0x4dd   : > { %s3645_s16 = sand.u32 1, %s6855_s2   ;;  %p6857_p13 = scmp.ne.s32.totalorder %s6856_s14, 0 }
 0x4de   : > { %s3646_s0 = scalar_lea.sflag [#allocation4], %s3645_s16 }
 0x4df   : > { %p4981_p5 = pnand %p6858_p3, %p6857_p13 }
 0x4e1   : > { %5398 = dma.done.wait (!%p4981_p5), %s3646_s0, 2048  }
 0x4e2   : > { %5400 = vsyncadd (!%p4981_p5), %s3646_s0, 4294965248  ;;  %s28_s10 = sadd.s32 1, %s5423_s10   ;;  %s6859_s27 = smov %s5407_s28 }
 0x4e3   : > { %p25_p11 = scmp.ge.s32.totalorder %s28_s10, 4   ;;  %s6860_s28 = smov %s5411_s29 }
 0x4e4   : > { %s6861_s29 = smov %s5651_s12  ;;  %s6862_s30 = smov %s5419_s9 }
 0x4e5   : > { %s6863_s9 = smov %s6865_s18  ;;  %27 = sbr.rel (!%p25_p11) target bundleno = 15 (0xf), region = 124 }
 0x4ec   :  { %3651 = vsyncpa [#allocation3], 1 }
 0x4ed   :  { %3653 = vsyncpa [#allocation3 + $0x1], 1 }
 0x4ee   :  { %3654 = vsyncpa [#allocation6], 1 }
 0x4ef   :  { %3656 = vsyncpa [#allocation6 + $0x1], 1 }
 0x4f0   :  { %3657 = vsyncpa [#allocation9], 1 }
 0x4f1   :  { %3658 = vsyncpa [#allocation4], 1 }
 0x4f2   :  { %3660 = vsyncpa [#allocation4 + $0x1], 1 }

</bundles_post_ra>
